<compile_context>
chip_gen: v7x
topology: tpu7x:2x2x1
jax: 0.10.0
libtpu: 0.0.40
codegen_flags: <defaults>
</compile_context>

<pallas_src>
import functools
import numpy as np
import jax
import jax.numpy as jnp
from jax import lax
from jax.experimental import pallas as pl
from jax.experimental.pallas import tpu as pltpu

F32 = jnp.float32
BF16 = jnp.bfloat16
NEG_INF = -1e9
VMEM_LIMIT = 48 * 1024 * 1024   # raised scoped-VMEM limit; headroom kept for v7x (64 MiB phys)


def _rmsnorm(x, w):
    # T5 LayerNorm: no mean subtraction, no bias; f32 math.
    var = jnp.mean(x * x, axis=-1, keepdims=True)
    return x * lax.rsqrt(var + 1e-6) * w


# ---------------------------------------------------------------------------
# Kernel 1: fused self-attention block (one grid step per batch)
#   RMSNorm -> one wide QKV matmul -> per-head softmax(QK^T + bias) -> one wide O matmul
#   -> +residual.  Weight layout: (D, 3*H*Dh) = [Q slab | K slab | V slab], head-major in slab.
# ---------------------------------------------------------------------------
def _self_attn_kernel(x_ref, ln_ref, wqkv_ref, wo_ref, pos_ref, mask_ref, o_ref,
                      ctx_sc, *, n_heads, d_kv):
    x = x_ref[0].astype(F32)                                         # (S, D)
    normed = _rmsnorm(x, ln_ref[...]).astype(BF16)                   # (S, D)
    # ONE lane-dense projection (N = 3*d_model) instead of H narrow per-head matmuls.
    qkv = jnp.dot(normed, wqkv_ref[...], preferred_element_type=F32)  # (S, 3*H*Dh) f32
    hd = n_heads * d_kv
    mask = mask_ref[0].astype(F32)                                    # (1, S)
    for h in range(n_heads):                                          # static unroll
        qh = qkv[:, h * d_kv:(h + 1) * d_kv].astype(BF16)
        kh = qkv[:, hd + h * d_kv: hd + (h + 1) * d_kv].astype(BF16)
        vh = qkv[:, 2 * hd + h * d_kv: 2 * hd + (h + 1) * d_kv].astype(BF16)
        # q @ k^T without materializing a transpose; T5 has no 1/sqrt(d_k) scaling.
        s = lax.dot_general(qh, kh, (((1,), (1,)), ((), ())),
                            preferred_element_type=F32)               # (S, S) f32
        s = s + pos_ref[h].astype(F32) + mask
        m = jnp.max(s, axis=-1, keepdims=True)
        p = jnp.exp(s - m)
        p = p * pl.reciprocal(jnp.sum(p, axis=-1, keepdims=True), approx=True)
        ctx_h = jnp.dot(p.astype(BF16), vh, preferred_element_type=F32)
        ctx_sc[:, h * d_kv:(h + 1) * d_kv] = ctx_h.astype(BF16)
    # ONE wide-K output projection: (S, H*Dh) @ (H*Dh, D) — head concat/sum done on the MXU.
    out = jnp.dot(ctx_sc[...], wo_ref[...], preferred_element_type=F32)
    o_ref[0] = (x + out).astype(o_ref.dtype)                          # residual folded in


def fused_self_attention(x, ln_w, wqkv, wo, pos_bias, mask_bias, cfg):
    B, S, D = x.shape
    H, Dh = cfg['n_heads'], cfg['d_kv']
    kern = functools.partial(_self_attn_kernel, n_heads=H, d_kv=Dh)
    return pl.pallas_call(
        kern,
        out_shape=jax.ShapeDtypeStruct((B, S, D), BF16),
        grid=(B,),
        in_specs=[
            pl.BlockSpec((1, S, D), lambda b: (b, 0, 0)),
            pl.BlockSpec((1, D), lambda b: (0, 0)),
            pl.BlockSpec((D, 3 * H * Dh), lambda b: (0, 0)),
            pl.BlockSpec((H * Dh, D), lambda b: (0, 0)),
            pl.BlockSpec((H, S, S), lambda b: (0, 0, 0)),      # bf16 pos/causal bias
            pl.BlockSpec((1, 1, S), lambda b: (b, 0, 0)),      # f32 padding-mask bias
        ],
        out_specs=pl.BlockSpec((1, S, D), lambda b: (b, 0, 0)),
        scratch_shapes=[pltpu.VMEM((S, H * Dh), BF16)],
        compiler_params=pltpu.CompilerParams(
            dimension_semantics=("parallel",), vmem_limit_bytes=VMEM_LIMIT),
    )(x.astype(BF16), ln_w.reshape(1, D).astype(F32), wqkv.astype(BF16),
      wo.astype(BF16), pos_bias.astype(BF16), mask_bias.astype(F32))


# ---------------------------------------------------------------------------
# Kernel 2: fused cross-attention block (encoder output arrives ALREADY final-normed, bf16)
# ---------------------------------------------------------------------------
def _cross_attn_kernel(x_ref, enc_ref, lnq_ref, wq_ref, wkv_ref, wo_ref, mask_ref,
                       o_ref, ctx_sc, *, n_heads, d_kv):
    x = x_ref[0].astype(F32)                                          # (Sd, D)
    e = enc_ref[0]                                                    # (Se, D) bf16, pre-normed
    nq = _rmsnorm(x, lnq_ref[...]).astype(BF16)
    q2d = jnp.dot(nq, wq_ref[...], preferred_element_type=F32)        # (Sd, H*Dh)
    kv2d = jnp.dot(e, wkv_ref[...], preferred_element_type=F32)       # (Se, 2*H*Dh)
    hd = n_heads * d_kv
    mask = mask_ref[0].astype(F32)                                     # (1, Se)
    for h in range(n_heads):
        qh = q2d[:, h * d_kv:(h + 1) * d_kv].astype(BF16)
        kh = kv2d[:, h * d_kv:(h + 1) * d_kv].astype(BF16)
        vh = kv2d[:, hd + h * d_kv: hd + (h + 1) * d_kv].astype(BF16)
        s = lax.dot_general(qh, kh, (((1,), (1,)), ((), ())),
                            preferred_element_type=F32)                # (Sd, Se)
        s = s + mask                                                    # no pos bias on cross-attn
        m = jnp.max(s, axis=-1, keepdims=True)
        p = jnp.exp(s - m)
        p = p * pl.reciprocal(jnp.sum(p, axis=-1, keepdims=True), approx=True)
        ctx_sc[:, h * d_kv:(h + 1) * d_kv] = jnp.dot(
            p.astype(BF16), vh, preferred_element_type=F32).astype(BF16)
    out = jnp.dot(ctx_sc[...], wo_ref[...], preferred_element_type=F32)
    o_ref[0] = (x + out).astype(o_ref.dtype)


def fused_cross_attention(x, enc_out, ln_q, p, mask_bias, cfg):
    B, Sd, D = x.shape
    Se = enc_out.shape[1]
    H, Dh = cfg['n_heads'], cfg['d_kv']
    kern = functools.partial(_cross_attn_kernel, n_heads=H, d_kv=Dh)
    return pl.pallas_call(
        kern,
        out_shape=jax.ShapeDtypeStruct((B, Sd, D), BF16),
        grid=(B,),
        in_specs=[
            pl.BlockSpec((1, Sd, D), lambda b: (b, 0, 0)),
            pl.BlockSpec((1, Se, D), lambda b: (b, 0, 0)),
            pl.BlockSpec((1, D), lambda b: (0, 0)),
            pl.BlockSpec((D, H * Dh), lambda b: (0, 0)),
            pl.BlockSpec((D, 2 * H * Dh), lambda b: (0, 0)),
            pl.BlockSpec((H * Dh, D), lambda b: (0, 0)),
            pl.BlockSpec((1, 1, Se), lambda b: (b, 0, 0)),
        ],
        out_specs=pl.BlockSpec((1, Sd, D), lambda b: (b, 0, 0)),
        scratch_shapes=[pltpu.VMEM((Sd, H * Dh), BF16)],
        compiler_params=pltpu.CompilerParams(
            dimension_semantics=("parallel",), vmem_limit_bytes=VMEM_LIMIT),
    )(x.astype(BF16), enc_out.astype(BF16), ln_q.reshape(1, D).astype(F32),
      p['wq'].astype(BF16), p['wkv'].astype(BF16), p['wo'].astype(BF16),
      mask_bias.astype(F32))


# ---------------------------------------------------------------------------
# Kernel 3: fused FFN block (RMSNorm -> dense-ReLU -> dense -> +residual)
#   Optionally also applies the encoder final RMSNorm (hoisted out of cross-attention).
# ---------------------------------------------------------------------------
def _ffn_kernel(x_ref, ln_ref, wi_ref, wo_ref, *rest, apply_final_ln):
    if apply_final_ln:
        fln_ref, o_ref = rest
    else:
        (o_ref,) = rest
    x = x_ref[...].astype(F32)                                        # (tr, D)
    normed = _rmsnorm(x, ln_ref[...]).astype(BF16)
    h = jnp.dot(normed, wi_ref[...], preferred_element_type=F32)
    h = jnp.maximum(h, 0.0).astype(BF16)                              # fused ReLU
    y = x + jnp.dot(h, wo_ref[...], preferred_element_type=F32)       # residual folded in
    if apply_final_ln:
        y = _rmsnorm(y, fln_ref[...])                                 # encoder final LN folded
    o_ref[...] = y.astype(o_ref.dtype)


def fused_ffn(x, ln_w, wi, wo, final_ln=None, *, row_tile=256):
    B, S, D = x.shape
    F_ = wi.shape[1]
    R = B * S
    tr = min(row_tile, R)
    R_pad = ((R + tr - 1) // tr) * tr
    xf = x.reshape(R, D).astype(BF16)
    if R_pad != R:
        xf = jnp.pad(xf, ((0, R_pad - R), (0, 0)))
    apply_fln = final_ln is not None
    kern = functools.partial(_ffn_kernel, apply_final_ln=apply_fln)
    in_specs = [pl.BlockSpec((tr, D), lambda r: (r, 0)),
                pl.BlockSpec((1, D), lambda r: (0, 0)),
                pl.BlockSpec((D, F_), lambda r: (0, 0)),
                pl.BlockSpec((F_, D), lambda r: (0, 0))]
    args = [xf, ln_w.reshape(1, D).astype(F32), wi.astype(BF16), wo.astype(BF16)]
    if apply_fln:
        in_specs.append(pl.BlockSpec((1, D), lambda r: (0, 0)))
        args.append(final_ln.reshape(1, D).astype(F32))
    out = pl.pallas_call(
        kern,
        out_shape=jax.ShapeDtypeStruct((R_pad, D), BF16),
        grid=(R_pad // tr,),
        in_specs=in_specs,
        out_specs=pl.BlockSpec((tr, D), lambda r: (r, 0)),
        compiler_params=pltpu.CompilerParams(
            dimension_semantics=("parallel",), vmem_limit_bytes=VMEM_LIMIT),
    )(*args)
    return out[:R].reshape(B, S, D)


# ---------------------------------------------------------------------------
# Kernel 4: fused lm_head + cross-entropy (vocab-tiled online logsumexp, bf16 logits out)
# ---------------------------------------------------------------------------
def _lmhead_ce_kernel(x_ref, ln_ref, emb_ref, lab_ref,
                      logits_ref, stats_ref,
                      xn_sc, m_sc, l_sc, t_sc, *, scale, tv, v_actual):
    j = pl.program_id(1)
    nv = pl.num_programs(1)

    @pl.when(j == 0)
    def _():
        x = x_ref[...].astype(F32)
        # decoder final RMSNorm + tied-embedding d_model**-0.5 scale folded in
        xn_sc[...] = (_rmsnorm(x, ln_ref[...]) * scale).astype(BF16)
        m_sc[...] = jnp.full_like(m_sc, -jnp.inf)
        l_sc[...] = jnp.zeros_like(l_sc)
        t_sc[...] = jnp.zeros_like(t_sc)

    # logits block = xn @ emb_block^T (contract last dims -> no HBM transpose of embed)
    logits = lax.dot_general(xn_sc[...], emb_ref[...],
                             dimension_numbers=(((1,), (1,)), ((), ())),
                             preferred_element_type=F32)              # (tn, tv) f32
    col = lax.broadcasted_iota(jnp.int32, logits.shape, 1) + j * tv
    logits = jnp.where(col < v_actual, logits, NEG_INF)               # mask padded vocab cols
    logits_ref[...] = logits.astype(logits_ref.dtype)                 # bf16 writeback

    labels = lab_ref[...]                                             # (tn, 1) int32
    t_sc[...] += jnp.sum(jnp.where(col == labels, logits, 0.0),
                         axis=-1, keepdims=True)
    m_new = jnp.maximum(m_sc[...], jnp.max(logits, axis=-1, keepdims=True))
    l_sc[...] = (l_sc[...] * jnp.exp(m_sc[...] - m_new)
                 + jnp.sum(jnp.exp(logits - m_new), axis=-1, keepdims=True))
    m_sc[...] = m_new

    @pl.when(j == nv - 1)
    def _():
        valid = labels != -100                                        # ignore_index = -100
        row_loss = jnp.where(valid, m_sc[...] + jnp.log(l_sc[...]) - t_sc[...], 0.0)
        valid_f = valid.astype(F32)
        lane = lax.broadcasted_iota(jnp.int32, stats_ref.shape, 1)
        # lane 0: per-token loss, lane 1: valid flag -> lane-dense 128-wide store
        stats_ref[...] = (jnp.where(lane == 0, row_loss, 0.0)
                          + jnp.where(lane == 1, valid_f, 0.0))


def lm_head_cross_entropy(dec_out, dec_final_ln, embed, labels, cfg,
                          *, row_tile=256, vocab_tile=512):
    B, S, D = dec_out.shape
    V = embed.shape[0]
    R = B * S
    tn = min(row_tile, R)
    tv = min(vocab_tile, V)
    R_pad = ((R + tn - 1) // tn) * tn
    V_pad = ((V + tv - 1) // tv) * tv

    xf = dec_out.reshape(R, D).astype(BF16)
    lab = labels.reshape(R, 1).astype(jnp.int32)
    if R_pad != R:
        xf = jnp.pad(xf, ((0, R_pad - R), (0, 0)))
        lab = jnp.pad(lab, ((0, R_pad - R), (0, 0)), constant_values=-100)
    emb = embed.astype(BF16)
    if V_pad != V:
        emb = jnp.pad(emb, ((0, V_pad - V), (0, 0)))

    scale = cfg['d_model'] ** -0.5
    kern = functools.partial(_lmhead_ce_kernel, scale=scale, tv=tv, v_actual=V)
    logits, stats = pl.pallas_call(
        kern,
        out_shape=(jax.ShapeDtypeStruct((R_pad, V_pad), BF16),
                   jax.ShapeDtypeStruct((R_pad, 128), F32)),
        grid=(R_pad // tn, V_pad // tv),
        in_specs=[pl.BlockSpec((tn, D), lambda i, j: (i, 0)),
                  pl.BlockSpec((1, D), lambda i, j: (0, 0)),
                  pl.BlockSpec((tv, D), lambda i, j: (j, 0)),
                  pl.BlockSpec((tn, 1), lambda i, j: (i, 0))],
        out_specs=(pl.BlockSpec((tn, tv), lambda i, j: (i, j)),
                   pl.BlockSpec((tn, 128), lambda i, j: (i, 0))),
        scratch_shapes=[pltpu.VMEM((tn, D), BF16),
                        pltpu.VMEM((tn, 1), F32),
                        pltpu.VMEM((tn, 1), F32),
                        pltpu.VMEM((tn, 1), F32)],
        compiler_params=pltpu.CompilerParams(
            dimension_semantics=("parallel", "arbitrary"),
            vmem_limit_bytes=VMEM_LIMIT),
    )(xf, dec_final_ln.reshape(1, D).astype(F32), emb, lab)
    loss = jnp.sum(stats[:, 0]) / jnp.maximum(jnp.sum(stats[:, 1]), 1.0)
    logits = logits[:R, :V].reshape(B, S, V)
    return loss, logits


# ---------------------------------------------------------------------------
# T5 glue (plain JAX): embedding gather, relative-position buckets, label shift
# ---------------------------------------------------------------------------
def _relative_position_bucket(rel_pos, bidirectional, num_buckets, max_distance):
    rb = jnp.zeros_like(rel_pos)
    if bidirectional:
        num_buckets //= 2
        rb = rb + (rel_pos > 0).astype(jnp.int32) * num_buckets
        rel_pos = jnp.abs(rel_pos)
    else:
        rel_pos = -jnp.minimum(rel_pos, 0)
    max_exact = num_buckets // 2
    is_small = rel_pos < max_exact
    rel_f = jnp.maximum(rel_pos, 1).astype(F32)
    large = max_exact + (jnp.log(rel_f / max_exact) / np.log(max_distance / max_exact)
                         * (num_buckets - max_exact)).astype(jnp.int32)
    large = jnp.minimum(large, num_buckets - 1)
    return rb + jnp.where(is_small, rel_pos, large)


def compute_position_bias(rel_emb, q_len, k_len, bidirectional, cfg):
    ctx = jnp.arange(q_len)[:, None]
    mem = jnp.arange(k_len)[None, :]
    buckets = _relative_position_bucket(mem - ctx, bidirectional,
                                        cfg['rel_buckets'], cfg['rel_max_dist'])
    values = jnp.take(rel_emb, buckets, axis=0)      # (q, k, H)
    return jnp.transpose(values, (2, 0, 1))          # (H, q, k)


def t5_encoder(params, ids, mask_bias, cfg):
    S = ids.shape[1]
    x = jnp.take(params['embed'], ids, axis=0).astype(BF16)              # (B, S, D)
    pos = compute_position_bias(params['enc_rel_bias'], S, S, True, cfg)  # (H, S, S)
    n = len(params['encoder'])
    for li, lp in enumerate(params['encoder']):
        sa = lp['self_attn']
        x = fused_self_attention(x, lp['ln_self'], sa['wqkv'], sa['wo'],
                                 pos, mask_bias, cfg)
        # encoder final RMSNorm is applied exactly once, folded into the last FFN kernel
        final_ln = params['enc_final_ln'] if li == n - 1 else None
        x = fused_ffn(x, lp['ln_ff'], lp['wi'], lp['wo'], final_ln=final_ln)
    return x   # bf16, already final-normed -> cross-attention consumes it directly


def t5_decoder(params, dec_ids, enc_out, enc_mask_bias, cfg):
    B, Sd = dec_ids.shape
    x = jnp.take(params['embed'], dec_ids, axis=0).astype(BF16)
    pos = compute_position_bias(params['dec_rel_bias'], Sd, Sd, False, cfg)  # (H,Sd,Sd)
    causal = jnp.where(jnp.arange(Sd)[None, :] > jnp.arange(Sd)[:, None], NEG_INF, 0.0)
    self_bias = (pos + causal[None]).astype(BF16)        # bf16 (H,Sd,Sd), no (B,H,..) bcast
    zero_mask = jnp.zeros((B, 1, Sd), F32)
    for lp in params['decoder']:
        sa = lp['self_attn']
        x = fused_self_attention(x, lp['ln_self'], sa['wqkv'], sa['wo'],
                                 self_bias, zero_mask, cfg)
        x = fused_cross_attention(x, enc_out, lp['ln_cross'], lp['cross_attn'],
                                  enc_mask_bias, cfg)
        x = fused_ffn(x, lp['ln_ff'], lp['wi'], lp['wo'])
    return x   # decoder final RMSNorm is folded into the lm_head+CE kernel


def ditto_forward(params, x1_ids, x1_mask, y, cfg):
    """out = T5ForConditionalGeneration(input_ids=x1, attention_mask=x1_mask, labels=y)
       Returns (loss, lm_logits)."""
    B = y.shape[0]
    # shift labels right -> decoder_input_ids (decoder_start_token_id = pad = 0)
    dec_ids = jnp.concatenate([jnp.zeros((B, 1), dtype=y.dtype), y[:, :-1]], axis=1)
    dec_ids = jnp.where(dec_ids == -100, 0, dec_ids)

    enc_mask_bias = (1.0 - x1_mask.astype(F32))[:, None, :] * NEG_INF   # (B, 1, Se)
    enc_out = t5_encoder(params, x1_ids, enc_mask_bias, cfg)
    dec_out = t5_decoder(params, dec_ids, enc_out, enc_mask_bias, cfg)
    loss, logits = lm_head_cross_entropy(dec_out, params['dec_final_ln'],
                                         params['embed'], y, cfg)
    return loss, logits


# ---------------------------------------------------------------------------
# deterministic init
# fused weight layouts: wqkv (D, 3*H*Dh) = [Q|K|V] slabs, wkv (D, 2*H*Dh) = [K|V],
#                       wq (D, H*Dh), wo (H*Dh, D)
# ---------------------------------------------------------------------------
def init_params(key, cfg):
    D, H, Dh, F_, V = cfg['d_model'], cfg['n_heads'], cfg['d_kv'], cfg['d_ff'], cfg['vocab']
    keys = iter(jax.random.split(key, 128))

    def w(shape, scale=0.05):
        return jax.random.normal(next(keys), shape, F32) * scale

    def self_attn():
        return {'wqkv': w((D, 3 * H * Dh)), 'wo': w((H * Dh, D))}

    def cross_attn():
        return {'wq': w((D, H * Dh)), 'wkv': w((D, 2 * H * Dh)), 'wo': w((H * Dh, D))}

    def block(cross):
        p = {'ln_self': jnp.ones((D,), F32), 'self_attn': self_attn(),
             'ln_ff': jnp.ones((D,), F32), 'wi': w((D, F_)), 'wo': w((F_, D))}
        if cross:
            p['ln_cross'] = jnp.ones((D,), F32)
            p['cross_attn'] = cross_attn()
        return p

    return {
        'embed': w((V, D), 1.0),
        'enc_rel_bias': w((cfg['rel_buckets'], H), 0.1),
        'dec_rel_bias': w((cfg['rel_buckets'], H), 0.1),
        'encoder': [block(False) for _ in range(cfg['n_layers'])],
        'decoder': [block(True) for _ in range(cfg['n_layers'])],
        'enc_final_ln': jnp.ones((D,), F32),
        'dec_final_ln': jnp.ones((D,), F32),
    }


# ---------------------------------------------------------------------------
# main
# ---------------------------------------------------------------------------
if __name__ == "__main__":
    cfg = dict(vocab=256, d_model=64, n_heads=4, d_kv=16, d_ff=128, n_layers=2,
               rel_buckets=32, rel_max_dist=128)
    key = jax.random.PRNGKey(0)
    kp, ki, ky = jax.random.split(key, 3)
    params = init_params(kp, cfg)

    B, S_enc, S_dec = 2, 8, 8
    x1_ids = jax.random.randint(ki, (B, S_enc), 0, cfg['vocab'], dtype=jnp.int32)
    x1_mask = jnp.concatenate([jnp.ones((B, 6), jnp.int32),
                               jnp.zeros((B, 2), jnp.int32)], axis=1)
    y = jax.random.randint(ky, (B, S_dec), 0, cfg['vocab'], dtype=jnp.int32)
    y = y.at[:, -1].set(-100)   # exercise ignore_index=-100 handling in the fused CE

    fwd = jax.jit(functools.partial(ditto_forward, cfg=cfg))
    loss, logits = fwd(params, x1_ids, x1_mask, y)
    jax.block_until_ready((loss, logits))

    assert logits.shape == (B, S_dec, cfg['vocab'])
    assert bool(jnp.isfinite(loss))
    print("KERNEL_OK")
</pallas_src>

<mosaic_0001>
module attributes {stable_mosaic.version = 11 : i64} {
  func.func @_ffn_kernel(%arg0: i32, %arg1: memref<16x64xbf16, #tpu.memory_space<vmem>>, %arg2: memref<1x64xf32, #tpu.memory_space<vmem>>, %arg3: memref<64x128xbf16, #tpu.memory_space<vmem>>, %arg4: memref<128x64xbf16, #tpu.memory_space<vmem>>, %arg5: memref<16x64xbf16, #tpu.memory_space<vmem>>) attributes {dimension_semantics = [#tpu.dimension_semantics<parallel>], iteration_bounds = array<i64: 1>, scalar_prefetch = 0 : i64, scratch_operands = 0 : i64, tpu.core_type = #tpu.core_type<tc>, window_params = [{transform_indices = @transform_0, window_bounds = array<i64: 16, 64>}, {pipeline_mode = #tpu.pipeline_mode<synchronous>, transform_indices = @transform_1, window_bounds = array<i64: 1, 64>}, {pipeline_mode = #tpu.pipeline_mode<synchronous>, transform_indices = @transform_2, window_bounds = array<i64: 64, 128>}, {pipeline_mode = #tpu.pipeline_mode<synchronous>, transform_indices = @transform_3, window_bounds = array<i64: 128, 64>}, {transform_indices = @transform_4, window_bounds = array<i64: 16, 64>}]} {
    %c0 = arith.constant 0 : index
    %c0_0 = arith.constant 0 : index
    %0 = vector.load %arg1[%c0, %c0_0] : memref<16x64xbf16, #tpu.memory_space<vmem>>, vector<16x64xbf16>
    %1 = arith.extf %0 : vector<16x64xbf16> to vector<16x64xf32>
    %c0_1 = arith.constant 0 : index
    %c0_2 = arith.constant 0 : index
    %2 = vector.load %arg2[%c0_1, %c0_2] : memref<1x64xf32, #tpu.memory_space<vmem>>, vector<1x64xf32>
    %3 = arith.mulf %1, %1 : vector<16x64xf32>
    %cst = arith.constant dense<0.000000e+00> : vector<16xf32>
    %4 = vector.multi_reduction <add>, %3, %cst [1] : vector<16x64xf32> to vector<16xf32>
    %5 = vector.shape_cast %4 : vector<16xf32> to vector<16x1xf32>
    %cst_3 = arith.constant 6.400000e+01 : f32
    %6 = vector.broadcast %cst_3 : f32 to vector<16x1xf32>
    %7 = arith.divf %5, %6 : vector<16x1xf32>
    %cst_4 = arith.constant 9.99999997E-7 : f32
    %8 = vector.broadcast %cst_4 : f32 to vector<16x1xf32>
    %9 = arith.addf %7, %8 : vector<16x1xf32>
    %10 = math.rsqrt %9 : vector<16x1xf32>
    %11 = vector.broadcast %10 : vector<16x1xf32> to vector<16x64xf32>
    %12 = arith.mulf %1, %11 : vector<16x64xf32>
    %13 = vector.broadcast %2 : vector<1x64xf32> to vector<16x64xf32>
    %14 = arith.mulf %12, %13 : vector<16x64xf32>
    %15 = arith.truncf %14 : vector<16x64xf32> to vector<16x64xbf16>
    %c0_5 = arith.constant 0 : index
    %c0_6 = arith.constant 0 : index
    %16 = vector.load %arg3[%c0_5, %c0_6] : memref<64x128xbf16, #tpu.memory_space<vmem>>, vector<64x128xbf16>
    %cst_7 = arith.constant dense<0.000000e+00> : vector<16x128xf32>
    %17 = tpu.matmul %15, %16, %cst_7 {dimension_numbers = #tpu.dot_dimension_numbers<[1], [0], [0], [1], [0, 0, 1, 1], [], []>} : vector<16x64xbf16>, vector<64x128xbf16>, vector<16x128xf32> -> vector<16x128xf32>
    %cst_8 = arith.constant 0.000000e+00 : f32
    %18 = vector.broadcast %cst_8 : f32 to vector<16x128xf32>
    %19 = arith.maximumf %17, %18 : vector<16x128xf32>
    %20 = arith.truncf %19 : vector<16x128xf32> to vector<16x128xbf16>
    %c0_9 = arith.constant 0 : index
    %c0_10 = arith.constant 0 : index
    %21 = vector.load %arg4[%c0_9, %c0_10] : memref<128x64xbf16, #tpu.memory_space<vmem>>, vector<128x64xbf16>
    %cst_11 = arith.constant dense<0.000000e+00> : vector<16x64xf32>
    %22 = tpu.matmul %20, %21, %cst_11 {dimension_numbers = #tpu.dot_dimension_numbers<[1], [0], [0], [1], [0, 0, 1, 1], [], []>} : vector<16x128xbf16>, vector<128x64xbf16>, vector<16x64xf32> -> vector<16x64xf32>
    %23 = arith.addf %1, %22 : vector<16x64xf32>
    %24 = arith.truncf %23 : vector<16x64xf32> to vector<16x64xbf16>
    %c0_12 = arith.constant 0 : index
    %c0_13 = arith.constant 0 : index
    %25 = vector.load %arg5[%c0_12, %c0_13] : memref<16x64xbf16, #tpu.memory_space<vmem>>, vector<16x64xbf16>
    tpu.vector_store %arg5[%c0_12, %c0_13], %24 {strides = array<i32>} : memref<16x64xbf16, #tpu.memory_space<vmem>>, vector<16x64xbf16>,
    return
  }
  func.func @transform_0(%arg0: i32) -> (i32, i32) {
    %c0_i32 = arith.constant 0 : i32
    %c0_i32_0 = arith.constant 0 : i32
    return %arg0, %c0_i32 : i32, i32
  }
  func.func @transform_1(%arg0: i32) -> (i32, i32) {
    %c0_i32 = arith.constant 0 : i32
    %c0_i32_0 = arith.constant 0 : i32
    %c0_i32_1 = arith.constant 0 : i32
    return %c0_i32, %c0_i32_0 : i32, i32
  }
  func.func @transform_2(%arg0: i32) -> (i32, i32) {
    %c0_i32 = arith.constant 0 : i32
    %c0_i32_0 = arith.constant 0 : i32
    %c0_i32_1 = arith.constant 0 : i32
    return %c0_i32, %c0_i32_0 : i32, i32
  }
  func.func @transform_3(%arg0: i32) -> (i32, i32) {
    %c0_i32 = arith.constant 0 : i32
    %c0_i32_0 = arith.constant 0 : i32
    %c0_i32_1 = arith.constant 0 : i32
    return %c0_i32, %c0_i32_0 : i32, i32
  }
  func.func @transform_4(%arg0: i32) -> (i32, i32) {
    %c0_i32 = arith.constant 0 : i32
    %c0_i32_0 = arith.constant 0 : i32
    return %arg0, %c0_i32 : i32, i32
  }
}

module attributes {stable_mosaic.version = 11 : i64} {
  func.func @_self_attn_kernel(%arg0: i32, %arg1: memref<1x8x64xbf16, #tpu.memory_space<vmem>>, %arg2: memref<1x64xf32, #tpu.memory_space<vmem>>, %arg3: memref<64x192xbf16, #tpu.memory_space<vmem>>, %arg4: memref<64x64xbf16, #tpu.memory_space<vmem>>, %arg5: memref<4x8x8xbf16, #tpu.memory_space<vmem>>, %arg6: memref<1x1x8xf32, #tpu.memory_space<vmem>>, %arg7: memref<1x8x64xbf16, #tpu.memory_space<vmem>>, %arg8: memref<8x64xbf16, #tpu.memory_space<vmem>>) attributes {dimension_semantics = [#tpu.dimension_semantics<parallel>], iteration_bounds = array<i64: 2>, scalar_prefetch = 0 : i64, scratch_operands = 1 : i64, tpu.core_type = #tpu.core_type<tc>, window_params = [{transform_indices = @transform_0, window_bounds = array<i64: 1, 8, 64>}, {pipeline_mode = #tpu.pipeline_mode<synchronous>, transform_indices = @transform_1, window_bounds = array<i64: 1, 64>}, {pipeline_mode = #tpu.pipeline_mode<synchronous>, transform_indices = @transform_2, window_bounds = array<i64: 64, 192>}, {pipeline_mode = #tpu.pipeline_mode<synchronous>, transform_indices = @transform_3, window_bounds = array<i64: 64, 64>}, {pipeline_mode = #tpu.pipeline_mode<synchronous>, transform_indices = @transform_4, window_bounds = array<i64: 4, 8, 8>}, {transform_indices = @transform_5, window_bounds = array<i64: 1, 1, 8>}, {transform_indices = @transform_6, window_bounds = array<i64: 1, 8, 64>}]} {
    %c0 = arith.constant 0 : index
    %c0_0 = arith.constant 0 : index
    %c0_1 = arith.constant 0 : index
    %0 = vector.load %arg1[%c0, %c0_0, %c0_1] : memref<1x8x64xbf16, #tpu.memory_space<vmem>>, vector<1x8x64xbf16>
    %1 = vector.shape_cast %0 : vector<1x8x64xbf16> to vector<8x64xbf16>
    %2 = arith.extf %1 : vector<8x64xbf16> to vector<8x64xf32>
    %c0_2 = arith.constant 0 : index
    %c0_3 = arith.constant 0 : index
    %3 = vector.load %arg2[%c0_2, %c0_3] : memref<1x64xf32, #tpu.memory_space<vmem>>, vector<1x64xf32>
    %4 = arith.mulf %2, %2 : vector<8x64xf32>
    %cst = arith.constant dense<0.000000e+00> : vector<8xf32>
    %5 = vector.multi_reduction <add>, %4, %cst [1] : vector<8x64xf32> to vector<8xf32>
    %6 = vector.shape_cast %5 : vector<8xf32> to vector<8x1xf32>
    %cst_4 = arith.constant 6.400000e+01 : f32
    %7 = vector.broadcast %cst_4 : f32 to vector<8x1xf32>
    %8 = arith.divf %6, %7 : vector<8x1xf32>
    %cst_5 = arith.constant 9.99999997E-7 : f32
    %9 = vector.broadcast %cst_5 : f32 to vector<8x1xf32>
    %10 = arith.addf %8, %9 : vector<8x1xf32>
    %11 = math.rsqrt %10 : vector<8x1xf32>
    %12 = vector.broadcast %11 : vector<8x1xf32> to vector<8x64xf32>
    %13 = arith.mulf %2, %12 : vector<8x64xf32>
    %14 = vector.broadcast %3 : vector<1x64xf32> to vector<8x64xf32>
    %15 = arith.mulf %13, %14 : vector<8x64xf32>
    %16 = arith.truncf %15 : vector<8x64xf32> to vector<8x64xbf16>
    %c0_6 = arith.constant 0 : index
    %c0_7 = arith.constant 0 : index
    %17 = vector.load %arg3[%c0_6, %c0_7] : memref<64x192xbf16, #tpu.memory_space<vmem>>, vector<64x192xbf16>
    %cst_8 = arith.constant dense<0.000000e+00> : vector<8x192xf32>
    %18 = tpu.matmul %16, %17, %cst_8 {dimension_numbers = #tpu.dot_dimension_numbers<[1], [0], [0], [1], [0, 0, 1, 1], [], []>} : vector<8x64xbf16>, vector<64x192xbf16>, vector<8x192xf32> -> vector<8x192xf32>
    %c0_9 = arith.constant 0 : index
    %c0_10 = arith.constant 0 : index
    %c0_11 = arith.constant 0 : index
    %19 = vector.load %arg6[%c0_9, %c0_10, %c0_11] : memref<1x1x8xf32, #tpu.memory_space<vmem>>, vector<1x1x8xf32>
    %20 = vector.shape_cast %19 : vector<1x1x8xf32> to vector<1x8xf32>
    %21 = vector.extract_strided_slice %18 {offsets = [0, 0], sizes = [8, 16], strides = [1, 1]} : vector<8x192xf32> to vector<8x16xf32>
    %22 = arith.truncf %21 : vector<8x16xf32> to vector<8x16xbf16>
    %23 = vector.extract_strided_slice %18 {offsets = [0, 64], sizes = [8, 16], strides = [1, 1]} : vector<8x192xf32> to vector<8x16xf32>
    %24 = arith.truncf %23 : vector<8x16xf32> to vector<8x16xbf16>
    %25 = vector.extract_strided_slice %18 {offsets = [0, 128], sizes = [8, 16], strides = [1, 1]} : vector<8x192xf32> to vector<8x16xf32>
    %26 = arith.truncf %25 : vector<8x16xf32> to vector<8x16xbf16>
    %cst_12 = arith.constant dense<0.000000e+00> : vector<8x8xf32>
    %27 = tpu.matmul %22, %24, %cst_12 {dimension_numbers = #tpu.dot_dimension_numbers<[1], [1], [0], [0], [0, 0, 1, 0], [], []>} : vector<8x16xbf16>, vector<8x16xbf16>, vector<8x8xf32> -> vector<8x8xf32>
    %c0_13 = arith.constant 0 : index
    %c0_14 = arith.constant 0 : index
    %c0_15 = arith.constant 0 : index
    %28 = vector.load %arg5[%c0_13, %c0_14, %c0_15] : memref<4x8x8xbf16, #tpu.memory_space<vmem>>, vector<1x8x8xbf16>
    %29 = vector.shape_cast %28 : vector<1x8x8xbf16> to vector<8x8xbf16>
    %30 = arith.extf %29 : vector<8x8xbf16> to vector<8x8xf32>
    %31 = arith.addf %27, %30 : vector<8x8xf32>
    %32 = vector.broadcast %20 : vector<1x8xf32> to vector<8x8xf32>
    %33 = arith.addf %31, %32 : vector<8x8xf32>
    %cst_16 = arith.constant dense<0xFF800000> : vector<8xf32>
    %34 = vector.multi_reduction <maximumf>, %33, %cst_16 [1] : vector<8x8xf32> to vector<8xf32>
    %35 = vector.shape_cast %34 : vector<8xf32> to vector<8x1xf32>
    %36 = vector.broadcast %35 : vector<8x1xf32> to vector<8x8xf32>
    %37 = arith.subf %33, %36 : vector<8x8xf32>
    %38 = math.exp %37 : vector<8x8xf32>
    %cst_17 = arith.constant dense<0.000000e+00> : vector<8xf32>
    %39 = vector.multi_reduction <add>, %38, %cst_17 [1] : vector<8x8xf32> to vector<8xf32>
    %40 = vector.shape_cast %39 : vector<8xf32> to vector<8x1xf32>
    %41 = tpu.reciprocal %40 {approx = true} : vector<8x1xf32> -> vector<8x1xf32>
    %42 = vector.broadcast %41 : vector<8x1xf32> to vector<8x8xf32>
    %43 = arith.mulf %38, %42 : vector<8x8xf32>
    %44 = arith.truncf %43 : vector<8x8xf32> to vector<8x8xbf16>
    %cst_18 = arith.constant dense<0.000000e+00> : vector<8x16xf32>
    %45 = tpu.matmul %44, %26, %cst_18 {dimension_numbers = #tpu.dot_dimension_numbers<[1], [0], [0], [1], [0, 0, 1, 1], [], []>} : vector<8x8xbf16>, vector<8x16xbf16>, vector<8x16xf32> -> vector<8x16xf32>
    %46 = arith.truncf %45 : vector<8x16xf32> to vector<8x16xbf16>
    %c0_19 = arith.constant 0 : index
    %c0_20 = arith.constant 0 : index
    %47 = vector.load %arg8[%c0_19, %c0_20] : memref<8x64xbf16, #tpu.memory_space<vmem>>, vector<8x16xbf16>
    tpu.vector_store %arg8[%c0_19, %c0_20], %46 {strides = array<i32>} : memref<8x64xbf16, #tpu.memory_space<vmem>>, vector<8x16xbf16>,
    %48 = vector.extract_strided_slice %18 {offsets = [0, 16], sizes = [8, 16], strides = [1, 1]} : vector<8x192xf32> to vector<8x16xf32>
    %49 = arith.truncf %48 : vector<8x16xf32> to vector<8x16xbf16>
    %50 = vector.extract_strided_slice %18 {offsets = [0, 80], sizes = [8, 16], strides = [1, 1]} : vector<8x192xf32> to vector<8x16xf32>
    %51 = arith.truncf %50 : vector<8x16xf32> to vector<8x16xbf16>
    %52 = vector.extract_strided_slice %18 {offsets = [0, 144], sizes = [8, 16], strides = [1, 1]} : vector<8x192xf32> to vector<8x16xf32>
    %53 = arith.truncf %52 : vector<8x16xf32> to vector<8x16xbf16>
    %cst_21 = arith.constant dense<0.000000e+00> : vector<8x8xf32>
    %54 = tpu.matmul %49, %51, %cst_21 {dimension_numbers = #tpu.dot_dimension_numbers<[1], [1], [0], [0], [0, 0, 1, 0], [], []>} : vector<8x16xbf16>, vector<8x16xbf16>, vector<8x8xf32> -> vector<8x8xf32>
    %c1 = arith.constant 1 : index
    %c0_22 = arith.constant 0 : index
    %c0_23 = arith.constant 0 : index
    %55 = vector.load %arg5[%c1, %c0_22, %c0_23] : memref<4x8x8xbf16, #tpu.memory_space<vmem>>, vector<1x8x8xbf16>
    %56 = vector.shape_cast %55 : vector<1x8x8xbf16> to vector<8x8xbf16>
    %57 = arith.extf %56 : vector<8x8xbf16> to vector<8x8xf32>
    %58 = arith.addf %54, %57 : vector<8x8xf32>
    %59 = vector.broadcast %20 : vector<1x8xf32> to vector<8x8xf32>
    %60 = arith.addf %58, %59 : vector<8x8xf32>
    %cst_24 = arith.constant dense<0xFF800000> : vector<8xf32>
    %61 = vector.multi_reduction <maximumf>, %60, %cst_24 [1] : vector<8x8xf32> to vector<8xf32>
    %62 = vector.shape_cast %61 : vector<8xf32> to vector<8x1xf32>
    %63 = vector.broadcast %62 : vector<8x1xf32> to vector<8x8xf32>
    %64 = arith.subf %60, %63 : vector<8x8xf32>
    %65 = math.exp %64 : vector<8x8xf32>
    %cst_25 = arith.constant dense<0.000000e+00> : vector<8xf32>
    %66 = vector.multi_reduction <add>, %65, %cst_25 [1] : vector<8x8xf32> to vector<8xf32>
    %67 = vector.shape_cast %66 : vector<8xf32> to vector<8x1xf32>
    %68 = tpu.reciprocal %67 {approx = true} : vector<8x1xf32> -> vector<8x1xf32>
    %69 = vector.broadcast %68 : vector<8x1xf32> to vector<8x8xf32>
    %70 = arith.mulf %65, %69 : vector<8x8xf32>
    %71 = arith.truncf %70 : vector<8x8xf32> to vector<8x8xbf16>
    %cst_26 = arith.constant dense<0.000000e+00> : vector<8x16xf32>
    %72 = tpu.matmul %71, %53, %cst_26 {dimension_numbers = #tpu.dot_dimension_numbers<[1], [0], [0], [1], [0, 0, 1, 1], [], []>} : vector<8x8xbf16>, vector<8x16xbf16>, vector<8x16xf32> -> vector<8x16xf32>
    %73 = arith.truncf %72 : vector<8x16xf32> to vector<8x16xbf16>
    %c0_27 = arith.constant 0 : index
    %c16 = arith.constant 16 : index
    %74 = vector.load %arg8[%c0_27, %c16] : memref<8x64xbf16, #tpu.memory_space<vmem>>, vector<8x16xbf16>
    tpu.vector_store %arg8[%c0_27, %c16], %73 {strides = array<i32>} : memref<8x64xbf16, #tpu.memory_space<vmem>>, vector<8x16xbf16>,
    %75 = vector.extract_strided_slice %18 {offsets = [0, 32], sizes = [8, 16], strides = [1, 1]} : vector<8x192xf32> to vector<8x16xf32>
    %76 = arith.truncf %75 : vector<8x16xf32> to vector<8x16xbf16>
    %77 = vector.extract_strided_slice %18 {offsets = [0, 96], sizes = [8, 16], strides = [1, 1]} : vector<8x192xf32> to vector<8x16xf32>
    %78 = arith.truncf %77 : vector<8x16xf32> to vector<8x16xbf16>
    %79 = vector.extract_strided_slice %18 {offsets = [0, 160], sizes = [8, 16], strides = [1, 1]} : vector<8x192xf32> to vector<8x16xf32>
    %80 = arith.truncf %79 : vector<8x16xf32> to vector<8x16xbf16>
    %cst_28 = arith.constant dense<0.000000e+00> : vector<8x8xf32>
    %81 = tpu.matmul %76, %78, %cst_28 {dimension_numbers = #tpu.dot_dimension_numbers<[1], [1], [0], [0], [0, 0, 1, 0], [], []>} : vector<8x16xbf16>, vector<8x16xbf16>, vector<8x8xf32> -> vector<8x8xf32>
    %c2 = arith.constant 2 : index
    %c0_29 = arith.constant 0 : index
    %c0_30 = arith.constant 0 : index
    %82 = vector.load %arg5[%c2, %c0_29, %c0_30] : memref<4x8x8xbf16, #tpu.memory_space<vmem>>, vector<1x8x8xbf16>
    %83 = vector.shape_cast %82 : vector<1x8x8xbf16> to vector<8x8xbf16>
    %84 = arith.extf %83 : vector<8x8xbf16> to vector<8x8xf32>
    %85 = arith.addf %81, %84 : vector<8x8xf32>
    %86 = vector.broadcast %20 : vector<1x8xf32> to vector<8x8xf32>
    %87 = arith.addf %85, %86 : vector<8x8xf32>
    %cst_31 = arith.constant dense<0xFF800000> : vector<8xf32>
    %88 = vector.multi_reduction <maximumf>, %87, %cst_31 [1] : vector<8x8xf32> to vector<8xf32>
    %89 = vector.shape_cast %88 : vector<8xf32> to vector<8x1xf32>
    %90 = vector.broadcast %89 : vector<8x1xf32> to vector<8x8xf32>
    %91 = arith.subf %87, %90 : vector<8x8xf32>
    %92 = math.exp %91 : vector<8x8xf32>
    %cst_32 = arith.constant dense<0.000000e+00> : vector<8xf32>
    %93 = vector.multi_reduction <add>, %92, %cst_32 [1] : vector<8x8xf32> to vector<8xf32>
    %94 = vector.shape_cast %93 : vector<8xf32> to vector<8x1xf32>
    %95 = tpu.reciprocal %94 {approx = true} : vector<8x1xf32> -> vector<8x1xf32>
    %96 = vector.broadcast %95 : vector<8x1xf32> to vector<8x8xf32>
    %97 = arith.mulf %92, %96 : vector<8x8xf32>
    %98 = arith.truncf %97 : vector<8x8xf32> to vector<8x8xbf16>
    %cst_33 = arith.constant dense<0.000000e+00> : vector<8x16xf32>
    %99 = tpu.matmul %98, %80, %cst_33 {dimension_numbers = #tpu.dot_dimension_numbers<[1], [0], [0], [1], [0, 0, 1, 1], [], []>} : vector<8x8xbf16>, vector<8x16xbf16>, vector<8x16xf32> -> vector<8x16xf32>
    %100 = arith.truncf %99 : vector<8x16xf32> to vector<8x16xbf16>
    %c0_34 = arith.constant 0 : index
    %c32 = arith.constant 32 : index
    %101 = vector.load %arg8[%c0_34, %c32] : memref<8x64xbf16, #tpu.memory_space<vmem>>, vector<8x16xbf16>
    tpu.vector_store %arg8[%c0_34, %c32], %100 {strides = array<i32>} : memref<8x64xbf16, #tpu.memory_space<vmem>>, vector<8x16xbf16>,
    %102 = vector.extract_strided_slice %18 {offsets = [0, 48], sizes = [8, 16], strides = [1, 1]} : vector<8x192xf32> to vector<8x16xf32>
    %103 = arith.truncf %102 : vector<8x16xf32> to vector<8x16xbf16>
    %104 = vector.extract_strided_slice %18 {offsets = [0, 112], sizes = [8, 16], strides = [1, 1]} : vector<8x192xf32> to vector<8x16xf32>
    %105 = arith.truncf %104 : vector<8x16xf32> to vector<8x16xbf16>
    %106 = vector.extract_strided_slice %18 {offsets = [0, 176], sizes = [8, 16], strides = [1, 1]} : vector<8x192xf32> to vector<8x16xf32>
    %107 = arith.truncf %106 : vector<8x16xf32> to vector<8x16xbf16>
    %cst_35 = arith.constant dense<0.000000e+00> : vector<8x8xf32>
    %108 = tpu.matmul %103, %105, %cst_35 {dimension_numbers = #tpu.dot_dimension_numbers<[1], [1], [0], [0], [0, 0, 1, 0], [], []>} : vector<8x16xbf16>, vector<8x16xbf16>, vector<8x8xf32> -> vector<8x8xf32>
    %c3 = arith.constant 3 : index
    %c0_36 = arith.constant 0 : index
    %c0_37 = arith.constant 0 : index
    %109 = vector.load %arg5[%c3, %c0_36, %c0_37] : memref<4x8x8xbf16, #tpu.memory_space<vmem>>, vector<1x8x8xbf16>
    %110 = vector.shape_cast %109 : vector<1x8x8xbf16> to vector<8x8xbf16>
    %111 = arith.extf %110 : vector<8x8xbf16> to vector<8x8xf32>
    %112 = arith.addf %108, %111 : vector<8x8xf32>
    %113 = vector.broadcast %20 : vector<1x8xf32> to vector<8x8xf32>
    %114 = arith.addf %112, %113 : vector<8x8xf32>
    %cst_38 = arith.constant dense<0xFF800000> : vector<8xf32>
    %115 = vector.multi_reduction <maximumf>, %114, %cst_38 [1] : vector<8x8xf32> to vector<8xf32>
    %116 = vector.shape_cast %115 : vector<8xf32> to vector<8x1xf32>
    %117 = vector.broadcast %116 : vector<8x1xf32> to vector<8x8xf32>
    %118 = arith.subf %114, %117 : vector<8x8xf32>
    %119 = math.exp %118 : vector<8x8xf32>
    %cst_39 = arith.constant dense<0.000000e+00> : vector<8xf32>
    %120 = vector.multi_reduction <add>, %119, %cst_39 [1] : vector<8x8xf32> to vector<8xf32>
    %121 = vector.shape_cast %120 : vector<8xf32> to vector<8x1xf32>
    %122 = tpu.reciprocal %121 {approx = true} : vector<8x1xf32> -> vector<8x1xf32>
    %123 = vector.broadcast %122 : vector<8x1xf32> to vector<8x8xf32>
    %124 = arith.mulf %119, %123 : vector<8x8xf32>
    %125 = arith.truncf %124 : vector<8x8xf32> to vector<8x8xbf16>
    %cst_40 = arith.constant dense<0.000000e+00> : vector<8x16xf32>
    %126 = tpu.matmul %125, %107, %cst_40 {dimension_numbers = #tpu.dot_dimension_numbers<[1], [0], [0], [1], [0, 0, 1, 1], [], []>} : vector<8x8xbf16>, vector<8x16xbf16>, vector<8x16xf32> -> vector<8x16xf32>
    %127 = arith.truncf %126 : vector<8x16xf32> to vector<8x16xbf16>
    %c0_41 = arith.constant 0 : index
    %c48 = arith.constant 48 : index
    %128 = vector.load %arg8[%c0_41, %c48] : memref<8x64xbf16, #tpu.memory_space<vmem>>, vector<8x16xbf16>
    tpu.vector_store %arg8[%c0_41, %c48], %127 {strides = array<i32>} : memref<8x64xbf16, #tpu.memory_space<vmem>>, vector<8x16xbf16>,
    %c0_42 = arith.constant 0 : index
    %c0_43 = arith.constant 0 : index
    %129 = vector.load %arg8[%c0_42, %c0_43] : memref<8x64xbf16, #tpu.memory_space<vmem>>, vector<8x64xbf16>
    %c0_44 = arith.constant 0 : index
    %c0_45 = arith.constant 0 : index
    %130 = vector.load %arg4[%c0_44, %c0_45] : memref<64x64xbf16, #tpu.memory_space<vmem>>, vector<64x64xbf16>
    %cst_46 = arith.constant dense<0.000000e+00> : vector<8x64xf32>
    %131 = tpu.matmul %129, %130, %cst_46 {dimension_numbers = #tpu.dot_dimension_numbers<[1], [0], [0], [1], [0, 0, 1, 1], [], []>} : vector<8x64xbf16>, vector<64x64xbf16>, vector<8x64xf32> -> vector<8x64xf32>
    %132 = arith.addf %2, %131 : vector<8x64xf32>
    %133 = arith.truncf %132 : vector<8x64xf32> to vector<8x64xbf16>
    %c0_47 = arith.constant 0 : index
    %c0_48 = arith.constant 0 : index
    %c0_49 = arith.constant 0 : index
    %134 = vector.load %arg7[%c0_47, %c0_48, %c0_49] : memref<1x8x64xbf16, #tpu.memory_space<vmem>>, vector<1x8x64xbf16>
    %135 = vector.shape_cast %134 : vector<1x8x64xbf16> to vector<8x64xbf16>
    %136 = vector.shape_cast %133 : vector<8x64xbf16> to vector<1x8x64xbf16>
    tpu.vector_store %arg7[%c0_47, %c0_48, %c0_49], %136 {strides = array<i32>} : memref<1x8x64xbf16, #tpu.memory_space<vmem>>, vector<1x8x64xbf16>,
    return
  }
  func.func @transform_0(%arg0: i32) -> (i32, i32, i32) {
    %c0_i32 = arith.constant 0 : i32
    %c0_i32_0 = arith.constant 0 : i32
    %c0_i32_1 = arith.constant 0 : i32
    return %arg0, %c0_i32, %c0_i32_0 : i32, i32, i32
  }
  func.func @transform_1(%arg0: i32) -> (i32, i32) {
    %c0_i32 = arith.constant 0 : i32
    %c0_i32_0 = arith.constant 0 : i32
    %c0_i32_1 = arith.constant 0 : i32
    return %c0_i32, %c0_i32_0 : i32, i32
  }
  func.func @transform_2(%arg0: i32) -> (i32, i32) {
    %c0_i32 = arith.constant 0 : i32
    %c0_i32_0 = arith.constant 0 : i32
    %c0_i32_1 = arith.constant 0 : i32
    return %c0_i32, %c0_i32_0 : i32, i32
  }
  func.func @transform_3(%arg0: i32) -> (i32, i32) {
    %c0_i32 = arith.constant 0 : i32
    %c0_i32_0 = arith.constant 0 : i32
    %c0_i32_1 = arith.constant 0 : i32
    return %c0_i32, %c0_i32_0 : i32, i32
  }
  func.func @transform_4(%arg0: i32) -> (i32, i32, i32) {
    %c0_i32 = arith.constant 0 : i32
    %c0_i32_0 = arith.constant 0 : i32
    %c0_i32_1 = arith.constant 0 : i32
    %c0_i32_2 = arith.constant 0 : i32
    return %c0_i32, %c0_i32_0, %c0_i32_1 : i32, i32, i32
  }
  func.func @transform_5(%arg0: i32) -> (i32, i32, i32) {
    %c0_i32 = arith.constant 0 : i32
    %c0_i32_0 = arith.constant 0 : i32
    %c0_i32_1 = arith.constant 0 : i32
    return %arg0, %c0_i32, %c0_i32_0 : i32, i32, i32
  }
  func.func @transform_6(%arg0: i32) -> (i32, i32, i32) {
    %c0_i32 = arith.constant 0 : i32
    %c0_i32_0 = arith.constant 0 : i32
    %c0_i32_1 = arith.constant 0 : i32
    return %arg0, %c0_i32, %c0_i32_0 : i32, i32, i32
  }
}

module attributes {stable_mosaic.version = 11 : i64} {
  func.func @_ffn_kernel(%arg0: i32, %arg1: memref<16x64xbf16, #tpu.memory_space<vmem>>, %arg2: memref<1x64xf32, #tpu.memory_space<vmem>>, %arg3: memref<64x128xbf16, #tpu.memory_space<vmem>>, %arg4: memref<128x64xbf16, #tpu.memory_space<vmem>>, %arg5: memref<1x64xf32, #tpu.memory_space<vmem>>, %arg6: memref<16x64xbf16, #tpu.memory_space<vmem>>) attributes {dimension_semantics = [#tpu.dimension_semantics<parallel>], iteration_bounds = array<i64: 1>, scalar_prefetch = 0 : i64, scratch_operands = 0 : i64, tpu.core_type = #tpu.core_type<tc>, window_params = [{transform_indices = @transform_0, window_bounds = array<i64: 16, 64>}, {pipeline_mode = #tpu.pipeline_mode<synchronous>, transform_indices = @transform_1, window_bounds = array<i64: 1, 64>}, {pipeline_mode = #tpu.pipeline_mode<synchronous>, transform_indices = @transform_2, window_bounds = array<i64: 64, 128>}, {pipeline_mode = #tpu.pipeline_mode<synchronous>, transform_indices = @transform_3, window_bounds = array<i64: 128, 64>}, {pipeline_mode = #tpu.pipeline_mode<synchronous>, transform_indices = @transform_4, window_bounds = array<i64: 1, 64>}, {transform_indices = @transform_5, window_bounds = array<i64: 16, 64>}]} {
    %c0 = arith.constant 0 : index
    %c0_0 = arith.constant 0 : index
    %0 = vector.load %arg1[%c0, %c0_0] : memref<16x64xbf16, #tpu.memory_space<vmem>>, vector<16x64xbf16>
    %1 = arith.extf %0 : vector<16x64xbf16> to vector<16x64xf32>
    %c0_1 = arith.constant 0 : index
    %c0_2 = arith.constant 0 : index
    %2 = vector.load %arg2[%c0_1, %c0_2] : memref<1x64xf32, #tpu.memory_space<vmem>>, vector<1x64xf32>
    %3 = arith.mulf %1, %1 : vector<16x64xf32>
    %cst = arith.constant dense<0.000000e+00> : vector<16xf32>
    %4 = vector.multi_reduction <add>, %3, %cst [1] : vector<16x64xf32> to vector<16xf32>
    %5 = vector.shape_cast %4 : vector<16xf32> to vector<16x1xf32>
    %cst_3 = arith.constant 6.400000e+01 : f32
    %6 = vector.broadcast %cst_3 : f32 to vector<16x1xf32>
    %7 = arith.divf %5, %6 : vector<16x1xf32>
    %cst_4 = arith.constant 9.99999997E-7 : f32
    %8 = vector.broadcast %cst_4 : f32 to vector<16x1xf32>
    %9 = arith.addf %7, %8 : vector<16x1xf32>
    %10 = math.rsqrt %9 : vector<16x1xf32>
    %11 = vector.broadcast %10 : vector<16x1xf32> to vector<16x64xf32>
    %12 = arith.mulf %1, %11 : vector<16x64xf32>
    %13 = vector.broadcast %2 : vector<1x64xf32> to vector<16x64xf32>
    %14 = arith.mulf %12, %13 : vector<16x64xf32>
    %15 = arith.truncf %14 : vector<16x64xf32> to vector<16x64xbf16>
    %c0_5 = arith.constant 0 : index
    %c0_6 = arith.constant 0 : index
    %16 = vector.load %arg3[%c0_5, %c0_6] : memref<64x128xbf16, #tpu.memory_space<vmem>>, vector<64x128xbf16>
    %cst_7 = arith.constant dense<0.000000e+00> : vector<16x128xf32>
    %17 = tpu.matmul %15, %16, %cst_7 {dimension_numbers = #tpu.dot_dimension_numbers<[1], [0], [0], [1], [0, 0, 1, 1], [], []>} : vector<16x64xbf16>, vector<64x128xbf16>, vector<16x128xf32> -> vector<16x128xf32>
    %cst_8 = arith.constant 0.000000e+00 : f32
    %18 = vector.broadcast %cst_8 : f32 to vector<16x128xf32>
    %19 = arith.maximumf %17, %18 : vector<16x128xf32>
    %20 = arith.truncf %19 : vector<16x128xf32> to vector<16x128xbf16>
    %c0_9 = arith.constant 0 : index
    %c0_10 = arith.constant 0 : index
    %21 = vector.load %arg4[%c0_9, %c0_10] : memref<128x64xbf16, #tpu.memory_space<vmem>>, vector<128x64xbf16>
    %cst_11 = arith.constant dense<0.000000e+00> : vector<16x64xf32>
    %22 = tpu.matmul %20, %21, %cst_11 {dimension_numbers = #tpu.dot_dimension_numbers<[1], [0], [0], [1], [0, 0, 1, 1], [], []>} : vector<16x128xbf16>, vector<128x64xbf16>, vector<16x64xf32> -> vector<16x64xf32>
    %23 = arith.addf %1, %22 : vector<16x64xf32>
    %c0_12 = arith.constant 0 : index
    %c0_13 = arith.constant 0 : index
    %24 = vector.load %arg5[%c0_12, %c0_13] : memref<1x64xf32, #tpu.memory_space<vmem>>, vector<1x64xf32>
    %25 = arith.mulf %23, %23 : vector<16x64xf32>
    %cst_14 = arith.constant dense<0.000000e+00> : vector<16xf32>
    %26 = vector.multi_reduction <add>, %25, %cst_14 [1] : vector<16x64xf32> to vector<16xf32>
    %27 = vector.shape_cast %26 : vector<16xf32> to vector<16x1xf32>
    %cst_15 = arith.constant 6.400000e+01 : f32
    %28 = vector.broadcast %cst_15 : f32 to vector<16x1xf32>
    %29 = arith.divf %27, %28 : vector<16x1xf32>
    %cst_16 = arith.constant 9.99999997E-7 : f32
    %30 = vector.broadcast %cst_16 : f32 to vector<16x1xf32>
    %31 = arith.addf %29, %30 : vector<16x1xf32>
    %32 = math.rsqrt %31 : vector<16x1xf32>
    %33 = vector.broadcast %32 : vector<16x1xf32> to vector<16x64xf32>
    %34 = arith.mulf %23, %33 : vector<16x64xf32>
    %35 = vector.broadcast %24 : vector<1x64xf32> to vector<16x64xf32>
    %36 = arith.mulf %34, %35 : vector<16x64xf32>
    %37 = arith.truncf %36 : vector<16x64xf32> to vector<16x64xbf16>
    %c0_17 = arith.constant 0 : index
    %c0_18 = arith.constant 0 : index
    %38 = vector.load %arg6[%c0_17, %c0_18] : memref<16x64xbf16, #tpu.memory_space<vmem>>, vector<16x64xbf16>
    tpu.vector_store %arg6[%c0_17, %c0_18], %37 {strides = array<i32>} : memref<16x64xbf16, #tpu.memory_space<vmem>>, vector<16x64xbf16>,
    return
  }
  func.func @transform_0(%arg0: i32) -> (i32, i32) {
    %c0_i32 = arith.constant 0 : i32
    %c0_i32_0 = arith.constant 0 : i32
    return %arg0, %c0_i32 : i32, i32
  }
  func.func @transform_1(%arg0: i32) -> (i32, i32) {
    %c0_i32 = arith.constant 0 : i32
    %c0_i32_0 = arith.constant 0 : i32
    %c0_i32_1 = arith.constant 0 : i32
    return %c0_i32, %c0_i32_0 : i32, i32
  }
  func.func @transform_2(%arg0: i32) -> (i32, i32) {
    %c0_i32 = arith.constant 0 : i32
    %c0_i32_0 = arith.constant 0 : i32
    %c0_i32_1 = arith.constant 0 : i32
    return %c0_i32, %c0_i32_0 : i32, i32
  }
  func.func @transform_3(%arg0: i32) -> (i32, i32) {
    %c0_i32 = arith.constant 0 : i32
    %c0_i32_0 = arith.constant 0 : i32
    %c0_i32_1 = arith.constant 0 : i32
    return %c0_i32, %c0_i32_0 : i32, i32
  }
  func.func @transform_4(%arg0: i32) -> (i32, i32) {
    %c0_i32 = arith.constant 0 : i32
    %c0_i32_0 = arith.constant 0 : i32
    %c0_i32_1 = arith.constant 0 : i32
    return %c0_i32, %c0_i32_0 : i32, i32
  }
  func.func @transform_5(%arg0: i32) -> (i32, i32) {
    %c0_i32 = arith.constant 0 : i32
    %c0_i32_0 = arith.constant 0 : i32
    return %arg0, %c0_i32 : i32, i32
  }
}

module attributes {stable_mosaic.version = 11 : i64} {
  func.func @_cross_attn_kernel(%arg0: i32, %arg1: memref<1x8x64xbf16, #tpu.memory_space<vmem>>, %arg2: memref<1x8x64xbf16, #tpu.memory_space<vmem>>, %arg3: memref<1x64xf32, #tpu.memory_space<vmem>>, %arg4: memref<64x64xbf16, #tpu.memory_space<vmem>>, %arg5: memref<64x128xbf16, #tpu.memory_space<vmem>>, %arg6: memref<64x64xbf16, #tpu.memory_space<vmem>>, %arg7: memref<1x1x8xf32, #tpu.memory_space<vmem>>, %arg8: memref<1x8x64xbf16, #tpu.memory_space<vmem>>, %arg9: memref<8x64xbf16, #tpu.memory_space<vmem>>) attributes {dimension_semantics = [#tpu.dimension_semantics<parallel>], iteration_bounds = array<i64: 2>, scalar_prefetch = 0 : i64, scratch_operands = 1 : i64, tpu.core_type = #tpu.core_type<tc>, window_params = [{transform_indices = @transform_0, window_bounds = array<i64: 1, 8, 64>}, {transform_indices = @transform_1, window_bounds = array<i64: 1, 8, 64>}, {pipeline_mode = #tpu.pipeline_mode<synchronous>, transform_indices = @transform_2, window_bounds = array<i64: 1, 64>}, {pipeline_mode = #tpu.pipeline_mode<synchronous>, transform_indices = @transform_3, window_bounds = array<i64: 64, 64>}, {pipeline_mode = #tpu.pipeline_mode<synchronous>, transform_indices = @transform_4, window_bounds = array<i64: 64, 128>}, {pipeline_mode = #tpu.pipeline_mode<synchronous>, transform_indices = @transform_5, window_bounds = array<i64: 64, 64>}, {transform_indices = @transform_6, window_bounds = array<i64: 1, 1, 8>}, {transform_indices = @transform_7, window_bounds = array<i64: 1, 8, 64>}]} {
    %c0 = arith.constant 0 : index
    %c0_0 = arith.constant 0 : index
    %c0_1 = arith.constant 0 : index
    %0 = vector.load %arg1[%c0, %c0_0, %c0_1] : memref<1x8x64xbf16, #tpu.memory_space<vmem>>, vector<1x8x64xbf16>
    %1 = vector.shape_cast %0 : vector<1x8x64xbf16> to vector<8x64xbf16>
    %2 = arith.extf %1 : vector<8x64xbf16> to vector<8x64xf32>
    %c0_2 = arith.constant 0 : index
    %c0_3 = arith.constant 0 : index
    %c0_4 = arith.constant 0 : index
    %3 = vector.load %arg2[%c0_2, %c0_3, %c0_4] : memref<1x8x64xbf16, #tpu.memory_space<vmem>>, vector<1x8x64xbf16>
    %4 = vector.shape_cast %3 : vector<1x8x64xbf16> to vector<8x64xbf16>
    %c0_5 = arith.constant 0 : index
    %c0_6 = arith.constant 0 : index
    %5 = vector.load %arg3[%c0_5, %c0_6] : memref<1x64xf32, #tpu.memory_space<vmem>>, vector<1x64xf32>
    %6 = arith.mulf %2, %2 : vector<8x64xf32>
    %cst = arith.constant dense<0.000000e+00> : vector<8xf32>
    %7 = vector.multi_reduction <add>, %6, %cst [1] : vector<8x64xf32> to vector<8xf32>
    %8 = vector.shape_cast %7 : vector<8xf32> to vector<8x1xf32>
    %cst_7 = arith.constant 6.400000e+01 : f32
    %9 = vector.broadcast %cst_7 : f32 to vector<8x1xf32>
    %10 = arith.divf %8, %9 : vector<8x1xf32>
    %cst_8 = arith.constant 9.99999997E-7 : f32
    %11 = vector.broadcast %cst_8 : f32 to vector<8x1xf32>
    %12 = arith.addf %10, %11 : vector<8x1xf32>
    %13 = math.rsqrt %12 : vector<8x1xf32>
    %14 = vector.broadcast %13 : vector<8x1xf32> to vector<8x64xf32>
    %15 = arith.mulf %2, %14 : vector<8x64xf32>
    %16 = vector.broadcast %5 : vector<1x64xf32> to vector<8x64xf32>
    %17 = arith.mulf %15, %16 : vector<8x64xf32>
    %18 = arith.truncf %17 : vector<8x64xf32> to vector<8x64xbf16>
    %c0_9 = arith.constant 0 : index
    %c0_10 = arith.constant 0 : index
    %19 = vector.load %arg4[%c0_9, %c0_10] : memref<64x64xbf16, #tpu.memory_space<vmem>>, vector<64x64xbf16>
    %cst_11 = arith.constant dense<0.000000e+00> : vector<8x64xf32>
    %20 = tpu.matmul %18, %19, %cst_11 {dimension_numbers = #tpu.dot_dimension_numbers<[1], [0], [0], [1], [0, 0, 1, 1], [], []>} : vector<8x64xbf16>, vector<64x64xbf16>, vector<8x64xf32> -> vector<8x64xf32>
    %c0_12 = arith.constant 0 : index
    %c0_13 = arith.constant 0 : index
    %21 = vector.load %arg5[%c0_12, %c0_13] : memref<64x128xbf16, #tpu.memory_space<vmem>>, vector<64x128xbf16>
    %cst_14 = arith.constant dense<0.000000e+00> : vector<8x128xf32>
    %22 = tpu.matmul %4, %21, %cst_14 {dimension_numbers = #tpu.dot_dimension_numbers<[1], [0], [0], [1], [0, 0, 1, 1], [], []>} : vector<8x64xbf16>, vector<64x128xbf16>, vector<8x128xf32> -> vector<8x128xf32>
    %c0_15 = arith.constant 0 : index
    %c0_16 = arith.constant 0 : index
    %c0_17 = arith.constant 0 : index
    %23 = vector.load %arg7[%c0_15, %c0_16, %c0_17] : memref<1x1x8xf32, #tpu.memory_space<vmem>>, vector<1x1x8xf32>
    %24 = vector.shape_cast %23 : vector<1x1x8xf32> to vector<1x8xf32>
    %25 = vector.extract_strided_slice %20 {offsets = [0, 0], sizes = [8, 16], strides = [1, 1]} : vector<8x64xf32> to vector<8x16xf32>
    %26 = arith.truncf %25 : vector<8x16xf32> to vector<8x16xbf16>
    %27 = vector.extract_strided_slice %22 {offsets = [0, 0], sizes = [8, 16], strides = [1, 1]} : vector<8x128xf32> to vector<8x16xf32>
    %28 = arith.truncf %27 : vector<8x16xf32> to vector<8x16xbf16>
    %29 = vector.extract_strided_slice %22 {offsets = [0, 64], sizes = [8, 16], strides = [1, 1]} : vector<8x128xf32> to vector<8x16xf32>
    %30 = arith.truncf %29 : vector<8x16xf32> to vector<8x16xbf16>
    %cst_18 = arith.constant dense<0.000000e+00> : vector<8x8xf32>
    %31 = tpu.matmul %26, %28, %cst_18 {dimension_numbers = #tpu.dot_dimension_numbers<[1], [1], [0], [0], [0, 0, 1, 0], [], []>} : vector<8x16xbf16>, vector<8x16xbf16>, vector<8x8xf32> -> vector<8x8xf32>
    %32 = vector.broadcast %24 : vector<1x8xf32> to vector<8x8xf32>
    %33 = arith.addf %31, %32 : vector<8x8xf32>
    %cst_19 = arith.constant dense<0xFF800000> : vector<8xf32>
    %34 = vector.multi_reduction <maximumf>, %33, %cst_19 [1] : vector<8x8xf32> to vector<8xf32>
    %35 = vector.shape_cast %34 : vector<8xf32> to vector<8x1xf32>
    %36 = vector.broadcast %35 : vector<8x1xf32> to vector<8x8xf32>
    %37 = arith.subf %33, %36 : vector<8x8xf32>
    %38 = math.exp %37 : vector<8x8xf32>
    %cst_20 = arith.constant dense<0.000000e+00> : vector<8xf32>
    %39 = vector.multi_reduction <add>, %38, %cst_20 [1] : vector<8x8xf32> to vector<8xf32>
    %40 = vector.shape_cast %39 : vector<8xf32> to vector<8x1xf32>
    %41 = tpu.reciprocal %40 {approx = true} : vector<8x1xf32> -> vector<8x1xf32>
    %42 = vector.broadcast %41 : vector<8x1xf32> to vector<8x8xf32>
    %43 = arith.mulf %38, %42 : vector<8x8xf32>
    %44 = arith.truncf %43 : vector<8x8xf32> to vector<8x8xbf16>
    %cst_21 = arith.constant dense<0.000000e+00> : vector<8x16xf32>
    %45 = tpu.matmul %44, %30, %cst_21 {dimension_numbers = #tpu.dot_dimension_numbers<[1], [0], [0], [1], [0, 0, 1, 1], [], []>} : vector<8x8xbf16>, vector<8x16xbf16>, vector<8x16xf32> -> vector<8x16xf32>
    %46 = arith.truncf %45 : vector<8x16xf32> to vector<8x16xbf16>
    %c0_22 = arith.constant 0 : index
    %c0_23 = arith.constant 0 : index
    %47 = vector.load %arg9[%c0_22, %c0_23] : memref<8x64xbf16, #tpu.memory_space<vmem>>, vector<8x16xbf16>
    tpu.vector_store %arg9[%c0_22, %c0_23], %46 {strides = array<i32>} : memref<8x64xbf16, #tpu.memory_space<vmem>>, vector<8x16xbf16>,
    %48 = vector.extract_strided_slice %20 {offsets = [0, 16], sizes = [8, 16], strides = [1, 1]} : vector<8x64xf32> to vector<8x16xf32>
    %49 = arith.truncf %48 : vector<8x16xf32> to vector<8x16xbf16>
    %50 = vector.extract_strided_slice %22 {offsets = [0, 16], sizes = [8, 16], strides = [1, 1]} : vector<8x128xf32> to vector<8x16xf32>
    %51 = arith.truncf %50 : vector<8x16xf32> to vector<8x16xbf16>
    %52 = vector.extract_strided_slice %22 {offsets = [0, 80], sizes = [8, 16], strides = [1, 1]} : vector<8x128xf32> to vector<8x16xf32>
    %53 = arith.truncf %52 : vector<8x16xf32> to vector<8x16xbf16>
    %cst_24 = arith.constant dense<0.000000e+00> : vector<8x8xf32>
    %54 = tpu.matmul %49, %51, %cst_24 {dimension_numbers = #tpu.dot_dimension_numbers<[1], [1], [0], [0], [0, 0, 1, 0], [], []>} : vector<8x16xbf16>, vector<8x16xbf16>, vector<8x8xf32> -> vector<8x8xf32>
    %55 = vector.broadcast %24 : vector<1x8xf32> to vector<8x8xf32>
    %56 = arith.addf %54, %55 : vector<8x8xf32>
    %cst_25 = arith.constant dense<0xFF800000> : vector<8xf32>
    %57 = vector.multi_reduction <maximumf>, %56, %cst_25 [1] : vector<8x8xf32> to vector<8xf32>
    %58 = vector.shape_cast %57 : vector<8xf32> to vector<8x1xf32>
    %59 = vector.broadcast %58 : vector<8x1xf32> to vector<8x8xf32>
    %60 = arith.subf %56, %59 : vector<8x8xf32>
    %61 = math.exp %60 : vector<8x8xf32>
    %cst_26 = arith.constant dense<0.000000e+00> : vector<8xf32>
    %62 = vector.multi_reduction <add>, %61, %cst_26 [1] : vector<8x8xf32> to vector<8xf32>
    %63 = vector.shape_cast %62 : vector<8xf32> to vector<8x1xf32>
    %64 = tpu.reciprocal %63 {approx = true} : vector<8x1xf32> -> vector<8x1xf32>
    %65 = vector.broadcast %64 : vector<8x1xf32> to vector<8x8xf32>
    %66 = arith.mulf %61, %65 : vector<8x8xf32>
    %67 = arith.truncf %66 : vector<8x8xf32> to vector<8x8xbf16>
    %cst_27 = arith.constant dense<0.000000e+00> : vector<8x16xf32>
    %68 = tpu.matmul %67, %53, %cst_27 {dimension_numbers = #tpu.dot_dimension_numbers<[1], [0], [0], [1], [0, 0, 1, 1], [], []>} : vector<8x8xbf16>, vector<8x16xbf16>, vector<8x16xf32> -> vector<8x16xf32>
    %69 = arith.truncf %68 : vector<8x16xf32> to vector<8x16xbf16>
    %c0_28 = arith.constant 0 : index
    %c16 = arith.constant 16 : index
    %70 = vector.load %arg9[%c0_28, %c16] : memref<8x64xbf16, #tpu.memory_space<vmem>>, vector<8x16xbf16>
    tpu.vector_store %arg9[%c0_28, %c16], %69 {strides = array<i32>} : memref<8x64xbf16, #tpu.memory_space<vmem>>, vector<8x16xbf16>,
    %71 = vector.extract_strided_slice %20 {offsets = [0, 32], sizes = [8, 16], strides = [1, 1]} : vector<8x64xf32> to vector<8x16xf32>
    %72 = arith.truncf %71 : vector<8x16xf32> to vector<8x16xbf16>
    %73 = vector.extract_strided_slice %22 {offsets = [0, 32], sizes = [8, 16], strides = [1, 1]} : vector<8x128xf32> to vector<8x16xf32>
    %74 = arith.truncf %73 : vector<8x16xf32> to vector<8x16xbf16>
    %75 = vector.extract_strided_slice %22 {offsets = [0, 96], sizes = [8, 16], strides = [1, 1]} : vector<8x128xf32> to vector<8x16xf32>
    %76 = arith.truncf %75 : vector<8x16xf32> to vector<8x16xbf16>
    %cst_29 = arith.constant dense<0.000000e+00> : vector<8x8xf32>
    %77 = tpu.matmul %72, %74, %cst_29 {dimension_numbers = #tpu.dot_dimension_numbers<[1], [1], [0], [0], [0, 0, 1, 0], [], []>} : vector<8x16xbf16>, vector<8x16xbf16>, vector<8x8xf32> -> vector<8x8xf32>
    %78 = vector.broadcast %24 : vector<1x8xf32> to vector<8x8xf32>
    %79 = arith.addf %77, %78 : vector<8x8xf32>
    %cst_30 = arith.constant dense<0xFF800000> : vector<8xf32>
    %80 = vector.multi_reduction <maximumf>, %79, %cst_30 [1] : vector<8x8xf32> to vector<8xf32>
    %81 = vector.shape_cast %80 : vector<8xf32> to vector<8x1xf32>
    %82 = vector.broadcast %81 : vector<8x1xf32> to vector<8x8xf32>
    %83 = arith.subf %79, %82 : vector<8x8xf32>
    %84 = math.exp %83 : vector<8x8xf32>
    %cst_31 = arith.constant dense<0.000000e+00> : vector<8xf32>
    %85 = vector.multi_reduction <add>, %84, %cst_31 [1] : vector<8x8xf32> to vector<8xf32>
    %86 = vector.shape_cast %85 : vector<8xf32> to vector<8x1xf32>
    %87 = tpu.reciprocal %86 {approx = true} : vector<8x1xf32> -> vector<8x1xf32>
    %88 = vector.broadcast %87 : vector<8x1xf32> to vector<8x8xf32>
    %89 = arith.mulf %84, %88 : vector<8x8xf32>
    %90 = arith.truncf %89 : vector<8x8xf32> to vector<8x8xbf16>
    %cst_32 = arith.constant dense<0.000000e+00> : vector<8x16xf32>
    %91 = tpu.matmul %90, %76, %cst_32 {dimension_numbers = #tpu.dot_dimension_numbers<[1], [0], [0], [1], [0, 0, 1, 1], [], []>} : vector<8x8xbf16>, vector<8x16xbf16>, vector<8x16xf32> -> vector<8x16xf32>
    %92 = arith.truncf %91 : vector<8x16xf32> to vector<8x16xbf16>
    %c0_33 = arith.constant 0 : index
    %c32 = arith.constant 32 : index
    %93 = vector.load %arg9[%c0_33, %c32] : memref<8x64xbf16, #tpu.memory_space<vmem>>, vector<8x16xbf16>
    tpu.vector_store %arg9[%c0_33, %c32], %92 {strides = array<i32>} : memref<8x64xbf16, #tpu.memory_space<vmem>>, vector<8x16xbf16>,
    %94 = vector.extract_strided_slice %20 {offsets = [0, 48], sizes = [8, 16], strides = [1, 1]} : vector<8x64xf32> to vector<8x16xf32>
    %95 = arith.truncf %94 : vector<8x16xf32> to vector<8x16xbf16>
    %96 = vector.extract_strided_slice %22 {offsets = [0, 48], sizes = [8, 16], strides = [1, 1]} : vector<8x128xf32> to vector<8x16xf32>
    %97 = arith.truncf %96 : vector<8x16xf32> to vector<8x16xbf16>
    %98 = vector.extract_strided_slice %22 {offsets = [0, 112], sizes = [8, 16], strides = [1, 1]} : vector<8x128xf32> to vector<8x16xf32>
    %99 = arith.truncf %98 : vector<8x16xf32> to vector<8x16xbf16>
    %cst_34 = arith.constant dense<0.000000e+00> : vector<8x8xf32>
    %100 = tpu.matmul %95, %97, %cst_34 {dimension_numbers = #tpu.dot_dimension_numbers<[1], [1], [0], [0], [0, 0, 1, 0], [], []>} : vector<8x16xbf16>, vector<8x16xbf16>, vector<8x8xf32> -> vector<8x8xf32>
    %101 = vector.broadcast %24 : vector<1x8xf32> to vector<8x8xf32>
    %102 = arith.addf %100, %101 : vector<8x8xf32>
    %cst_35 = arith.constant dense<0xFF800000> : vector<8xf32>
    %103 = vector.multi_reduction <maximumf>, %102, %cst_35 [1] : vector<8x8xf32> to vector<8xf32>
    %104 = vector.shape_cast %103 : vector<8xf32> to vector<8x1xf32>
    %105 = vector.broadcast %104 : vector<8x1xf32> to vector<8x8xf32>
    %106 = arith.subf %102, %105 : vector<8x8xf32>
    %107 = math.exp %106 : vector<8x8xf32>
    %cst_36 = arith.constant dense<0.000000e+00> : vector<8xf32>
    %108 = vector.multi_reduction <add>, %107, %cst_36 [1] : vector<8x8xf32> to vector<8xf32>
    %109 = vector.shape_cast %108 : vector<8xf32> to vector<8x1xf32>
    %110 = tpu.reciprocal %109 {approx = true} : vector<8x1xf32> -> vector<8x1xf32>
    %111 = vector.broadcast %110 : vector<8x1xf32> to vector<8x8xf32>
    %112 = arith.mulf %107, %111 : vector<8x8xf32>
    %113 = arith.truncf %112 : vector<8x8xf32> to vector<8x8xbf16>
    %cst_37 = arith.constant dense<0.000000e+00> : vector<8x16xf32>
    %114 = tpu.matmul %113, %99, %cst_37 {dimension_numbers = #tpu.dot_dimension_numbers<[1], [0], [0], [1], [0, 0, 1, 1], [], []>} : vector<8x8xbf16>, vector<8x16xbf16>, vector<8x16xf32> -> vector<8x16xf32>
    %115 = arith.truncf %114 : vector<8x16xf32> to vector<8x16xbf16>
    %c0_38 = arith.constant 0 : index
    %c48 = arith.constant 48 : index
    %116 = vector.load %arg9[%c0_38, %c48] : memref<8x64xbf16, #tpu.memory_space<vmem>>, vector<8x16xbf16>
    tpu.vector_store %arg9[%c0_38, %c48], %115 {strides = array<i32>} : memref<8x64xbf16, #tpu.memory_space<vmem>>, vector<8x16xbf16>,
    %c0_39 = arith.constant 0 : index
    %c0_40 = arith.constant 0 : index
    %117 = vector.load %arg9[%c0_39, %c0_40] : memref<8x64xbf16, #tpu.memory_space<vmem>>, vector<8x64xbf16>
    %c0_41 = arith.constant 0 : index
    %c0_42 = arith.constant 0 : index
    %118 = vector.load %arg6[%c0_41, %c0_42] : memref<64x64xbf16, #tpu.memory_space<vmem>>, vector<64x64xbf16>
    %cst_43 = arith.constant dense<0.000000e+00> : vector<8x64xf32>
    %119 = tpu.matmul %117, %118, %cst_43 {dimension_numbers = #tpu.dot_dimension_numbers<[1], [0], [0], [1], [0, 0, 1, 1], [], []>} : vector<8x64xbf16>, vector<64x64xbf16>, vector<8x64xf32> -> vector<8x64xf32>
    %120 = arith.addf %2, %119 : vector<8x64xf32>
    %121 = arith.truncf %120 : vector<8x64xf32> to vector<8x64xbf16>
    %c0_44 = arith.constant 0 : index
    %c0_45 = arith.constant 0 : index
    %c0_46 = arith.constant 0 : index
    %122 = vector.load %arg8[%c0_44, %c0_45, %c0_46] : memref<1x8x64xbf16, #tpu.memory_space<vmem>>, vector<1x8x64xbf16>
    %123 = vector.shape_cast %122 : vector<1x8x64xbf16> to vector<8x64xbf16>
    %124 = vector.shape_cast %121 : vector<8x64xbf16> to vector<1x8x64xbf16>
    tpu.vector_store %arg8[%c0_44, %c0_45, %c0_46], %124 {strides = array<i32>} : memref<1x8x64xbf16, #tpu.memory_space<vmem>>, vector<1x8x64xbf16>,
    return
  }
  func.func @transform_0(%arg0: i32) -> (i32, i32, i32) {
    %c0_i32 = arith.constant 0 : i32
    %c0_i32_0 = arith.constant 0 : i32
    %c0_i32_1 = arith.constant 0 : i32
    return %arg0, %c0_i32, %c0_i32_0 : i32, i32, i32
  }
  func.func @transform_1(%arg0: i32) -> (i32, i32, i32) {
    %c0_i32 = arith.constant 0 : i32
    %c0_i32_0 = arith.constant 0 : i32
    %c0_i32_1 = arith.constant 0 : i32
    return %arg0, %c0_i32, %c0_i32_0 : i32, i32, i32
  }
  func.func @transform_2(%arg0: i32) -> (i32, i32) {
    %c0_i32 = arith.constant 0 : i32
    %c0_i32_0 = arith.constant 0 : i32
    %c0_i32_1 = arith.constant 0 : i32
    return %c0_i32, %c0_i32_0 : i32, i32
  }
  func.func @transform_3(%arg0: i32) -> (i32, i32) {
    %c0_i32 = arith.constant 0 : i32
    %c0_i32_0 = arith.constant 0 : i32
    %c0_i32_1 = arith.constant 0 : i32
    return %c0_i32, %c0_i32_0 : i32, i32
  }
  func.func @transform_4(%arg0: i32) -> (i32, i32) {
    %c0_i32 = arith.constant 0 : i32
    %c0_i32_0 = arith.constant 0 : i32
    %c0_i32_1 = arith.constant 0 : i32
    return %c0_i32, %c0_i32_0 : i32, i32
  }
  func.func @transform_5(%arg0: i32) -> (i32, i32) {
    %c0_i32 = arith.constant 0 : i32
    %c0_i32_0 = arith.constant 0 : i32
    %c0_i32_1 = arith.constant 0 : i32
    return %c0_i32, %c0_i32_0 : i32, i32
  }
  func.func @transform_6(%arg0: i32) -> (i32, i32, i32) {
    %c0_i32 = arith.constant 0 : i32
    %c0_i32_0 = arith.constant 0 : i32
    %c0_i32_1 = arith.constant 0 : i32
    return %arg0, %c0_i32, %c0_i32_0 : i32, i32, i32
  }
  func.func @transform_7(%arg0: i32) -> (i32, i32, i32) {
    %c0_i32 = arith.constant 0 : i32
    %c0_i32_0 = arith.constant 0 : i32
    %c0_i32_1 = arith.constant 0 : i32
    return %arg0, %c0_i32, %c0_i32_0 : i32, i32, i32
  }
}

module attributes {stable_mosaic.version = 11 : i64} {
  func.func @_lmhead_ce_kernel(%arg0: i32, %arg1: i32, %arg2: memref<16x64xbf16, #tpu.memory_space<vmem>>, %arg3: memref<1x64xf32, #tpu.memory_space<vmem>>, %arg4: memref<256x64xbf16, #tpu.memory_space<vmem>>, %arg5: memref<16x1xi32, #tpu.memory_space<vmem>>, %arg6: memref<16x256xbf16, #tpu.memory_space<vmem>>, %arg7: memref<16x128xf32, #tpu.memory_space<vmem>>, %arg8: memref<16x64xbf16, #tpu.memory_space<vmem>>, %arg9: memref<16x1xf32, #tpu.memory_space<vmem>>, %arg10: memref<16x1xf32, #tpu.memory_space<vmem>>, %arg11: memref<16x1xf32, #tpu.memory_space<vmem>>) attributes {dimension_semantics = [#tpu.dimension_semantics<parallel>, #tpu.dimension_semantics<arbitrary>], iteration_bounds = array<i64: 1, 1>, scalar_prefetch = 0 : i64, scratch_operands = 4 : i64, tpu.core_type = #tpu.core_type<tc>, window_params = [{transform_indices = @transform_0, window_bounds = array<i64: 16, 64>}, {pipeline_mode = #tpu.pipeline_mode<synchronous>, transform_indices = @transform_1, window_bounds = array<i64: 1, 64>}, {transform_indices = @transform_2, window_bounds = array<i64: 256, 64>}, {transform_indices = @transform_3, window_bounds = array<i64: 16, 1>}, {transform_indices = @transform_4, window_bounds = array<i64: 16, 256>}, {transform_indices = @transform_5, window_bounds = array<i64: 16, 128>}]} {
    %c0_i32 = arith.constant 0 : i32
    %0 = arith.cmpi eq, %arg1, %c0_i32 : i32
    %1 = arith.extui %0 : i1 to i32
    %c0_i32_0 = arith.constant 0 : i32
    %2 = arith.cmpi ne, %1, %c0_i32_0 : i32
    scf.if %2 {
      %c0_30 = arith.constant 0 : index
      %c0_31 = arith.constant 0 : index
      %46 = vector.load %arg2[%c0_30, %c0_31] : memref<16x64xbf16, #tpu.memory_space<vmem>>, vector<16x64xbf16>
      %47 = arith.extf %46 : vector<16x64xbf16> to vector<16x64xf32>
      %c0_32 = arith.constant 0 : index
      %c0_33 = arith.constant 0 : index
      %48 = vector.load %arg3[%c0_32, %c0_33] : memref<1x64xf32, #tpu.memory_space<vmem>>, vector<1x64xf32>
      %49 = arith.mulf %47, %47 : vector<16x64xf32>
      %cst_34 = arith.constant dense<0.000000e+00> : vector<16xf32>
      %50 = vector.multi_reduction <add>, %49, %cst_34 [1] : vector<16x64xf32> to vector<16xf32>
      %51 = vector.shape_cast %50 : vector<16xf32> to vector<16x1xf32>
      %cst_35 = arith.constant 6.400000e+01 : f32
      %52 = vector.broadcast %cst_35 : f32 to vector<16x1xf32>
      %53 = arith.divf %51, %52 : vector<16x1xf32>
      %cst_36 = arith.constant 9.99999997E-7 : f32
      %54 = vector.broadcast %cst_36 : f32 to vector<16x1xf32>
      %55 = arith.addf %53, %54 : vector<16x1xf32>
      %56 = math.rsqrt %55 : vector<16x1xf32>
      %57 = vector.broadcast %56 : vector<16x1xf32> to vector<16x64xf32>
      %58 = arith.mulf %47, %57 : vector<16x64xf32>
      %59 = vector.broadcast %48 : vector<1x64xf32> to vector<16x64xf32>
      %60 = arith.mulf %58, %59 : vector<16x64xf32>
      %cst_37 = arith.constant 1.250000e-01 : f32
      %61 = vector.broadcast %cst_37 : f32 to vector<16x64xf32>
      %62 = arith.mulf %60, %61 : vector<16x64xf32>
      %63 = arith.truncf %62 : vector<16x64xf32> to vector<16x64xbf16>
      %c0_38 = arith.constant 0 : index
      %c0_39 = arith.constant 0 : index
      %64 = vector.load %arg8[%c0_38, %c0_39] : memref<16x64xbf16, #tpu.memory_space<vmem>>, vector<16x64xbf16>
      tpu.vector_store %arg8[%c0_38, %c0_39], %63 {strides = array<i32>} : memref<16x64xbf16, #tpu.memory_space<vmem>>, vector<16x64xbf16>,
      %cst_40 = arith.constant 0xFF800000 : f32
      %65 = vector.broadcast %cst_40 : f32 to vector<16x1xf32>
      %c0_41 = arith.constant 0 : index
      %c0_42 = arith.constant 0 : index
      %66 = vector.load %arg9[%c0_41, %c0_42] : memref<16x1xf32, #tpu.memory_space<vmem>>, vector<16x1xf32>
      tpu.vector_store %arg9[%c0_41, %c0_42], %65 {strides = array<i32>} : memref<16x1xf32, #tpu.memory_space<vmem>>, vector<16x1xf32>,
      %cst_43 = arith.constant 0.000000e+00 : f32
      %67 = vector.broadcast %cst_43 : f32 to vector<16x1xf32>
      %c0_44 = arith.constant 0 : index
      %c0_45 = arith.constant 0 : index
      %68 = vector.load %arg10[%c0_44, %c0_45] : memref<16x1xf32, #tpu.memory_space<vmem>>, vector<16x1xf32>
      tpu.vector_store %arg10[%c0_44, %c0_45], %67 {strides = array<i32>} : memref<16x1xf32, #tpu.memory_space<vmem>>, vector<16x1xf32>,
      %cst_46 = arith.constant 0.000000e+00 : f32
      %69 = vector.broadcast %cst_46 : f32 to vector<16x1xf32>
      %c0_47 = arith.constant 0 : index
      %c0_48 = arith.constant 0 : index
      %70 = vector.load %arg11[%c0_47, %c0_48] : memref<16x1xf32, #tpu.memory_space<vmem>>, vector<16x1xf32>
      tpu.vector_store %arg11[%c0_47, %c0_48], %69 {strides = array<i32>} : memref<16x1xf32, #tpu.memory_space<vmem>>, vector<16x1xf32>,
    } else {
    }
    %c0 = arith.constant 0 : index
    %c0_1 = arith.constant 0 : index
    %3 = vector.load %arg8[%c0, %c0_1] : memref<16x64xbf16, #tpu.memory_space<vmem>>, vector<16x64xbf16>
    %c0_2 = arith.constant 0 : index
    %c0_3 = arith.constant 0 : index
    %4 = vector.load %arg4[%c0_2, %c0_3] : memref<256x64xbf16, #tpu.memory_space<vmem>>, vector<256x64xbf16>
    %cst = arith.constant dense<0.000000e+00> : vector<16x256xf32>
    %5 = tpu.matmul %3, %4, %cst {dimension_numbers = #tpu.dot_dimension_numbers<[1], [1], [0], [0], [0, 0, 1, 0], [], []>} : vector<16x64xbf16>, vector<256x64xbf16>, vector<16x256xf32> -> vector<16x256xf32>
    %6 = tpu.iota {dimensions = array<i32: 1>} : vector<16x256xi32>
    %c256_i32 = arith.constant 256 : i32
    %7 = arith.muli %arg1, %c256_i32 : i32
    %8 = vector.broadcast %7 : i32 to vector<16x256xi32>
    %9 = arith.addi %6, %8 : vector<16x256xi32>
    %c256_i32_4 = arith.constant 256 : i32
    %10 = vector.broadcast %c256_i32_4 : i32 to vector<16x256xi32>
    %11 = arith.cmpi slt, %9, %10 : vector<16x256xi32>
    %cst_5 = arith.constant -1.000000e+09 : f32
    %12 = vector.broadcast %cst_5 : f32 to vector<16x256xf32>
    %13 = arith.select %11, %5, %12 : vector<16x256xi1>, vector<16x256xf32>
    %14 = arith.truncf %13 : vector<16x256xf32> to vector<16x256xbf16>
    %c0_6 = arith.constant 0 : index
    %c0_7 = arith.constant 0 : index
    %15 = vector.load %arg6[%c0_6, %c0_7] : memref<16x256xbf16, #tpu.memory_space<vmem>>, vector<16x256xbf16>
    tpu.vector_store %arg6[%c0_6, %c0_7], %14 {strides = array<i32>} : memref<16x256xbf16, #tpu.memory_space<vmem>>, vector<16x256xbf16>,
    %c0_8 = arith.constant 0 : index
    %c0_9 = arith.constant 0 : index
    %16 = vector.load %arg5[%c0_8, %c0_9] : memref<16x1xi32, #tpu.memory_space<vmem>>, vector<16x1xi32>
    %c0_10 = arith.constant 0 : index
    %c0_11 = arith.constant 0 : index
    %17 = vector.load %arg11[%c0_10, %c0_11] : memref<16x1xf32, #tpu.memory_space<vmem>>, vector<16x1xf32>
    %18 = vector.broadcast %16 : vector<16x1xi32> to vector<16x256xi32>
    %19 = arith.cmpi eq, %9, %18 : vector<16x256xi32>
    %cst_12 = arith.constant 0.000000e+00 : f32
    %20 = vector.broadcast %cst_12 : f32 to vector<16x256xf32>
    %21 = arith.select %19, %13, %20 : vector<16x256xi1>, vector<16x256xf32>
    %cst_13 = arith.constant dense<0.000000e+00> : vector<16xf32>
    %22 = vector.multi_reduction <add>, %21, %cst_13 [1] : vector<16x256xf32> to vector<16xf32>
    %23 = vector.shape_cast %22 : vector<16xf32> to vector<16x1xf32>
    %24 = arith.addf %17, %23 : vector<16x1xf32>
    %c0_14 = arith.constant 0 : index
    %c0_15 = arith.constant 0 : index
    %25 = vector.load %arg11[%c0_14, %c0_15] : memref<16x1xf32, #tpu.memory_space<vmem>>, vector<16x1xf32>
    tpu.vector_store %arg11[%c0_14, %c0_15], %24 {strides = array<i32>} : memref<16x1xf32, #tpu.memory_space<vmem>>, vector<16x1xf32>,
    %c0_16 = arith.constant 0 : index
    %c0_17 = arith.constant 0 : index
    %26 = vector.load %arg9[%c0_16, %c0_17] : memref<16x1xf32, #tpu.memory_space<vmem>>, vector<16x1xf32>
    %cst_18 = arith.constant dense<0xFF800000> : vector<16xf32>
    %27 = vector.multi_reduction <maximumf>, %13, %cst_18 [1] : vector<16x256xf32> to vector<16xf32>
    %28 = vector.shape_cast %27 : vector<16xf32> to vector<16x1xf32>
    %29 = arith.maximumf %26, %28 : vector<16x1xf32>
    %c0_19 = arith.constant 0 : index
    %c0_20 = arith.constant 0 : index
    %30 = vector.load %arg10[%c0_19, %c0_20] : memref<16x1xf32, #tpu.memory_space<vmem>>, vector<16x1xf32>
    %c0_21 = arith.constant 0 : index
    %c0_22 = arith.constant 0 : index
    %31 = vector.load %arg9[%c0_21, %c0_22] : memref<16x1xf32, #tpu.memory_space<vmem>>, vector<16x1xf32>
    %32 = arith.subf %31, %29 : vector<16x1xf32>
    %33 = math.exp %32 : vector<16x1xf32>
    %34 = arith.mulf %30, %33 : vector<16x1xf32>
    %35 = vector.broadcast %29 : vector<16x1xf32> to vector<16x256xf32>
    %36 = arith.subf %13, %35 : vector<16x256xf32>
    %37 = math.exp %36 : vector<16x256xf32>
    %cst_23 = arith.constant dense<0.000000e+00> : vector<16xf32>
    %38 = vector.multi_reduction <add>, %37, %cst_23 [1] : vector<16x256xf32> to vector<16xf32>
    %39 = vector.shape_cast %38 : vector<16xf32> to vector<16x1xf32>
    %40 = arith.addf %34, %39 : vector<16x1xf32>
    %c0_24 = arith.constant 0 : index
    %c0_25 = arith.constant 0 : index
    %41 = vector.load %arg10[%c0_24, %c0_25] : memref<16x1xf32, #tpu.memory_space<vmem>>, vector<16x1xf32>
    tpu.vector_store %arg10[%c0_24, %c0_25], %40 {strides = array<i32>} : memref<16x1xf32, #tpu.memory_space<vmem>>, vector<16x1xf32>,
    %c0_26 = arith.constant 0 : index
    %c0_27 = arith.constant 0 : index
    %42 = vector.load %arg9[%c0_26, %c0_27] : memref<16x1xf32, #tpu.memory_space<vmem>>, vector<16x1xf32>
    tpu.vector_store %arg9[%c0_26, %c0_27], %29 {strides = array<i32>} : memref<16x1xf32, #tpu.memory_space<vmem>>, vector<16x1xf32>,
    %c0_i32_28 = arith.constant 0 : i32
    %43 = arith.cmpi eq, %arg1, %c0_i32_28 : i32
    %44 = arith.extui %43 : i1 to i32
    %c0_i32_29 = arith.constant 0 : i32
    %45 = arith.cmpi ne, %44, %c0_i32_29 : i32
    scf.if %45 {
      %c-100_i32 = arith.constant -100 : i32
      %46 = vector.broadcast %c-100_i32 : i32 to vector<16x1xi32>
      %47 = arith.cmpi ne, %16, %46 : vector<16x1xi32>
      %c0_30 = arith.constant 0 : index
      %c0_31 = arith.constant 0 : index
      %48 = vector.load %arg9[%c0_30, %c0_31] : memref<16x1xf32, #tpu.memory_space<vmem>>, vector<16x1xf32>
      %c0_32 = arith.constant 0 : index
      %c0_33 = arith.constant 0 : index
      %49 = vector.load %arg10[%c0_32, %c0_33] : memref<16x1xf32, #tpu.memory_space<vmem>>, vector<16x1xf32>
      %50 = math.log %49 : vector<16x1xf32>
      %51 = arith.addf %48, %50 : vector<16x1xf32>
      %c0_34 = arith.constant 0 : index
      %c0_35 = arith.constant 0 : index
      %52 = vector.load %arg11[%c0_34, %c0_35] : memref<16x1xf32, #tpu.memory_space<vmem>>, vector<16x1xf32>
      %53 = arith.subf %51, %52 : vector<16x1xf32>
      %cst_36 = arith.constant 0.000000e+00 : f32
      %54 = vector.broadcast %cst_36 : f32 to vector<16x1xf32>
      %55 = arith.select %47, %53, %54 : vector<16x1xi1>, vector<16x1xf32>
      %56 = arith.extui %47 : vector<16x1xi1> to vector<16x1xi32>
      %57 = arith.sitofp %56 : vector<16x1xi32> to vector<16x1xf32>
      %58 = tpu.iota {dimensions = array<i32: 1>} : vector<16x128xi32>
      %c0_i32_37 = arith.constant 0 : i32
      %59 = vector.broadcast %c0_i32_37 : i32 to vector<16x128xi32>
      %60 = arith.cmpi eq, %58, %59 : vector<16x128xi32>
      %cst_38 = arith.constant 0.000000e+00 : f32
      %61 = vector.shape_cast %55 : vector<16x1xf32> to vector<16x1xf32>
      %62 = vector.broadcast %61 : vector<16x1xf32> to vector<16x128xf32>
      %63 = vector.broadcast %cst_38 : f32 to vector<16x128xf32>
      %64 = arith.select %60, %62, %63 : vector<16x128xi1>, vector<16x128xf32>
      %c1_i32 = arith.constant 1 : i32
      %65 = vector.broadcast %c1_i32 : i32 to vector<16x128xi32>
      %66 = arith.cmpi eq, %58, %65 : vector<16x128xi32>
      %cst_39 = arith.constant 0.000000e+00 : f32
      %67 = vector.shape_cast %57 : vector<16x1xf32> to vector<16x1xf32>
      %68 = vector.broadcast %67 : vector<16x1xf32> to vector<16x128xf32>
      %69 = vector.broadcast %cst_39 : f32 to vector<16x128xf32>
      %70 = arith.select %66, %68, %69 : vector<16x128xi1>, vector<16x128xf32>
      %71 = arith.addf %64, %70 : vector<16x128xf32>
      %c0_40 = arith.constant 0 : index
      %c0_41 = arith.constant 0 : index
      %72 = vector.load %arg7[%c0_40, %c0_41] : memref<16x128xf32, #tpu.memory_space<vmem>>, vector<16x128xf32>
      tpu.vector_store %arg7[%c0_40, %c0_41], %71 {strides = array<i32>} : memref<16x128xf32, #tpu.memory_space<vmem>>, vector<16x128xf32>,
    } else {
    }
    return
  }
  func.func @transform_0(%arg0: i32, %arg1: i32) -> (i32, i32) {
    %c0_i32 = arith.constant 0 : i32
    %c0_i32_0 = arith.constant 0 : i32
    return %arg0, %c0_i32 : i32, i32
  }
  func.func @transform_1(%arg0: i32, %arg1: i32) -> (i32, i32) {
    %c0_i32 = arith.constant 0 : i32
    %c0_i32_0 = arith.constant 0 : i32
    %c0_i32_1 = arith.constant 0 : i32
    return %c0_i32, %c0_i32_0 : i32, i32
  }
  func.func @transform_2(%arg0: i32, %arg1: i32) -> (i32, i32) {
    %c0_i32 = arith.constant 0 : i32
    %c0_i32_0 = arith.constant 0 : i32
    return %arg1, %c0_i32 : i32, i32
  }
  func.func @transform_3(%arg0: i32, %arg1: i32) -> (i32, i32) {
    %c0_i32 = arith.constant 0 : i32
    %c0_i32_0 = arith.constant 0 : i32
    return %arg0, %c0_i32 : i32, i32
  }
  func.func @transform_4(%arg0: i32, %arg1: i32) -> (i32, i32) {
    %c0_i32 = arith.constant 0 : i32
    return %arg0, %arg1 : i32, i32
  }
  func.func @transform_5(%arg0: i32, %arg1: i32) -> (i32, i32) {
    %c0_i32 = arith.constant 0 : i32
    %c0_i32_0 = arith.constant 0 : i32
    return %arg0, %c0_i32 : i32, i32
  }
}

</mosaic_0001>

<bundles_post_ra>
// kernel: ditto_forward.12
= control target key start
LH: loop header
LB: loop body
LE: loop exit
PB: predicated region body
PF: predicated region fallthrough
CT: control target
= control target key end

     0   :  { %vm25_vm0 = vcmask 523264   ;;  %v337_v8 = vmov 0.0   ;;  %vm338_vm1 = vmmov 0   ;;  %vm244_vm2 = vcmask 519168   ;;  %s427_s0 = inlined_call_operand.vmem [shape: bf16[16,64], index: 0, kind: input, shape index: {}]   ;;  %s428_s2 = inlined_call_operand.vmem [shape: bf16[64,128], index: 2, kind: input, shape index: {}]   ;;  %s429_s3 = inlined_call_operand.vmem [shape: bf16[128,64], index: 3, kind: input, shape index: {}]   ;;  %s430_s1 = inlined_call_operand.vmem [shape: f32[1,64], index: 1, kind: input, shape index: {}]   ;;  %s431_s4 = inlined_call_operand.vmem [shape: bf16[16,64], index: 4, kind: output, shape index: {}]  }
   0x1   :  { %v270_v0 = vld [vmem:[%s427_s0] sm:$0xff]   ;;  %287 = vmatprep.subr.bf16.mxu0 %v337_v8  ;;  %299 = vmatprep.subr.bf16.mxu1 %v337_v8  ;;  %v322_v9 = vld [vmem:[%s428_s2 + $0x8] sm:$0xff]   ;;  %v323_v10 = vld [vmem:[%s428_s2 + $0x10] sm:$0xff]  }
   0x2   :  { %v367_v1 = vunpack.c.l.bf16 %v270_v0  ;;  %v369_v2 = vunpack.c.h.bf16 %v270_v0  ;;  %v321_v7 = vld [vmem:[%s428_s2] sm:$0xff]   ;;  %295 = vmatprep.mubr.msk.bf16.mxu0 %vm338_vm1, %v337_v8  ;;  %315 = vmatprep.mubr.msk.bf16.mxu1 %vm338_vm1, %v337_v8  ;;  %v324_v11 = vld [vmem:[%s428_s2 + $0x18] sm:$0xff]   ;;  %v326_v13 = vld [vmem:[%s429_s3 + $0x8] sm:$0xff]  }
   0x3   :  { %288 = vmatpush3.bf16.msra.mxu0 %v321_v7  ;;  %v325_v12 = vld [vmem:[%s429_s3] sm:$0xff]   ;;  %v327_v14 = vld [vmem:[%s429_s3 + $0x10] sm:$0xff]   ;;  %v328_v15 = vld [vmem:[%s429_s3 + $0x18] sm:$0xff]  }
   0x4   :  { %v23_v3 = vmul.f32 %v367_v1, %v367_v1  ;;  %v24_v4 = vmul.f32 %v369_v2, %v369_v2  ;;  %289 = vmatprep.subr.bf16.mxu0 %v337_v8  ;;  %300 = vmatpush3.bf16.msra.mxu1 %v325_v12  ;;  %v329_v16 = vld [vmem:[%s429_s3 + $0x20] sm:$0xff]   ;;  %v330_v17 = vld [vmem:[%s429_s3 + $0x28] sm:$0xff]   ;;  %v331_v32 = vld [vmem:[%s429_s3 + $0x30] sm:$0xff]  }
   0x5   :  { %301 = vmatprep.subr.bf16.mxu1 %v337_v8  ;;  %v251_v27 = vld [vmem:[%s430_s1] ss:$0 sm:$0xff]  ;;  %v332_v33 = vld [vmem:[%s429_s3 + $0x38] sm:$0xff]  }
   0x6   :  { %v26_v5 = vsel %vm25_vm0, %v23_v3, 0.0  ;;  %v29_v6 = vsel %vm25_vm0, %v24_v4, 0.0 }
   0x7   :  { %27 = vadd.xlane.f32.xlu0 %v26_v5  ;;  %290 = vmatpush3.bf16.msra.mxu0 %v322_v9 }
   0x8   :  { %291 = vmatprep.subr.bf16.mxu0 %v337_v8  ;;  %302 = vmatpush3.bf16.msra.mxu1 %v326_v13 }
   0x9   :  { %303 = vmatprep.subr.bf16.mxu1 %v337_v8 }
   0xb   :  { %30 = vadd.xlane.f32.xlu0 %v29_v6  ;;  %292 = vmatpush3.bf16.msra.mxu0 %v323_v10 }
   0xc   :  { %293 = vmatprep.subr.bf16.mxu0 %v337_v8  ;;  %304 = vmatpush3.bf16.msra.mxu1 %v327_v14 }
   0xd   :  { %305 = vmatprep.subr.bf16.mxu1 %v337_v8 }
   0xf   :  { %294 = vmatpush3.bf16.msra.mxu0 %v324_v11 }
  0x10   :  { %306 = vmatpush3.bf16.msra.mxu1 %v328_v15 }
  0x11   :  { %307 = vmatprep.subr.bf16.mxu1 %v337_v8 }
  0x14   :  { %308 = vmatpush3.bf16.msra.mxu1 %v329_v16 }
  0x15   :  { %309 = vmatprep.subr.bf16.mxu1 %v337_v8 }
  0x18   :  { %310 = vmatpush3.bf16.msra.mxu1 %v330_v17 }
  0x19   :  { %311 = vmatprep.subr.bf16.mxu1 %v337_v8 }
  0x1c   :  { %312 = vmatpush3.bf16.msra.mxu1 %v331_v32 }
  0x1d   :  { %313 = vmatprep.subr.bf16.mxu1 %v337_v8 }
  0x20   :  { %314 = vmatpush3.bf16.msra.mxu1 %v332_v33 }
  0x94   :  { %v28_v18 = vpop.xlane.xlu0 %27 }
  0x95   :  { %v33_v19 = vmul.f32 0.015625, %v28_v18 }
  0x97   :  { %v35_v20 = vadd.f32 1e-06, %v33_v19 }
  0x98   :  { %v31_v21 = vpop.xlane.xlu0 %30 }
  0x99   :  { %333 = vrsqrt.f32 %v35_v20  ;;  %v34_v22 = vmul.f32 0.015625, %v31_v21 }
  0x9b   :  { %v36_v23 = vadd.f32 1e-06, %v34_v22 }
  0x9d   :  { %335 = vrsqrt.f32 %v36_v23 }
  0xa3   :  { %v334_v24 = vpop.eup %333 }
  0xa4   :  { %v39_v25 = vmul.f32 %v334_v24, %v367_v1 }
  0xa6   :  { %v47_v29 = vmul.f32 %v251_v27, %v39_v25 }
  0xa7   :  { %v336_v26 = vpop.eup %335 }
  0xa8   :  { %v40_v28 = vmul.f32 %v336_v26, %v369_v2 }
  0xaa   :  { %v48_v30 = vmul.f32 %v251_v27, %v40_v28 }
  0xac   :  { %v49_v31 = vpack.c.bf16 %v48_v30, %v47_v29 }
  0xae   :  { %296 = vmatmul.mubr.msk.bf16.vlgmr.msra.gmra.mrb[0].mxu0 %vm25_vm0, %v49_v31 }
 0x181   :  { %v119_v34 = vpop.f32.mrb[0].mxu0 }
 0x182   :  { %v297_v35 = vpop.f32.mrb[1].mxu0  ;;  %v126_v37 = vmax.f32 %v119_v34, 0.0 }
 0x183   :  { %v122_v36 = vpop.f32.mrb[2].mxu0 }
 0x184   :  { %v127_v38 = vmax.f32 %v122_v36, 0.0  ;;  %v298_v39 = vpop.f32.mrb[3].mxu0 }
 0x186   :  { %v128_v40 = vpack.c.bf16 %v127_v38, %v126_v37 }
 0x188   :  { %316 = vmatmul.mubr.bf16.vlgmr.msra.gmra.mrb[0].mxu1 %v128_v40 }
 0x25b   :  { %v227_v41 = vpop.f32.mrb[0].mxu1 }
 0x25c   :  { %v234_v42 = vadd.f32 %v367_v1, %v227_v41  ;;  %v317_v43 = vpop.f32.mrb[1].mxu1 }
 0x25d   :  { %v230_v44 = vpop.f32.mrb[2].mxu1 }
 0x25e   :  { %v267_v45 = vpack.c.bf16 %v234_v42, %v234_v42  ;;  %v235_v46 = vadd.f32 %v369_v2, %v230_v44  ;;  %v318_v47 = vpop.f32.mrb[3].mxu1 }
 0x260   :  { %245 = vst.msk [vmem:[%s431_s4] sm:$0xf] %vm244_vm2, %v267_v45  ;;  %v268_v48 = vpack.c.bf16 %v235_v46, %v235_v46 }
 0x262   :  { %246 = vst.msk [vmem:[%s431_s4 + $0x4] sm:$0xf] %vm244_vm2, %v268_v48 }

// kernel: ditto_forward.14
= control target key start
LH: loop header
LB: loop body
LE: loop exit
PB: predicated region body
PF: predicated region fallthrough
CT: control target
= control target key end

     0   :  { %vm28_vm0 = vcmask 523264   ;;  %v370_v8 = vmov 0.0   ;;  %vm371_vm1 = vmmov 0   ;;  %vm272_vm2 = vcmask 519168   ;;  %s470_s0 = inlined_call_operand.vmem [shape: bf16[16,64], index: 0, kind: input, shape index: {}]   ;;  %s471_s2 = inlined_call_operand.vmem [shape: bf16[64,128], index: 2, kind: input, shape index: {}]   ;;  %s472_s3 = inlined_call_operand.vmem [shape: bf16[128,64], index: 3, kind: input, shape index: {}]   ;;  %s473_s1 = inlined_call_operand.vmem [shape: f32[1,64], index: 1, kind: input, shape index: {}]   ;;  %s474_s4 = inlined_call_operand.vmem [shape: f32[1,64], index: 4, kind: input, shape index: {}]   ;;  %s475_s5 = inlined_call_operand.vmem [shape: bf16[16,64], index: 5, kind: output, shape index: {}]  }
   0x1   :  { %v299_v0 = vld [vmem:[%s470_s0] sm:$0xff]   ;;  %316 = vmatprep.subr.bf16.mxu0 %v370_v8  ;;  %328 = vmatprep.subr.bf16.mxu1 %v370_v8  ;;  %v351_v9 = vld [vmem:[%s471_s2 + $0x8] sm:$0xff]   ;;  %v352_v10 = vld [vmem:[%s471_s2 + $0x10] sm:$0xff]  }
   0x2   :  { %v405_v1 = vunpack.c.l.bf16 %v299_v0  ;;  %v407_v2 = vunpack.c.h.bf16 %v299_v0  ;;  %v350_v7 = vld [vmem:[%s471_s2] sm:$0xff]   ;;  %324 = vmatprep.mubr.msk.bf16.mxu0 %vm371_vm1, %v370_v8  ;;  %344 = vmatprep.mubr.msk.bf16.mxu1 %vm371_vm1, %v370_v8  ;;  %v353_v11 = vld [vmem:[%s471_s2 + $0x18] sm:$0xff]   ;;  %v355_v13 = vld [vmem:[%s472_s3 + $0x8] sm:$0xff]  }
   0x3   :  { %317 = vmatpush3.bf16.msra.mxu0 %v350_v7  ;;  %v354_v12 = vld [vmem:[%s472_s3] sm:$0xff]   ;;  %v356_v14 = vld [vmem:[%s472_s3 + $0x10] sm:$0xff]   ;;  %v357_v15 = vld [vmem:[%s472_s3 + $0x18] sm:$0xff]  }
   0x4   :  { %v26_v3 = vmul.f32 %v405_v1, %v405_v1  ;;  %v27_v4 = vmul.f32 %v407_v2, %v407_v2  ;;  %318 = vmatprep.subr.bf16.mxu0 %v370_v8  ;;  %329 = vmatpush3.bf16.msra.mxu1 %v354_v12  ;;  %v358_v16 = vld [vmem:[%s472_s3 + $0x20] sm:$0xff]   ;;  %v359_v17 = vld [vmem:[%s472_s3 + $0x28] sm:$0xff]   ;;  %v360_v32 = vld [vmem:[%s472_s3 + $0x30] sm:$0xff]  }
   0x5   :  { %330 = vmatprep.subr.bf16.mxu1 %v370_v8  ;;  %v279_v27 = vld [vmem:[%s473_s1] ss:$0 sm:$0xff]  ;;  %v361_v33 = vld [vmem:[%s472_s3 + $0x38] sm:$0xff]  }
   0x6   :  { %v29_v5 = vsel %vm28_vm0, %v26_v3, 0.0  ;;  %v32_v6 = vsel %vm28_vm0, %v27_v4, 0.0  ;;  %v293_v58 = vld [vmem:[%s474_s4] ss:$0 sm:$0xff] }
   0x7   :  { %30 = vadd.xlane.f32.xlu0 %v29_v5  ;;  %319 = vmatpush3.bf16.msra.mxu0 %v351_v9 }
   0x8   :  { %320 = vmatprep.subr.bf16.mxu0 %v370_v8  ;;  %331 = vmatpush3.bf16.msra.mxu1 %v355_v13 }
   0x9   :  { %332 = vmatprep.subr.bf16.mxu1 %v370_v8 }
   0xb   :  { %33 = vadd.xlane.f32.xlu0 %v32_v6  ;;  %321 = vmatpush3.bf16.msra.mxu0 %v352_v10 }
   0xc   :  { %322 = vmatprep.subr.bf16.mxu0 %v370_v8  ;;  %333 = vmatpush3.bf16.msra.mxu1 %v356_v14 }
   0xd   :  { %334 = vmatprep.subr.bf16.mxu1 %v370_v8 }
   0xf   :  { %323 = vmatpush3.bf16.msra.mxu0 %v353_v11 }
  0x10   :  { %335 = vmatpush3.bf16.msra.mxu1 %v357_v15 }
  0x11   :  { %336 = vmatprep.subr.bf16.mxu1 %v370_v8 }
  0x14   :  { %337 = vmatpush3.bf16.msra.mxu1 %v358_v16 }
  0x15   :  { %338 = vmatprep.subr.bf16.mxu1 %v370_v8 }
  0x18   :  { %339 = vmatpush3.bf16.msra.mxu1 %v359_v17 }
  0x19   :  { %340 = vmatprep.subr.bf16.mxu1 %v370_v8 }
  0x1c   :  { %341 = vmatpush3.bf16.msra.mxu1 %v360_v32 }
  0x1d   :  { %342 = vmatprep.subr.bf16.mxu1 %v370_v8 }
  0x20   :  { %343 = vmatpush3.bf16.msra.mxu1 %v361_v33 }
  0x94   :  { %v31_v18 = vpop.xlane.xlu0 %30 }
  0x95   :  { %v36_v19 = vmul.f32 0.015625, %v31_v18 }
  0x97   :  { %v38_v20 = vadd.f32 1e-06, %v36_v19 }
  0x98   :  { %v34_v21 = vpop.xlane.xlu0 %33 }
  0x99   :  { %362 = vrsqrt.f32 %v38_v20  ;;  %v37_v22 = vmul.f32 0.015625, %v34_v21 }
  0x9b   :  { %v39_v23 = vadd.f32 1e-06, %v37_v22 }
  0x9d   :  { %364 = vrsqrt.f32 %v39_v23 }
  0xa3   :  { %v363_v24 = vpop.eup %362 }
  0xa4   :  { %v42_v25 = vmul.f32 %v363_v24, %v405_v1 }
  0xa6   :  { %v50_v29 = vmul.f32 %v279_v27, %v42_v25 }
  0xa7   :  { %v365_v26 = vpop.eup %364 }
  0xa8   :  { %v43_v28 = vmul.f32 %v365_v26, %v407_v2 }
  0xaa   :  { %v51_v30 = vmul.f32 %v279_v27, %v43_v28 }
  0xac   :  { %v52_v31 = vpack.c.bf16 %v51_v30, %v50_v29 }
  0xae   :  { %325 = vmatmul.mubr.msk.bf16.vlgmr.msra.gmra.mrb[0].mxu0 %vm28_vm0, %v52_v31 }
 0x181   :  { %v122_v34 = vpop.f32.mrb[0].mxu0 }
 0x182   :  { %v326_v35 = vpop.f32.mrb[1].mxu0  ;;  %v129_v37 = vmax.f32 %v122_v34, 0.0 }
 0x183   :  { %v125_v36 = vpop.f32.mrb[2].mxu0 }
 0x184   :  { %v130_v38 = vmax.f32 %v125_v36, 0.0  ;;  %v327_v39 = vpop.f32.mrb[3].mxu0 }
 0x186   :  { %v131_v40 = vpack.c.bf16 %v130_v38, %v129_v37 }
 0x188   :  { %345 = vmatmul.mubr.bf16.vlgmr.msra.gmra.mrb[0].mxu1 %v131_v40 }
 0x25b   :  { %v230_v41 = vpop.f32.mrb[0].mxu1 }
 0x25c   :  { %v237_v42 = vadd.f32 %v405_v1, %v230_v41  ;;  %v346_v43 = vpop.f32.mrb[1].mxu1 }
 0x25d   :  { %v233_v44 = vpop.f32.mrb[2].mxu1 }
 0x25e   :  { %v238_v45 = vadd.f32 %v407_v2, %v233_v44  ;;  %v347_v46 = vpop.f32.mrb[3].mxu1  ;;  %v240_v47 = vmul.f32 %v237_v42, %v237_v42 }
 0x260   :  { %v242_v48 = vsel %vm28_vm0, %v240_v47, 0.0  ;;  %v241_v49 = vmul.f32 %v238_v45, %v238_v45 }
 0x261   :  { %243 = vadd.xlane.f32.xlu1 %v242_v48 }
 0x262   :  { %v245_v50 = vsel %vm28_vm0, %v241_v49, 0.0 }
 0x265   :  { %246 = vadd.xlane.f32.xlu1 %v245_v50 }
 0x2ee   :  { %v244_v51 = vpop.xlane.xlu1 %243 }
 0x2ef   :  { %v248_v52 = vmul.f32 0.015625, %v244_v51 }
 0x2f1   :  { %v250_v53 = vadd.f32 1e-06, %v248_v52 }
 0x2f2   :  { %v247_v54 = vpop.xlane.xlu1 %246 }
 0x2f3   :  { %366 = vrsqrt.f32 %v250_v53  ;;  %v249_v55 = vmul.f32 0.015625, %v247_v54 }
 0x2f5   :  { %v251_v56 = vadd.f32 1e-06, %v249_v55 }
 0x2f7   :  { %368 = vrsqrt.f32 %v251_v56 }
 0x2fd   :  { %v367_v57 = vpop.eup %366 }
 0x2fe   :  { %v254_v59 = vmul.f32 %v367_v57, %v237_v42 }
 0x300   :  { %v262_v60 = vmul.f32 %v293_v58, %v254_v59 }
 0x301   :  { %v369_v61 = vpop.eup %368 }
 0x302   :  { %v296_v62 = vpack.c.bf16 %v262_v60, %v262_v60  ;;  %v255_v63 = vmul.f32 %v369_v61, %v238_v45 }
 0x304   :  { %273 = vst.msk [vmem:[%s475_s5] sm:$0xf] %vm272_vm2, %v296_v62  ;;  %v263_v0 = vmul.f32 %v293_v58, %v255_v63 }
 0x306   :  { %v297_v1 = vpack.c.bf16 %v263_v0, %v263_v0 }
 0x308   :  { %274 = vst.msk [vmem:[%s475_s5 + $0x4] sm:$0xf] %vm272_vm2, %v297_v1 }

// kernel: ditto_forward.11
= control target key start
LH: loop header
LB: loop body
LE: loop exit
PB: predicated region body
PF: predicated region fallthrough
CT: control target
= control target key end

     0   :  { %s1240_s21 = smov 0   ;;  %s1404_s0 = inlined_call_operand.vmem [shape: bf16[2,8,64], index: 0, kind: input, shape index: {}]   ;;  %s1405_s1 = inlined_call_operand.vmem [shape: f32[1,64], index: 1, kind: input, shape index: {}]   ;;  %s1406_s2 = inlined_call_operand.vmem [shape: bf16[64,192], index: 2, kind: input, shape index: {}]   ;;  %s1407_s3 = inlined_call_operand.vmem [shape: bf16[64,64], index: 3, kind: input, shape index: {}]   ;;  %s1408_s4 = inlined_call_operand.vmem [shape: bf16[4,8,8], index: 4, kind: input, shape index: {}]   ;;  %s1409_s5 = inlined_call_operand.vmem [shape: f32[2,1,8], index: 5, kind: input, shape index: {}]   ;;  %s1410_s6 = inlined_call_operand.vmem [shape: bf16[2,8,64], index: 6, kind: output, shape index: {}]  }
   0x1 LB: > { %s1012_s22 = sadd.s32 4294967295, %s1193_s21   ;;  %p1016_p0 = scmp.ge.s32.totalorder %s1193_s21, 1  ;;  %s1193_s21 = sphi %s1240_s21, %s16_s21  }
   0x2   : > { %p219_p1 = scmp.lt.s32.totalorder %s1193_s21, 3 }
   0x4   : > { %p220_p2 = pnand %p1016_p0, %p219_p1 }
   0x5   : > { %p250_p3 = scmp.lt.s32.totalorder (!%p220_p2), %s1012_s22, 1  ;;  %vm266_vm0 = vcmask (!%p220_p2), 523264   ;;  %v1153_v4 = vld [vmem:[%s1406_s2 + $0x4] ss:$8 sps:$4 sm:$0xff] (!%p220_p2)   ;;  %v1155_v5 = vld [vmem:[%s1406_s2] ss:$8 sps:$4 sm:$0xff] (!%p220_p2)  }
   0x6   : > { %223 = sbr.rel (%p220_p2) target bundleno = 2164 (0x874), region = 44  ;;  %v1156_v6 = vld [vmem:[%s1406_s2 + $0x14] ss:$8 sps:$4 sm:$0xff] (!%p220_p2)   ;;  %334 = vmatprep.subr.bf16.mxu0 (!%p220_p2), %v1153_v4  ;;  %v1158_v7 = vld [vmem:[%s1406_s2 + $0x10] ss:$8 sps:$4 sm:$0xff] (!%p220_p2)   ;;  %v1195_v9 = vmov (!%p220_p2), 0  }
   0x7   : > { %335 = vmatpush1.bf16.msra.mxu0 (!%p220_p2), %v1155_v5  ;;  %v1159_v8 = vld [vmem:[%s1406_s2 + $0x24] ss:$8 sps:$4 sm:$0xff] (!%p220_p2)   ;;  %366 = vmatprep.mubr.bf16.mxu0 (!%p220_p2), %v1195_v9  ;;  %v1161_v10 = vld [vmem:[%s1406_s2 + $0x20] ss:$8 sps:$4 sm:$0xff] (!%p220_p2)   ;;  %v1162_v11 = vld [vmem:[%s1406_s2 + $0x34] ss:$8 sps:$4 sm:$0xff] (!%p220_p2)  }
   0x8   : > { %336 = vmatprep.subr.bf16.mxu0 (!%p220_p2), %v1156_v6  ;;  %v1164_v12 = vld [vmem:[%s1406_s2 + $0x30] ss:$8 sps:$4 sm:$0xff] (!%p220_p2)   ;;  %v1019_v17 = vld [vmem:[%s1405_s1] ss:$0 sm:$0xff] (!%p220_p2)  ;;  %v1196_v21 = vmov (!%p220_p2), 0.0   ;;  %vm1197_vm1 = vmmov (!%p220_p2), 0  }
   0x9   : > { %1075 = vmatprep.subr.bf16.mxu1 (!%p220_p2), %v1196_v21  ;;  %1077 = vmatprep.mubr.msk.bf16.mxu1 (!%p220_p2), %vm1197_vm1, %v1196_v21  ;;  %s1198_s24 = smov (!%p220_p2), 64   ;;  %s1199_s25 = smov (!%p220_p2), 32   ;;  %vm383_vm2 = vcmask (!%p220_p2), 130048   ;;  %vm453_vm3 = vcmask (!%p220_p2), 1043456   ;;  %v1313_v33 = vld [vmem:[%s1408_s4] sm:$0xff] (!%p220_p2)   ;;  %vm437_vm4 = vcmask (!%p220_p2), 64512  }
   0xa   : > { %v379_v34 = vunpack.c.l.bf16 (!%p220_p2), %v1313_v33  ;;  %s1201_s8 = smov (!%p220_p2), 48   ;;  %s1202_s9 = smov (!%p220_p2), 112   ;;  %v1036_v59 = vld [vmem:[%s1408_s4 + $0x8] sm:$0xff] (!%p220_p2)   ;;  %vm498_vm5 = vcmask (!%p220_p2), 125952   ;;  %vm622_vm6 = vcmask (!%p220_p2), 257152   ;;  %vm745_vm7 = vcmask (!%p220_p2), 388352  }
   0xb   : > { %337 = vmatpush1.bf16.msra.mxu0 (!%p220_p2), %v1158_v7  ;;  %s1203_s10 = smov (!%p220_p2), 96   ;;  %s1204_s11 = smov (!%p220_p2), 80   ;;  %v626_v60 = vunpack.c.l.bf16 (!%p220_p2), %v1036_v59  ;;  %vm868_vm8 = vcmask (!%p220_p2), 519552   ;;  %vm948_vm9 = vcmask (!%p220_p2), 519168  }
   0xc   : > { %338 = vmatprep.subr.bf16.mxu0 (!%p220_p2), %v1159_v8 }
   0xd   : > { %s1412_s22 = smov (!%p250_p3, %s1012_s22), 1 }
   0xe   : > { %s1017_s23 = sshll.u32 %s1412_s22, 2  ;;  %s256_s7 = scalar_lea.vmem %s1409_s5, %s1412_s22 }
   0xf   : > { %s253_s26 = scalar_lea.vmem %s1404_s0, %s1017_s23  ;;  %339 = vmatpush1.bf16.msra.mxu0 %v1161_v10  ;;  %v1320_v36 = vld [vmem:[%s256_s7] ss:$0 sm:$0xff]  ;;  %v749_v10 = vunpack.c.h.bf16 %v1036_v59  ;;  %s260_s27 = scalar_lea.vmem %s1410_s6, %s1017_s23 }
  0x10   : > { %v262_v0 = vld [vmem:[%s253_s26] sm:$0xf]  ;;  %340 = vmatprep.subr.bf16.mxu0 %v1162_v11  ;;  %s1200_s26 = smov 16  }
  0x11   : > { %v1256_v1 = vunpack.c.l.bf16 %v262_v0 }
  0x13   : > { %v265_v2 = vmul.f32 %v1256_v1, %v1256_v1  ;;  %341 = vmatpush1.bf16.msra.mxu0 %v1164_v12  ;;  %v502_v12 = vunpack.c.h.bf16 %v1313_v33 }
  0x14   : > { %1099 = vmatprep.subr.bf16.mxu0 %v1196_v21 }
  0x15   : > { %v267_v3 = vsel %vm266_vm0, %v265_v2, 0.0 }
  0x16   : > { %268 = vadd.xlane.f32.xlu0 %v267_v3 }
  0xa3   : > { %v269_v13 = vpop.xlane.xlu0 %268 }
  0xa4   : > { %v271_v14 = vmul.f32 0.015625, %v269_v13 }
  0xa6   : > { %v272_v15 = vadd.f32 1e-06, %v271_v14 }
  0xa8   : > { %1169 = vrsqrt.f32 %v272_v15 }
  0xb2   : > { %v1170_v16 = vpop.eup %1169 }
  0xb3   : > { %v274_v18 = vmul.f32 %v1170_v16, %v1256_v1 }
  0xb5   : > { %v281_v19 = vmul.f32 %v1019_v17, %v274_v18 }
  0xb7   : > { %v282_v20 = vpack.c.bf16 %v281_v19, %v281_v19 }
  0xb9   : > { %1028 = vmatmul.mubr.msk.bf16.vlgmr.msra.gmra.mrb[0].mxu0 %vm266_vm0, %v282_v20 }
  0xba   : > { %1101 = vmatprep.mubr.msk.bf16.mxu0 %vm1197_vm1, %v1196_v21 }
 0x18c   : > { %v368_v22 = vpop.f32.mrb[0].mxu0 }
 0x18d   : > { %v376_v23 = vpack.c.bf16 %v368_v22, %v368_v22  ;;  %v370_v24 = vpop.f32.mrb[1].mxu0 }
 0x18e   : > { %v372_v25 = vpop.f32.mrb[2].mxu0  ;;  %v1300_v30 = vpack.c.bf16 %v370_v24, %v370_v24 }
 0x18f   : > { %381 = vrot.lane.b32.xlu0 %v376_v23, %s1198_s24  ;;  %v373_v26 = vpop.f32.mrb[3].mxu0 }
 0x190   : > { %v455_v32 = vsel %vm453_vm3, %v1300_v30, 0 }
 0x193   : > { %629 = vrot.lane.b32.xlu0 %v376_v23, %s1199_s25 }
 0x197   : > { %752 = vrot.lane.b32.xlu0 %v376_v23, %s1200_s26 }
 0x201   : > { %v382_v27 = vpop.permute.xlu0 %381 }
 0x202   : > { %v388_v28 = vsel %vm383_vm2, %v382_v27, 0 }
 0x203   : > { %1076 = vmatpush3.bf16.xpose.msra.mxu1 %v388_v28 }
 0x204   : > { %1081 = vmatprep.subr.bf16.mxu1 %v1196_v21 }
 0x205   : > { %v630_v29 = vpop.permute.xlu0 %629 }
 0x206   : > { %v635_v31 = vsel %vm383_vm2, %v630_v29, 0 }
 0x207   : > { %1100 = vmatpush3.bf16.xpose.msra.mxu0 %v635_v31 }
 0x208   : > { %1111 = vmatprep.subr.bf16.mxu0 %v1196_v21 }
 0x209   : > { %v753_v51 = vpop.permute.xlu0 %752 }
 0x20a   : > { %1078 = vmatmul.mubr.msk.bf16.vlgmr.msra.gmra.mrb[0].mxu1 %vm383_vm2, %v376_v23  ;;  %v758_v55 = vsel %vm383_vm2, %v753_v51, 0 }
 0x20b   : > { %1082 = vmatpush3.bf16.msra.mxu1 %v455_v32  ;;  %1083 = vmatprep.mubr.msk.bf16.mxu1 %vm1197_vm1, %v1196_v21 }
 0x20c   : > { %1087 = vmatprep.subr.bf16.mxu1 %v1196_v21 }
 0x2dd   : > { %v424_v35 = vpop.f32.mrb[0].mxu1 }
 0x2de   : > { %v425_v37 = vadd.f32 %v424_v35, %v379_v34  ;;  %v1079_v38 = vpop.f32.mrb[1].mxu1 }
 0x2df   : > { %v427_v39 = vpop.f32.mrb[2].mxu1 }
 0x2e0   : > { %v1080_v40 = vpop.f32.mrb[3].mxu1  ;;  %v436_v41 = vadd.f32 %v1320_v36, %v425_v37 }
 0x2e2   : > { %v438_v42 = vsel %vm437_vm4, %v436_v41, -inf }
 0x2e3   : > { %439 = vmax.xlane.f32.xlu1 %v438_v42 }
 0x370   : > { %v440_v43 = vpop.xlane.xlu1 %439 }
 0x371   : > { %v441_v44 = vsub.f32 %v436_v41, %v440_v43 }
 0x373   : > { %v442_v45 = vmul.f32 1.442695, %v441_v44 }
 0x375   : > { %1171 = vpow2.f32 %v442_v45 }
 0x37f   : > { %v1172_v46 = vpop.eup %1171 }
 0x380   : > { %v444_v47 = vsel %vm437_vm4, %v1172_v46, 0.0 }
 0x381   : > { %445 = vadd.xlane.f32.xlu1 %v444_v47 }
 0x392   : > { %505 = vrot.lane.b32.xlu1 %v376_v23, %s1201_s8 }
 0x396   : > { %503 = vrot.lane.b32.xlu1 %v376_v23, %s1202_s9 }
 0x39a   : > { %627 = vrot.lane.b32.xlu1 %v376_v23, %s1203_s10 }
 0x39e   : > { %750 = vrot.lane.b32.xlu1 %v376_v23, %s1204_s11 }
 0x40e   : > { %v446_v48 = vpop.xlane.xlu1 %445 }
 0x40f   : > { %1173 = vrcp.f32 %v446_v48 }
 0x412   : > { %v506_v49 = vpop.permute.xlu1 %505 }
 0x413   : > { %v511_v57 = vsel %vm383_vm2, %v506_v49, 0 }
 0x416   : > { %v504_v50 = vpop.permute.xlu1 %503 }
 0x419   : > { %v1174_v52 = vpop.eup %1173 }
 0x41a   : > { %v448_v53 = vmul.f32 %v1174_v52, %v1172_v46  ;;  %v628_v54 = vpop.permute.xlu1 %627 }
 0x41b   : > { %1102 = vmatmul.mubr.msk.bf16.vlgmr.msra.gmra.mrb[4].mxu0 %vm383_vm2, %v628_v54 }
 0x41c   : > { %1112 = vmatpush3.bf16.xpose.msra.mxu0 %v758_v55  ;;  %v449_v56 = vpack.c.bf16 %v448_v53, %v448_v53  ;;  %1113 = vmatprep.mubr.msk.bf16.mxu0 %vm1197_vm1, %v1196_v21 }
 0x41d   : > { %1123 = vmatprep.subr.bf16.mxu0 %v1196_v21 }
 0x41e   : > { %1084 = vmatmul.mubr.msk.bf16.vlgmr.msra.gmra.mrb[4].mxu1 %vm437_vm4, %v449_v56  ;;  %v751_v58 = vpop.permute.xlu1 %750 }
 0x41f   : > { %1088 = vmatpush3.bf16.xpose.msra.mxu1 %v511_v57  ;;  %1089 = vmatprep.mubr.msk.bf16.mxu1 %vm1197_vm1, %v1196_v21 }
 0x420   : > { %1093 = vmatprep.subr.bf16.mxu1 %v1196_v21 }
 0x423   : > { %1114 = vmatmul.mubr.msk.bf16.vlgmr.msra.gmra.mrb[8].mxu0 %vm383_vm2, %v751_v58 }
 0x424   : > { %1131 = vmatprep.mubr.msk.bf16.mxu0 %vm1197_vm1, %v1196_v21 }
 0x426   : > { %1090 = vmatmul.mubr.msk.bf16.vlgmr.msra.gmra.mrb[8].mxu1 %vm383_vm2, %v504_v50 }
 0x427   : > { %1095 = vmatprep.mubr.msk.bf16.mxu1 %vm1197_vm1, %v1196_v21 }
 0x4ee   : > { %v671_v61 = vpop.f32.mrb[4].mxu0 }
 0x4ef   : > { %v672_v62 = vadd.f32 %v671_v61, %v626_v60  ;;  %v1103_v63 = vpop.f32.mrb[5].mxu0  ;;  %v1165_v60 = vld [vmem:[%s1407_s3] sm:$0xff]  }
 0x4f0   : > { %v674_v0 = vpop.f32.mrb[6].mxu0  ;;  %1124 = vmatpush3.bf16.msra.mxu0 %v1165_v60 }
 0x4f1   : > { %v491_v2 = vpop.f32.mrb[4].mxu1  ;;  %v1104_v3 = vpop.f32.mrb[7].mxu0  ;;  %v677_v4 = vadd.f32 %v1320_v36, %v672_v62  ;;  %v1166_v62 = vld [vmem:[%s1407_s3 + $0x8] sm:$0xff]   ;;  %1125 = vmatprep.subr.bf16.mxu0 %v1196_v21 }
 0x4f2   : > { %v497_v5 = vpack.c.bf16 %v491_v2, %v491_v2  ;;  %v1085_v6 = vpop.f32.mrb[5].mxu1 }
 0x4f3   : > { %v494_v7 = vpop.f32.mrb[6].mxu1  ;;  %v678_v8 = vsel %vm437_vm4, %v677_v4, -inf  ;;  %v1168_v6 = vld [vmem:[%s1407_s3 + $0x18] sm:$0xff]  }
 0x4f4   : > { %499 = vst.msk [vmem:[#allocation2] sm:$0xf] %vm498_vm5, %v497_v5  ;;  %v1086_v9 = vpop.f32.mrb[7].mxu1  ;;  %679 = vmax.xlane.f32.xlu1 %v678_v8  ;;  %1126 = vmatpush3.bf16.msra.mxu0 %v1166_v62 }
 0x4f5   : > { %1127 = vmatprep.subr.bf16.mxu0 %v1196_v21 }
 0x4f6   : > { %v794_v11 = vpop.f32.mrb[8].mxu0 }
 0x4f7   : > { %v1115_v13 = vpop.f32.mrb[9].mxu0  ;;  %v795_v17 = vadd.f32 %v794_v11, %v749_v10 }
 0x4f8   : > { %v797_v14 = vpop.f32.mrb[10].mxu0 }
 0x4f9   : > { %v547_v15 = vpop.f32.mrb[8].mxu1  ;;  %v1116_v16 = vpop.f32.mrb[11].mxu0  ;;  %v800_v25 = vadd.f32 %v1320_v36, %v795_v17 }
 0x4fa   : > { %v548_v18 = vadd.f32 %v547_v15, %v502_v12  ;;  %v1091_v19 = vpop.f32.mrb[9].mxu1 }
 0x4fb   : > { %v550_v20 = vpop.f32.mrb[10].mxu1  ;;  %v801_v26 = vsel %vm437_vm4, %v800_v25, -inf }
 0x4fc   : > { %v1092_v22 = vpop.f32.mrb[11].mxu1  ;;  %v553_v23 = vadd.f32 %v1320_v36, %v548_v18 }
 0x4fe   : > { %v554_v24 = vsel %vm437_vm4, %v553_v23, -inf }
 0x4ff   : > { %555 = vmax.xlane.f32.xlu0 %v554_v24 }
 0x503   : > { %802 = vmax.xlane.f32.xlu0 %v801_v26 }
 0x581   : > { %v680_v27 = vpop.xlane.xlu1 %679 }
 0x582   : > { %v681_v28 = vsub.f32 %v677_v4, %v680_v27  ;;  %v1167_v4 = vld [vmem:[%s1407_s3 + $0x10] sm:$0xff]  }
 0x583   : > { %1128 = vmatpush3.bf16.msra.mxu0 %v1167_v4 }
 0x584   : > { %v682_v29 = vmul.f32 1.442695, %v681_v28  ;;  %1129 = vmatprep.subr.bf16.mxu0 %v1196_v21 }
 0x586   : > { %1175 = vpow2.f32 %v682_v29 }
 0x587   : > { %1130 = vmatpush3.bf16.msra.mxu0 %v1168_v6 }
 0x58c   : > { %v556_v31 = vpop.xlane.xlu0 %555 }
 0x58d   : > { %v557_v32 = vsub.f32 %v553_v23, %v556_v31 }
 0x58f   : > { %v558_v33 = vmul.f32 1.442695, %v557_v32 }
 0x590   : > { %v1176_v34 = vpop.eup %1175  ;;  %v803_v35 = vpop.xlane.xlu0 %802 }
 0x591   : > { %1177 = vpow2.f32 %v558_v33  ;;  %v804_v37 = vsub.f32 %v800_v25, %v803_v35  ;;  %v684_v38 = vsel %vm437_vm4, %v1176_v34, 0.0 }
 0x592   : > { %685 = vadd.xlane.f32.xlu0 %v684_v38 }
 0x593   : > { %v805_v39 = vmul.f32 1.442695, %v804_v37 }
 0x595   : > { %1179 = vpow2.f32 %v805_v39 }
 0x59b   : > { %v1178_v36 = vpop.eup %1177 }
 0x59c   : > { %v560_v40 = vsel %vm437_vm4, %v1178_v36, 0.0 }
 0x59d   : > { %561 = vadd.xlane.f32.xlu0 %v560_v40 }
 0x59f   : > { %v1180_v41 = vpop.eup %1179 }
 0x5a0   : > { %v807_v42 = vsel %vm437_vm4, %v1180_v41, 0.0 }
 0x5a1   : > { %808 = vadd.xlane.f32.xlu1 %v807_v42 }
 0x5b2   : > { %690 = vrot.lane.b32.xlu1 %v1300_v30, %s1203_s10 }
 0x5b3   : > { %567 = vrot.lane.b32.xlu0 %v1300_v30, %s1202_s9 }
 0x5b6   : > { %813 = vrot.lane.b32.xlu1 %v1300_v30, %s1204_s11 }
 0x61f   : > { %v686_v43 = vpop.xlane.xlu0 %685 }
 0x62a   : > { %v562_v44 = vpop.xlane.xlu0 %561 }
 0x62b   : > { %1181 = vrcp.f32 %v562_v44 }
 0x62c   : > { %1183 = vrcp.f32 %v686_v43 }
 0x62e   : > { %v568_v45 = vpop.permute.xlu0 %567  ;;  %v809_v47 = vpop.xlane.xlu1 %808 }
 0x62f   : > { %v573_v46 = vsel %vm453_vm3, %v568_v45, 0  ;;  %1185 = vrcp.f32 %v809_v47 }
 0x630   : > { %1094 = vmatpush3.bf16.msra.mxu1 %v573_v46 }
 0x631   : > { %1105 = vmatprep.subr.bf16.mxu1 %v1196_v21 }
 0x632   : > { %v691_v50 = vpop.permute.xlu1 %690 }
 0x633   : > { %v696_v53 = vsel %vm453_vm3, %v691_v50, 0 }
 0x635   : > { %v1182_v48 = vpop.eup %1181 }
 0x636   : > { %v564_v49 = vmul.f32 %v1182_v48, %v1178_v36  ;;  %v1184_v52 = vpop.eup %1183  ;;  %v814_v54 = vpop.permute.xlu1 %813 }
 0x637   : > { %v688_v30 = vmul.f32 %v1184_v52, %v1176_v34  ;;  %v819_v57 = vsel %vm453_vm3, %v814_v54, 0 }
 0x638   : > { %v565_v51 = vpack.c.bf16 %v564_v49, %v564_v49 }
 0x639   : > { %v689_v55 = vpack.c.bf16 %v688_v30, %v688_v30  ;;  %v1186_v56 = vpop.eup %1185 }
 0x63a   : > { %1096 = vmatmul.mubr.msk.bf16.vlgmr.msra.gmra.mrb[12].mxu1 %vm437_vm4, %v565_v51  ;;  %v811_v58 = vmul.f32 %v1186_v56, %v1180_v41 }
 0x63b   : > { %1106 = vmatpush3.bf16.msra.mxu1 %v696_v53  ;;  %1107 = vmatprep.mubr.msk.bf16.mxu1 %vm1197_vm1, %v1196_v21 }
 0x63c   : > { %1117 = vmatprep.subr.bf16.mxu1 %v1196_v21  ;;  %v812_v59 = vpack.c.bf16 %v811_v58, %v811_v58 }
 0x642   : > { %1108 = vmatmul.mubr.msk.bf16.vlgmr.msra.gmra.mrb[16].mxu1 %vm437_vm4, %v689_v55 }
 0x643   : > { %1118 = vmatpush3.bf16.msra.mxu1 %v819_v57  ;;  %1119 = vmatprep.mubr.msk.bf16.mxu1 %vm1197_vm1, %v1196_v21 }
 0x64a   : > { %1120 = vmatmul.mubr.msk.bf16.vlgmr.msra.gmra.mrb[20].mxu1 %vm437_vm4, %v812_v59 }
 0x70d   : > { %v609_v61 = vpop.f32.mrb[12].mxu1 }
 0x70e   : > { %v1051_v63 = vpack.c.bf16 %v609_v61, %v609_v61  ;;  %v1097_v0 = vpop.f32.mrb[13].mxu1 }
 0x70f   : > { %v612_v2 = vpop.f32.mrb[14].mxu1 }
 0x710   : > { %619 = vrot.lane.b32.xlu1 %v1051_v63, %s1200_s26  ;;  %v1098_v3 = vpop.f32.mrb[15].mxu1 }
 0x715   : > { %v732_v5 = vpop.f32.mrb[16].mxu1 }
 0x716   : > { %v1052_v7 = vpack.c.bf16 %v732_v5, %v732_v5  ;;  %v1109_v8 = vpop.f32.mrb[17].mxu1 }
 0x717   : > { %v735_v9 = vpop.f32.mrb[18].mxu1 }
 0x718   : > { %742 = vrot.lane.b32.xlu0 %v1052_v7, %s1199_s25  ;;  %v1110_v10 = vpop.f32.mrb[19].mxu1 }
 0x71d   : > { %v855_v11 = vpop.f32.mrb[20].mxu1 }
 0x71e   : > { %v1053_v12 = vpack.c.bf16 %v855_v11, %v855_v11  ;;  %v1121_v13 = vpop.f32.mrb[21].mxu1 }
 0x71f   : > { %v858_v14 = vpop.f32.mrb[22].mxu1 }
 0x720   : > { %865 = vrot.lane.b32.xlu1 %v1053_v12, %s1201_s8  ;;  %v1122_v15 = vpop.f32.mrb[23].mxu1 }
 0x782   : > { %v620_v16 = vpop.permute.xlu1 %619 }
 0x783   : > { %623 = vst.msk [vmem:[#allocation2] sm:$0xf] %vm622_vm6, %v620_v16 }
 0x78a   : > { %v743_v17 = vpop.permute.xlu0 %742 }
 0x78b   : > { %746 = vst.msk [vmem:[#allocation2] sm:$0xf] %vm745_vm7, %v743_v17 }
 0x792   : > { %v866_v21 = vpop.permute.xlu1 %865 }
 0x793   : > { %869 = vst.msk [vmem:[#allocation2] sm:$0xf] %vm868_vm8, %v866_v21 }
 0x79a   : > { %v870_v18 = vld [vmem:[#allocation2] sm:$0xf] }
 0x79b   : > { %1132 = vmatmul.mubr.msk.bf16.vlgmr.msra.gmra.mrb[12].mxu0 %vm266_vm0, %v870_v18 }
 0x86e   : > { %v940_v19 = vpop.f32.mrb[12].mxu0 }
 0x86f   : > { %v946_v20 = vadd.f32 %v940_v19, %v1256_v1  ;;  %v1133_v22 = vpop.f32.mrb[13].mxu0 }
 0x870   : > { %v943_v23 = vpop.f32.mrb[14].mxu0 }
 0x871   : > { %v947_v24 = vpack.c.bf16 %v946_v20, %v946_v20  ;;  %v1134_v25 = vpop.f32.mrb[15].mxu0 }
 0x873   : > { %949 = vst.msk [vmem:[%s260_s27] sm:$0xf] %vm948_vm9, %v947_v24 }
 0x874 PF: > { %s16_s21 = sadd.s32 1, %s1193_s21  }
 0x875   : > { %p13_p4 = scmp.ge.s32.totalorder %s16_s21, 4  }
 0x877   :  { %15 = sbr.rel (!%p13_p4) target bundleno = 1 (0x1), region = 80 }

// kernel: ditto_forward.16
= control target key start
LH: loop header
LB: loop body
LE: loop exit
PB: predicated region body
PF: predicated region fallthrough
CT: control target
= control target key end

     0   :  { %s1372_s24 = smov 0   ;;  %s1535_s0 = inlined_call_operand.vmem [shape: bf16[2,8,64], index: 0, kind: input, shape index: {}]   ;;  %s1536_s1 = inlined_call_operand.vmem [shape: bf16[2,8,64], index: 1, kind: input, shape index: {}]   ;;  %s1537_s2 = inlined_call_operand.vmem [shape: f32[1,64], index: 2, kind: input, shape index: {}]   ;;  %s1538_s3 = inlined_call_operand.vmem [shape: bf16[64,64], index: 3, kind: input, shape index: {}]   ;;  %s1539_s4 = inlined_call_operand.vmem [shape: bf16[64,128], index: 4, kind: input, shape index: {}]   ;;  %s1540_s5 = inlined_call_operand.vmem [shape: bf16[64,64], index: 5, kind: input, shape index: {}]   ;;  %s1541_s6 = inlined_call_operand.vmem [shape: f32[2,1,8], index: 6, kind: input, shape index: {}]   ;;  %s1542_s7 = inlined_call_operand.vmem [shape: bf16[2,8,64], index: 7, kind: output, shape index: {}]  }
   0x1 LB: > { %s1112_s25 = sadd.s32 4294967295, %s1321_s24   ;;  %p1116_p0 = scmp.ge.s32.totalorder %s1321_s24, 1  ;;  %s1321_s24 = sphi %s1372_s24, %s17_s24  }
   0x2   : > { %p253_p1 = scmp.lt.s32.totalorder %s1321_s24, 3 }
   0x4   : > { %p254_p2 = pnand %p1116_p0, %p253_p1 }
   0x5   : > { %p290_p3 = scmp.lt.s32.totalorder (!%p254_p2), %s1112_s25, 1  ;;  %v1285_v0 = vld [vmem:[%s1539_s4] sm:$0xff] (!%p254_p2)   ;;  %v1323_v1 = vmov (!%p254_p2), 0.0   ;;  %v1286_v2 = vld [vmem:[%s1539_s4 + $0x8] sm:$0xff] (!%p254_p2)   ;;  %vm311_vm0 = vcmask (!%p254_p2), 523264   ;;  %v1287_v7 = vld [vmem:[%s1539_s4 + $0x10] sm:$0xff] (!%p254_p2)  }
   0x6   : > { %257 = sbr.rel (%p254_p2) target bundleno = 1623 (0x657), region = 48  ;;  %1196 = vmatprep.subr.bf16.mxu1 (!%p254_p2), %v1323_v1  ;;  %1184 = vmatprep.subr.bf16.mxu0 (!%p254_p2), %v1323_v1  ;;  %v1288_v8 = vld [vmem:[%s1538_s3] sm:$0xff] (!%p254_p2)   ;;  %v1289_v9 = vld [vmem:[%s1539_s4 + $0x18] sm:$0xff] (!%p254_p2)   ;;  %vm1324_vm1 = vmmov (!%p254_p2), 0   ;;  %v1290_v10 = vld [vmem:[%s1538_s3 + $0x8] sm:$0xff] (!%p254_p2)   ;;  %vm487_vm2 = vcmask (!%p254_p2), 130048  }
   0x7   : > { %1197 = vmatpush3.bf16.msra.mxu1 (!%p254_p2), %v1285_v0  ;;  %1204 = vmatprep.mubr.msk.bf16.mxu1 (!%p254_p2), %vm1324_vm1, %v1323_v1  ;;  %v1291_v12 = vld [vmem:[%s1538_s3 + $0x10] sm:$0xff] (!%p254_p2)   ;;  %v1292_v13 = vld [vmem:[%s1538_s3 + $0x18] sm:$0xff] (!%p254_p2)   ;;  %v1120_v18 = vld [vmem:[%s1537_s2] ss:$0 sm:$0xff] (!%p254_p2)  ;;  %s1325_s8 = smov (!%p254_p2), 112   ;;  %s1326_s9 = smov (!%p254_p2), 96  }
   0x8   : > { %1198 = vmatprep.subr.bf16.mxu1 (!%p254_p2), %v1323_v1  ;;  %1192 = vmatprep.mubr.msk.bf16.mxu0 (!%p254_p2), %vm1324_vm1, %v1323_v1  ;;  %vm534_vm3 = vcmask (!%p254_p2), 64512   ;;  %s1329_s14 = smov (!%p254_p2), 32   ;;  %vm553_vm4 = vcmask (!%p254_p2), 1043456   ;;  %s1330_s15 = smov (!%p254_p2), 16   ;;  %vm598_vm5 = vcmask (!%p254_p2), 125952   ;;  %vm718_vm6 = vcmask (!%p254_p2), 257152  }
   0x9   : > { %1185 = vmatpush3.bf16.msra.mxu0 (!%p254_p2), %v1288_v8  ;;  %s1331_s16 = smov (!%p254_p2), 48   ;;  %vm837_vm7 = vcmask (!%p254_p2), 388352   ;;  %vm956_vm8 = vcmask (!%p254_p2), 519552   ;;  %vm1036_vm9 = vcmask (!%p254_p2), 519168  }
   0xa   : > { %1186 = vmatprep.subr.bf16.mxu0 (!%p254_p2), %v1323_v1 }
   0xb   : > { %1199 = vmatpush3.bf16.msra.mxu1 (!%p254_p2), %v1286_v2 }
   0xc   : > { %1200 = vmatprep.subr.bf16.mxu1 (!%p254_p2), %v1323_v1 }
   0xd   : > { %s1544_s25 = smov (!%p290_p3, %s1112_s25), 1  ;;  %1187 = vmatpush3.bf16.msra.mxu0 %v1290_v10 }
   0xe   : > { %s1392_s30 = sshll.u32 %s1544_s25, 2  ;;  %1188 = vmatprep.subr.bf16.mxu0 %v1323_v1  ;;  %s300_s13 = scalar_lea.vmem %s1541_s6, %s1544_s25 }
   0xf   : > { %s293_s10 = scalar_lea.vmem %s1535_s0, %s1392_s30  ;;  %1201 = vmatpush3.bf16.msra.mxu1 %v1287_v7  ;;  %s297_s19 = scalar_lea.vmem %s1536_s1, %s1392_s30  ;;  %v1131_v42 = vld [vmem:[%s300_s13] ss:$0 sm:$0xff] }
  0x10   : > { %v306_v3 = vld [vmem:[%s293_s10] sm:$0xf]  ;;  %1202 = vmatprep.subr.bf16.mxu1 %v1323_v1  ;;  %s1327_s10 = smov 80   ;;  %s1328_s25 = smov 64  }
  0x11   : > { %v1398_v4 = vunpack.c.l.bf16 %v306_v3  ;;  %v308_v11 = vld [vmem:[%s297_s19] sm:$0xf]  ;;  %1189 = vmatpush3.bf16.msra.mxu0 %v1291_v12  ;;  %s304_s29 = scalar_lea.vmem %s1542_s7, %s1392_s30 }
  0x12   : > { %1190 = vmatprep.subr.bf16.mxu0 %v1323_v1 }
  0x13   : > { %v310_v5 = vmul.f32 %v1398_v4, %v1398_v4  ;;  %1203 = vmatpush3.bf16.msra.mxu1 %v1289_v9 }
  0x14   : > { %1208 = vmatprep.subr.bf16.mxu1 %v1323_v1 }
  0x15   : > { %v312_v6 = vsel %vm311_vm0, %v310_v5, 0.0  ;;  %1191 = vmatpush3.bf16.msra.mxu0 %v1292_v13 }
  0x16   : > { %313 = vadd.xlane.f32.xlu0 %v312_v6  ;;  %1205 = vmatmul.mubr.msk.bf16.vlgmr.msra.gmra.mrb[0].mxu1 %vm311_vm0, %v308_v11 }
  0x17   : > { %1210 = vmatprep.mubr.msk.bf16.mxu1 %vm1324_vm1, %v1323_v1  ;;  %1220 = vmatprep.subr.bf16.mxu0 %v1323_v1 }
  0xa3   : > { %v314_v14 = vpop.xlane.xlu0 %313 }
  0xa4   : > { %v316_v15 = vmul.f32 0.015625, %v314_v14 }
  0xa6   : > { %v317_v16 = vadd.f32 1e-06, %v316_v15 }
  0xa8   : > { %1297 = vrsqrt.f32 %v317_v16 }
  0xb2   : > { %v1298_v17 = vpop.eup %1297 }
  0xb3   : > { %v319_v19 = vmul.f32 %v1298_v17, %v1398_v4 }
  0xb5   : > { %v326_v20 = vmul.f32 %v1120_v18, %v319_v19 }
  0xb7   : > { %v327_v21 = vpack.c.bf16 %v326_v20, %v326_v20 }
  0xb9   : > { %1193 = vmatmul.mubr.msk.bf16.vlgmr.msra.gmra.mrb[0].mxu0 %vm311_vm0, %v327_v21 }
  0xba   : > { %1222 = vmatprep.mubr.msk.bf16.mxu0 %vm1324_vm1, %v1323_v1 }
  0xe9   : > { %v472_v22 = vpop.f32.mrb[0].mxu1 }
  0xea   : > { %v1446_v23 = vpack.c.bf16 %v472_v22, %v472_v22  ;;  %v1206_v24 = vpop.f32.mrb[1].mxu1 }
  0xeb   : > { %v475_v25 = vpop.f32.mrb[2].mxu1 }
  0xec   : > { %v1207_v26 = vpop.f32.mrb[3].mxu1  ;;  %603 = vrot.lane.b32.xlu0 %v1446_v23, %s1325_s8  ;;  %722 = vrot.lane.b32.xlu1 %v1446_v23, %s1326_s9  ;;  %v492_v27 = vsel %vm487_vm2, %v1446_v23, 0 }
  0xed   : > { %1209 = vmatpush3.bf16.xpose.msra.mxu1 %v492_v27 }
  0xee   : > { %1214 = vmatprep.subr.bf16.mxu1 %v1323_v1 }
 0x15e   : > { %v604_v28 = vpop.permute.xlu0 %603  ;;  %v723_v35 = vpop.permute.xlu1 %722 }
 0x15f   : > { %v609_v29 = vsel %vm487_vm2, %v604_v28, 0  ;;  %v728_v37 = vsel %vm487_vm2, %v723_v35, 0 }
 0x160   : > { %1221 = vmatpush3.bf16.xpose.msra.mxu0 %v609_v29 }
 0x161   : > { %1232 = vmatprep.subr.bf16.mxu0 %v1323_v1 }
 0x18c   : > { %v397_v30 = vpop.f32.mrb[0].mxu0 }
 0x18d   : > { %v479_v31 = vpack.c.bf16 %v397_v30, %v397_v30  ;;  %v1194_v32 = vpop.f32.mrb[1].mxu0 }
 0x18e   : > { %v400_v33 = vpop.f32.mrb[2].mxu0 }
 0x18f   : > { %601 = vrot.lane.b32.xlu1 %v479_v31, %s1325_s8  ;;  %v1195_v34 = vpop.f32.mrb[3].mxu0  ;;  %1211 = vmatmul.mubr.msk.bf16.vlgmr.msra.gmra.mrb[4].mxu1 %vm487_vm2, %v479_v31 }
 0x190   : > { %1216 = vmatprep.mubr.msk.bf16.mxu1 %vm1324_vm1, %v1323_v1 }
 0x193   : > { %720 = vrot.lane.b32.xlu1 %v479_v31, %s1326_s9 }
 0x197   : > { %841 = vrot.lane.b32.xlu1 %v1446_v23, %s1327_s10 }
 0x19b   : > { %839 = vrot.lane.b32.xlu1 %v479_v31, %s1327_s10 }
 0x201   : > { %v602_v36 = vpop.permute.xlu1 %601 }
 0x202   : > { %1223 = vmatmul.mubr.msk.bf16.vlgmr.msra.gmra.mrb[4].mxu0 %vm487_vm2, %v602_v36 }
 0x203   : > { %1233 = vmatpush3.bf16.xpose.msra.mxu0 %v728_v37  ;;  %1234 = vmatprep.mubr.msk.bf16.mxu0 %vm1324_vm1, %v1323_v1 }
 0x204   : > { %1244 = vmatprep.subr.bf16.mxu0 %v1323_v1 }
 0x205   : > { %v721_v38 = vpop.permute.xlu1 %720 }
 0x209   : > { %v842_v39 = vpop.permute.xlu1 %841 }
 0x20a   : > { %v847_v40 = vsel %vm487_vm2, %v842_v39, 0  ;;  %1235 = vmatmul.mubr.msk.bf16.vlgmr.msra.gmra.mrb[8].mxu0 %vm487_vm2, %v721_v38 }
 0x20b   : > { %1245 = vmatpush3.bf16.xpose.msra.mxu0 %v847_v40  ;;  %1246 = vmatprep.mubr.msk.bf16.mxu0 %vm1324_vm1, %v1323_v1 }
 0x20c   : > { %1256 = vmatprep.subr.bf16.mxu0 %v1323_v1 }
 0x20d   : > { %v840_v41 = vpop.permute.xlu1 %839 }
 0x212   : > { %1247 = vmatmul.mubr.msk.bf16.vlgmr.msra.gmra.mrb[12].mxu0 %vm487_vm2, %v840_v41 }
 0x213   : > { %1264 = vmatprep.mubr.msk.bf16.mxu0 %vm1324_vm1, %v1323_v1 }
 0x262   : > { %v528_v43 = vpop.f32.mrb[4].mxu1 }
 0x263   : > { %v529_v44 = vadd.f32 %v1131_v42, %v528_v43  ;;  %v1212_v45 = vpop.f32.mrb[5].mxu1 }
 0x264   : > { %v531_v46 = vpop.f32.mrb[6].mxu1 }
 0x265   : > { %v1213_v47 = vpop.f32.mrb[7].mxu1  ;;  %v535_v48 = vsel %vm534_vm3, %v529_v44, -inf }
 0x266   : > { %536 = vmax.xlane.f32.xlu1 %v535_v48 }
 0x2d5   : > { %v645_v49 = vpop.f32.mrb[4].mxu0 }
 0x2d6   : > { %v646_v50 = vadd.f32 %v1131_v42, %v645_v49  ;;  %v1224_v51 = vpop.f32.mrb[5].mxu0 }
 0x2d7   : > { %v648_v52 = vpop.f32.mrb[6].mxu0 }
 0x2d8   : > { %v1225_v53 = vpop.f32.mrb[7].mxu0  ;;  %v651_v54 = vsel %vm534_vm3, %v646_v50, -inf }
 0x2d9   : > { %652 = vmax.xlane.f32.xlu0 %v651_v54  ;;  %v1293_v54 = vld [vmem:[%s1540_s5] sm:$0xff]  }
 0x2da   : > { %1257 = vmatpush3.bf16.msra.mxu0 %v1293_v54 }
 0x2db   : > { %1258 = vmatprep.subr.bf16.mxu0 %v1323_v1 }
 0x2dd   : > { %v764_v55 = vpop.f32.mrb[8].mxu0 }
 0x2de   : > { %v765_v56 = vadd.f32 %v1131_v42, %v764_v55  ;;  %v1236_v57 = vpop.f32.mrb[9].mxu0 }
 0x2df   : > { %v767_v58 = vpop.f32.mrb[10].mxu0 }
 0x2e0   : > { %v1237_v59 = vpop.f32.mrb[11].mxu0  ;;  %v770_v60 = vsel %vm534_vm3, %v765_v56, -inf }
 0x2e1   : > { %771 = vmax.xlane.f32.xlu1 %v770_v60 }
 0x2e5   : > { %v883_v61 = vpop.f32.mrb[12].mxu0 }
 0x2e6   : > { %v884_v62 = vadd.f32 %v1131_v42, %v883_v61  ;;  %v1248_v63 = vpop.f32.mrb[13].mxu0  ;;  %v1295_v61 = vld [vmem:[%s1540_s5 + $0x10] sm:$0xff]  }
 0x2e7   : > { %v886_v0 = vpop.f32.mrb[14].mxu0  ;;  %v1296_v63 = vld [vmem:[%s1540_s5 + $0x18] sm:$0xff]  }
 0x2e8   : > { %v1249_v2 = vpop.f32.mrb[15].mxu0  ;;  %v889_v3 = vsel %vm534_vm3, %v884_v62, -inf }
 0x2e9   : > { %890 = vmax.xlane.f32.xlu0 %v889_v3 }
 0x2f3   : > { %v537_v5 = vpop.xlane.xlu1 %536 }
 0x2f4   : > { %v538_v6 = vsub.f32 %v529_v44, %v537_v5 }
 0x2f6   : > { %v539_v7 = vmul.f32 1.442695, %v538_v6 }
 0x2f8   : > { %1299 = vpow2.f32 %v539_v7 }
 0x302   : > { %v1300_v8 = vpop.eup %1299 }
 0x303   : > { %v541_v9 = vsel %vm534_vm3, %v1300_v8, 0.0 }
 0x304   : > { %542 = vadd.xlane.f32.xlu1 %v541_v9 }
 0x315   : > { %548 = vrot.lane.b32.xlu1 %v1446_v23, %s1328_s25 }
 0x366   : > { %v653_v10 = vpop.xlane.xlu0 %652 }
 0x367   : > { %v654_v11 = vsub.f32 %v646_v50, %v653_v10 }
 0x369   : > { %v655_v12 = vmul.f32 1.442695, %v654_v11 }
 0x36b   : > { %1301 = vpow2.f32 %v655_v12 }
 0x36e   : > { %v772_v13 = vpop.xlane.xlu1 %771 }
 0x36f   : > { %v773_v14 = vsub.f32 %v765_v56, %v772_v13  ;;  %v1294_v56 = vld [vmem:[%s1540_s5 + $0x8] sm:$0xff]  }
 0x370   : > { %1259 = vmatpush3.bf16.msra.mxu0 %v1294_v56 }
 0x371   : > { %v774_v15 = vmul.f32 1.442695, %v773_v14  ;;  %1260 = vmatprep.subr.bf16.mxu0 %v1323_v1 }
 0x373   : > { %1303 = vpow2.f32 %v774_v15 }
 0x374   : > { %1261 = vmatpush3.bf16.msra.mxu0 %v1295_v61 }
 0x375   : > { %v1302_v16 = vpop.eup %1301  ;;  %1262 = vmatprep.subr.bf16.mxu0 %v1323_v1 }
 0x376   : > { %v891_v17 = vpop.xlane.xlu0 %890  ;;  %v657_v18 = vsel %vm534_vm3, %v1302_v16, 0.0 }
 0x377   : > { %v892_v19 = vsub.f32 %v884_v62, %v891_v17  ;;  %658 = vadd.xlane.f32.xlu0 %v657_v18 }
 0x378   : > { %1263 = vmatpush3.bf16.msra.mxu0 %v1296_v63 }
 0x379   : > { %v893_v20 = vmul.f32 1.442695, %v892_v19 }
 0x37b   : > { %1305 = vpow2.f32 %v893_v20 }
 0x37d   : > { %v1304_v21 = vpop.eup %1303 }
 0x37e   : > { %v776_v22 = vsel %vm534_vm3, %v1304_v21, 0.0 }
 0x37f   : > { %777 = vadd.xlane.f32.xlu1 %v776_v22 }
 0x385   : > { %v1306_v24 = vpop.eup %1305 }
 0x386   : > { %v895_v25 = vsel %vm534_vm3, %v1306_v24, 0.0 }
 0x387   : > { %896 = vadd.xlane.f32.xlu0 %v895_v25 }
 0x390   : > { %782 = vrot.lane.b32.xlu1 %v1446_v23, %s1329_s14 }
 0x391   : > { %v543_v26 = vpop.xlane.xlu1 %542 }
 0x392   : > { %1307 = vrcp.f32 %v543_v26 }
 0x394   : > { %901 = vrot.lane.b32.xlu1 %v1446_v23, %s1330_s15 }
 0x395   : > { %v549_v27 = vpop.permute.xlu1 %548 }
 0x396   : > { %v555_v28 = vsel %vm553_vm4, %v549_v27, 0 }
 0x397   : > { %1215 = vmatpush3.bf16.msra.mxu1 %v555_v28 }
 0x398   : > { %1226 = vmatprep.subr.bf16.mxu1 %v1323_v1 }
 0x39c   : > { %v1308_v29 = vpop.eup %1307 }
 0x39d   : > { %v545_v30 = vmul.f32 %v1308_v29, %v1300_v8  ;;  %663 = vrot.lane.b32.xlu0 %v1446_v23, %s1331_s16 }
 0x39f   : > { %v546_v31 = vpack.c.bf16 %v545_v30, %v545_v30 }
 0x3a1   : > { %1217 = vmatmul.mubr.msk.bf16.vlgmr.msra.gmra.mrb[8].mxu1 %vm534_vm3, %v546_v31 }
 0x3a2   : > { %1228 = vmatprep.mubr.msk.bf16.mxu1 %vm1324_vm1, %v1323_v1 }
 0x404   : > { %v659_v32 = vpop.xlane.xlu0 %658 }
 0x405   : > { %1309 = vrcp.f32 %v659_v32 }
 0x40c   : > { %v778_v33 = vpop.xlane.xlu1 %777 }
 0x40d   : > { %1311 = vrcp.f32 %v778_v33 }
 0x40f   : > { %v1310_v34 = vpop.eup %1309 }
 0x410   : > { %v661_v36 = vmul.f32 %v1310_v34, %v1302_v16  ;;  %v783_v39 = vpop.permute.xlu1 %782 }
 0x411   : > { %v788_v41 = vsel %vm553_vm4, %v783_v39, 0 }
 0x412   : > { %v662_v23 = vpack.c.bf16 %v661_v36, %v661_v36 }
 0x414   : > { %v897_v35 = vpop.xlane.xlu0 %896  ;;  %v902_v43 = vpop.permute.xlu1 %901 }
 0x415   : > { %1313 = vrcp.f32 %v897_v35  ;;  %v907_v46 = vsel %vm553_vm4, %v902_v43, 0 }
 0x417   : > { %v1312_v40 = vpop.eup %1311 }
 0x418   : > { %v664_v37 = vpop.permute.xlu0 %663  ;;  %v780_v42 = vmul.f32 %v1312_v40, %v1304_v21 }
 0x419   : > { %v669_v38 = vsel %vm553_vm4, %v664_v37, 0 }
 0x41a   : > { %1227 = vmatpush3.bf16.msra.mxu1 %v669_v38  ;;  %v781_v44 = vpack.c.bf16 %v780_v42, %v780_v42 }
 0x41b   : > { %1238 = vmatprep.subr.bf16.mxu1 %v1323_v1 }
 0x41d   : > { %1229 = vmatmul.mubr.msk.bf16.vlgmr.msra.gmra.mrb[12].mxu1 %vm534_vm3, %v662_v23 }
 0x41e   : > { %1239 = vmatpush3.bf16.msra.mxu1 %v788_v41  ;;  %1240 = vmatprep.mubr.msk.bf16.mxu1 %vm1324_vm1, %v1323_v1 }
 0x41f   : > { %1250 = vmatprep.subr.bf16.mxu1 %v1323_v1  ;;  %v1314_v45 = vpop.eup %1313 }
 0x420   : > { %v899_v47 = vmul.f32 %v1314_v45, %v1306_v24 }
 0x422   : > { %v900_v48 = vpack.c.bf16 %v899_v47, %v899_v47 }
 0x425   : > { %1241 = vmatmul.mubr.msk.bf16.vlgmr.msra.gmra.mrb[16].mxu1 %vm534_vm3, %v781_v44 }
 0x426   : > { %1251 = vmatpush3.bf16.msra.mxu1 %v907_v46  ;;  %1252 = vmatprep.mubr.msk.bf16.mxu1 %vm1324_vm1, %v1323_v1 }
 0x42d   : > { %1253 = vmatmul.mubr.msk.bf16.vlgmr.msra.gmra.mrb[20].mxu1 %vm534_vm3, %v900_v48 }
 0x474   : > { %v591_v49 = vpop.f32.mrb[8].mxu1 }
 0x475   : > { %v597_v50 = vpack.c.bf16 %v591_v49, %v591_v49  ;;  %v1218_v51 = vpop.f32.mrb[9].mxu1 }
 0x476   : > { %v594_v52 = vpop.f32.mrb[10].mxu1 }
 0x477   : > { %599 = vst.msk [vmem:[#allocation2] sm:$0xf] %vm598_vm5, %v597_v50  ;;  %v1219_v53 = vpop.f32.mrb[11].mxu1 }
 0x4f0   : > { %v705_v55 = vpop.f32.mrb[12].mxu1 }
 0x4f1   : > { %v1150_v57 = vpack.c.bf16 %v705_v55, %v705_v55  ;;  %v1230_v58 = vpop.f32.mrb[13].mxu1 }
 0x4f2   : > { %v708_v59 = vpop.f32.mrb[14].mxu1 }
 0x4f3   : > { %715 = vrot.lane.b32.xlu0 %v1150_v57, %s1330_s15  ;;  %v1231_v60 = vpop.f32.mrb[15].mxu1 }
 0x4f8   : > { %v824_v62 = vpop.f32.mrb[16].mxu1 }
 0x4f9   : > { %v1151_v0 = vpack.c.bf16 %v824_v62, %v824_v62  ;;  %v1242_v2 = vpop.f32.mrb[17].mxu1 }
 0x4fa   : > { %v827_v3 = vpop.f32.mrb[18].mxu1 }
 0x4fb   : > { %834 = vrot.lane.b32.xlu1 %v1151_v0, %s1329_s14  ;;  %v1243_v5 = vpop.f32.mrb[19].mxu1 }
 0x500   : > { %v943_v6 = vpop.f32.mrb[20].mxu1 }
 0x501   : > { %v1152_v7 = vpack.c.bf16 %v943_v6, %v943_v6  ;;  %v1254_v8 = vpop.f32.mrb[21].mxu1 }
 0x502   : > { %v946_v9 = vpop.f32.mrb[22].mxu1 }
 0x503   : > { %953 = vrot.lane.b32.xlu0 %v1152_v7, %s1331_s16  ;;  %v1255_v10 = vpop.f32.mrb[23].mxu1 }
 0x565   : > { %v716_v11 = vpop.permute.xlu0 %715 }
 0x566   : > { %719 = vst.msk [vmem:[#allocation2] sm:$0xf] %vm718_vm6, %v716_v11 }
 0x56d   : > { %v835_v12 = vpop.permute.xlu1 %834 }
 0x56e   : > { %838 = vst.msk [vmem:[#allocation2] sm:$0xf] %vm837_vm7, %v835_v12 }
 0x575   : > { %v954_v1 = vpop.permute.xlu0 %953 }
 0x576   : > { %957 = vst.msk [vmem:[#allocation2] sm:$0xf] %vm956_vm8, %v954_v1 }
 0x57d   : > { %v958_v13 = vld [vmem:[#allocation2] sm:$0xf] }
 0x57e   : > { %1265 = vmatmul.mubr.msk.bf16.vlgmr.msra.gmra.mrb[16].mxu0 %vm311_vm0, %v958_v13 }
 0x651   : > { %v1028_v14 = vpop.f32.mrb[16].mxu0 }
 0x652   : > { %v1034_v15 = vadd.f32 %v1028_v14, %v1398_v4  ;;  %v1266_v16 = vpop.f32.mrb[17].mxu0 }
 0x653   : > { %v1031_v17 = vpop.f32.mrb[18].mxu0 }
 0x654   : > { %v1035_v18 = vpack.c.bf16 %v1034_v15, %v1034_v15  ;;  %v1267_v19 = vpop.f32.mrb[19].mxu0 }
 0x656   : > { %1037 = vst.msk [vmem:[%s304_s29] sm:$0xf] %vm1036_vm9, %v1035_v18 }
 0x657 PF: > { %s17_s24 = sadd.s32 1, %s1321_s24  }
 0x658   : > { %p14_p4 = scmp.ge.s32.totalorder %s17_s24, 4  }
 0x65a   :  { %16 = sbr.rel (!%p14_p4) target bundleno = 1 (0x1), region = 84 }

// kernel: ditto_forward.21
= control target key start
LH: loop header
LB: loop body
LE: loop exit
PB: predicated region body
PF: predicated region fallthrough
CT: control target
= control target key end

     0   :  { %vm32_vm0 = vcmask 523264   ;;  %s759_s0 = inlined_call_operand.vmem [shape: bf16[16,64], index: 0, kind: input, shape index: {}]   ;;  %s760_s1 = inlined_call_operand.vmem [shape: f32[1,64], index: 1, kind: input, shape index: {}]   ;;  %s761_s2 = inlined_call_operand.vmem [shape: bf16[256,64], index: 2, kind: input, shape index: {}]   ;;  %s762_s3 = inlined_call_operand.vmem [shape: s32[16,1], index: 3, kind: input, shape index: {}]   ;;  %s763_s4 = inlined_call_operand.hbm [shape: bf16[16,256], index: 4, kind: output, shape index: {0}]   ;;  %s764_s5 = inlined_call_operand.vmem [shape: f32[16,128], index: 5, kind: output, shape index: {1}]  }
   0x1   :  { %v485_v0 = vld [vmem:[%s759_s0] sm:$0xff]   ;;  %v529_v7 = vld [vmem:[%s761_s2 + $0x48] sm:$0xff]   ;;  %v531_v13 = vld [vmem:[%s761_s2 + $0x50] sm:$0xff]  }
   0x2   :  { %v486_v1 = vunpack.c.l.bf16 %v485_v0  ;;  %v487_v2 = vunpack.c.h.bf16 %v485_v0  ;;  %v527_v3 = vld [vmem:[%s761_s2 + $0x40] sm:$0xff]   ;;  %v530_v10 = vld [vmem:[%s761_s2 + $0x8] sm:$0xff]   ;;  %v532_v14 = vld [vmem:[%s761_s2 + $0x10] sm:$0xff]  }
   0x3   :  { %v528_v4 = vld [vmem:[%s761_s2] sm:$0xff]   ;;  %506 = vmatprep.subr.msk.bf16.mxu0 %vm32_vm0, %v527_v3  ;;  %v188_v12 = vsel %vm32_vm0, %v530_v10, 0 }
   0x4   :  { %v30_v5 = vmul.f32 %v486_v1, %v486_v1  ;;  %v31_v6 = vmul.f32 %v487_v2, %v487_v2  ;;  %v185_v8 = vsel %vm32_vm0, %v528_v4, 0 }
   0x5   :  { %489 = vmatpush3.bf16.xpose.msra.mxu0 %v185_v8 }
   0x6   :  { %v33_v9 = vsel %vm32_vm0, %v30_v5, 0.0  ;;  %507 = vmatprep.subr.msk.bf16.mxu0 %vm32_vm0, %v529_v7  ;;  %v36_v11 = vsel %vm32_vm0, %v31_v6, 0.0 }
   0x7   :  { %34 = vadd.xlane.f32.xlu0 %v33_v9 }
   0xb   :  { %37 = vadd.xlane.f32.xlu0 %v36_v11 }
   0xd   :  { %491 = vmatpush3.bf16.xpose.msra.mxu0 %v188_v12 }
   0xe   :  { %508 = vmatprep.subr.msk.bf16.mxu0 %vm32_vm0, %v531_v13 }
   0xf   :  { %11 = vsyncpa [#allocation7], 0  ;;  %v191_v15 = vsel %vm32_vm0, %v532_v14, 0  ;;  %v533_v16 = vld [vmem:[%s761_s2 + $0x58] sm:$0xff]   ;;  %v535_v19 = vld [vmem:[%s761_s2 + $0x60] sm:$0xff]   ;;  %vm60_vm1 = vcmask 7168   ;;  %v275_v5 = vlaneseq }
  0x10   :  { %v534_v17 = vld [vmem:[%s761_s2 + $0x18] sm:$0xff]   ;;  %v536_v20 = vld [vmem:[%s761_s2 + $0x20] sm:$0xff]   ;;  %v537_v22 = vld [vmem:[%s761_s2 + $0x68] sm:$0xff]   ;;  %v587_v48 = vmov -inf   ;;  %v588_v57 = vmov 0   ;;  %v589_v58 = vmov 0.0  }
  0x11   :  { %v194_v18 = vsel %vm32_vm0, %v534_v17, 0  ;;  %v197_v21 = vsel %vm32_vm0, %v536_v20, 0  ;;  %v538_v23 = vld [vmem:[%s761_s2 + $0x28] sm:$0xff]   ;;  %v539_v25 = vld [vmem:[%s761_s2 + $0x70] sm:$0xff]   ;;  %v541_v28 = vld [vmem:[%s761_s2 + $0x78] sm:$0xff]   ;;  %61 = vst.msk [vmem:[#allocation3] sm:$0xff] %vm60_vm1, %v587_v48  ;;  %520 = vset.pattern.permute.xlu0 %v588_v57  ;;  %521 = vset.pattern.permute.xlu1 %v588_v57 }
  0x12   :  { %v200_v24 = vsel %vm32_vm0, %v538_v23, 0  ;;  %v540_v26 = vld [vmem:[%s761_s2 + $0x30] sm:$0xff]   ;;  %v542_v29 = vld [vmem:[%s761_s2 + $0x38] sm:$0xff]   ;;  %v460_v39 = vld [vmem:[%s760_s1] ss:$0 sm:$0xff]  ;;  %62 = vst.msk [vmem:[#allocation3 + $0x8] sm:$0xff] %vm60_vm1, %v587_v48 }
  0x13   :  { %v203_v27 = vsel %vm32_vm0, %v540_v26, 0  ;;  %v206_v30 = vsel %vm32_vm0, %v542_v29, 0  ;;  %63 = vst.msk [vmem:[#allocation4] sm:$0xff] %vm60_vm1, %v589_v58  ;;  %64 = vst.msk [vmem:[#allocation4 + $0x8] sm:$0xff] %vm60_vm1, %v589_v58  ;;  %v713_v3 = vld [vmem:[%s762_s3] sm:$0xff]  ;;  %v719_v4 = vld [vmem:[%s762_s3 + $0x8] sm:$0xff] }
  0x14   :  { %65 = vst.msk [vmem:[#allocation5] sm:$0xff] %vm60_vm1, %v589_v58  ;;  %66 = vst.msk [vmem:[#allocation5 + $0x8] sm:$0xff] %vm60_vm1, %v589_v58  ;;  %v722_v9 = vand.u32 127, %v275_v5  ;;  %vm389_vm6 = vcmp.ne.s32.totalorder %v719_v4, 4294967196  ;;  %vm388_vm7 = vcmp.ne.s32.totalorder %v713_v3, 4294967196  ;;  %s590_s3 = smov [#allocation6]  }
  0x15   :  { %493 = vmatpush3.bf16.xpose.msra.mxu0 %v191_v15  ;;  %s445_s29 = sshll.u32 %s590_s3, 4  ;;  %s446_s29 = int_to_ptr.vmem [resolvable:$true] %s445_s29 }
  0x16   :  { %509 = vmatprep.subr.msk.bf16.mxu0 %vm32_vm0, %v533_v16  ;;  %v277_v15 = vadd.s32 128, %v722_v9  ;;  %s563_s30 = scalar_lea.vmem %s446_s29, 256  ;;  %p568_p1 = scmp.lt.s32.totalorder %s446_s29, %s446_s29 }
  0x17   :  { %p564_p0 = scmp.ne.s32.totalorder %s446_s29, %s563_s30  ;;  %p569_p2 = scmp.lt.s32.totalorder %s563_s30, %s563_s30 }
  0x18   :  { %v331_v59 = vld [vmem:[#allocation3] sm:$0xff] }
  0x19   :  { %v332_v62 = vld [vmem:[#allocation3 + $0x8] sm:$0xff]  ;;  %p570_p3 = por %p569_p2, %p568_p1 }
  0x1b   :  { %p571_p4 = pnand %p570_p3, %p564_p0 }
  0x1d   :  { %495 = vmatpush3.bf16.xpose.msra.mxu0 %v194_v18 }
  0x1e   :  { %510 = vmatprep.subr.msk.bf16.mxu0 %vm32_vm0, %v535_v19 }
  0x25   :  { %497 = vmatpush3.bf16.xpose.msra.mxu0 %v197_v21 }
  0x26   :  { %511 = vmatprep.subr.msk.bf16.mxu0 %vm32_vm0, %v537_v22 }
  0x2d   :  { %499 = vmatpush3.bf16.xpose.msra.mxu0 %v200_v24 }
  0x2e   :  { %512 = vmatprep.subr.msk.bf16.mxu0 %vm32_vm0, %v539_v25 }
  0x35   :  { %501 = vmatpush3.bf16.xpose.msra.mxu0 %v203_v27 }
  0x36   :  { %513 = vmatprep.subr.msk.bf16.mxu0 %vm32_vm0, %v541_v28 }
  0x3d   :  { %503 = vmatpush3.bf16.xpose.msra.mxu0 %v206_v30 }
  0x94   :  { %v35_v31 = vpop.xlane.xlu0 %34 }
  0x95   :  { %v40_v32 = vmul.f32 0.015625, %v35_v31 }
  0x97   :  { %v42_v33 = vadd.f32 1e-06, %v40_v32 }
  0x98   :  { %v38_v34 = vpop.xlane.xlu0 %37 }
  0x99   :  { %543 = vrsqrt.f32 %v42_v33  ;;  %v41_v35 = vmul.f32 0.015625, %v38_v34 }
  0x9b   :  { %v43_v36 = vadd.f32 1e-06, %v41_v35  ;;  %v341_v35 = vld [vmem:[#allocation4] sm:$0xff] }
  0x9d   :  { %545 = vrsqrt.f32 %v43_v36 }
  0xa3   :  { %v544_v37 = vpop.eup %543 }
  0xa4   :  { %v46_v38 = vmul.f32 %v544_v37, %v486_v1 }
  0xa6   :  { %v54_v41 = vmul.f32 %v460_v39, %v46_v38 }
  0xa7   :  { %v546_v40 = vpop.eup %545 }
  0xa8   :  { %v47_v42 = vmul.f32 %v546_v40, %v487_v2  ;;  %v56_v44 = vmul.f32 0.125, %v54_v41  ;;  %v304_v41 = vld [vmem:[#allocation5] sm:$0xff] }
  0xaa   :  { %v55_v43 = vmul.f32 %v460_v39, %v47_v42  ;;  %v342_v39 = vld [vmem:[#allocation4 + $0x8] sm:$0xff] }
  0xac   :  { %v57_v45 = vmul.f32 0.125, %v55_v43 }
  0xae   :  { %v58_v46 = vpack.c.bf16 %v57_v45, %v56_v44 }
  0xb0   :  { %59 = vst.msk [vmem:[#allocation2] sm:$0xff] %vm32_vm0, %v58_v46 }
  0xb7   :  { %v67_v47 = vld [vmem:[#allocation2] sm:$0xff] }
  0xb8   :  { %504 = vmatprep.mubr.msk.bf16.mxu0 %vm32_vm0, %v67_v47 }
  0xb9   :  { %505 = vmatmul.mubr.msk.bf16.vlgmr.msra.gmra.mrb[0].mxu0 %vm32_vm0, %v67_v47  ;;  %v305_v47 = vld [vmem:[#allocation5 + $0x8] sm:$0xff] }
 0x18c   :  { %v266_v49 = vpop.f32.mrb[0].mxu0 }
 0x18d   :  { %v268_v50 = vpop.f32.mrb[1].mxu0 }
 0x18e   :  { %v482_v51 = vpack.c.bf16 %v268_v50, %v266_v49  ;;  %v270_v52 = vpop.f32.mrb[2].mxu0  ;;  %v333_v53 = vmax.f32 %v266_v49, %v268_v50 }
 0x18f   :  { %v272_v54 = vpop.f32.mrb[3].mxu0 }
 0x190   :  { %300 = vst [vmem:[#allocation6] sm:$0xff] %v482_v51  ;;  %v483_v55 = vpack.c.bf16 %v272_v54, %v270_v52  ;;  %334 = vmax.xlane.f32.xlu1 %v333_v53  ;;  %v336_v56 = vmax.f32 %v270_v52, %v272_v54 }
 0x192   :  { %301 = vst [vmem:[#allocation6 + $0x8] sm:$0xff] %v483_v55 }
 0x194   :  { %337 = vmax.xlane.f32.xlu1 %v336_v56 }
 0x21d   :  { %v335_v60 = vpop.xlane.xlu1 %334 }
 0x21e   :  { %v339_v61 = vmax.f32 %v331_v59, %v335_v60 }
 0x220   :  { %v343_v63 = vsub.f32 %v331_v59, %v339_v61  ;;  %383 = vst.msk [vmem:[#allocation3] sm:$0xff] %vm60_vm1, %v339_v61  ;;  %353 = vperm.xlu0 %520, %v339_v61   ;;  %v481_v59 = vsel %vm389_vm6, 1.0, %v589_v58  ;;  %v480_v61 = vsel %vm388_vm7, 1.0, %v589_v58 }
 0x221   :  { %v338_v0 = vpop.xlane.xlu1 %337 }
 0x222   :  { %v340_v1 = vmax.f32 %v332_v62, %v338_v0  ;;  %v345_v32 = vmul.f32 1.442695, %v343_v63 }
 0x224   :  { %v344_v2 = vsub.f32 %v332_v62, %v340_v1  ;;  %384 = vst.msk [vmem:[#allocation3 + $0x8] sm:$0xff] %vm60_vm1, %v340_v1  ;;  %358 = vperm.xlu1 %521, %v340_v1  }
 0x226   :  { %v347_v33 = vmul.f32 1.442695, %v344_v2  ;;  %v522_v2 = vpack.i.bf16 %v481_v59, %v480_v61 }
 0x228   :  { %307 = vperm.xlu1 %521, %v713_v3  }
 0x22b   :  { %v391_v63 = vld [vmem:[#allocation3 + $0x8] sm:$0xff] }
 0x22c   :  { %310 = vperm.xlu1 %521, %v719_v4  }
 0x29f   :  { %v354_v6 = vpop.permute.xlu0 %353 }
 0x2a0   :  { %v361_v7 = vsub.f32 %v266_v49, %v354_v6  ;;  %v362_v8 = vsub.f32 %v268_v50, %v354_v6 }
 0x2a2   :  { %v365_v10 = vmul.f32 1.442695, %v361_v7  ;;  %v367_v11 = vmul.f32 1.442695, %v362_v8 }
 0x2a3   :  { %v359_v12 = vpop.permute.xlu1 %358 }
 0x2a4   :  { %547 = vpow2.f32 %v365_v10  ;;  %v363_v13 = vsub.f32 %v270_v52, %v359_v12  ;;  %v364_v14 = vsub.f32 %v272_v54, %v359_v12 }
 0x2a5   :  { %549 = vpow2.f32 %v367_v11 }
 0x2a6   :  { %v369_v16 = vmul.f32 1.442695, %v363_v13  ;;  %v371_v17 = vmul.f32 1.442695, %v364_v14 }
 0x2a7   :  { %v308_v18 = vpop.permute.xlu1 %307 }
 0x2a8   :  { %551 = vpow2.f32 %v369_v16  ;;  %vm312_vm2 = vcmp.eq.s32.totalorder %v722_v9, %v308_v18  ;;  %vm313_vm3 = vcmp.eq.s32.totalorder %v277_v15, %v308_v18 }
 0x2a9   :  { %553 = vpow2.f32 %v371_v17  ;;  %v316_v19 = vsel %vm312_vm2, %v266_v49, 0.0  ;;  %v317_v20 = vsel %vm313_vm3, %v268_v50, 0.0 }
 0x2aa   :  { %v320_v21 = vadd.f32 %v317_v20, %v316_v19  ;;  %555 = vpow2.f32 %v345_v32 }
 0x2ab   :  { %v311_v22 = vpop.permute.xlu1 %310  ;;  %557 = vpow2.f32 %v347_v33 }
 0x2ac   :  { %vm314_vm4 = vcmp.eq.s32.totalorder %v722_v9, %v311_v22  ;;  %vm315_vm5 = vcmp.eq.s32.totalorder %v277_v15, %v311_v22 }
 0x2ad   :  { %v318_v23 = vsel %vm314_vm4, %v270_v52, 0.0  ;;  %v319_v24 = vsel %vm315_vm5, %v272_v54, 0.0  ;;  %v390_v54 = vld [vmem:[#allocation3] sm:$0xff] }
 0x2ae   :  { %v548_v25 = vpop.eup %547  ;;  %v323_v26 = vadd.f32 %v319_v24, %v318_v23 }
 0x2af   :  { %v550_v27 = vpop.eup %549 }
 0x2b0   :  { %v373_v28 = vadd.f32 %v550_v27, %v548_v25 }
 0x2b2   :  { %v552_v29 = vpop.eup %551  ;;  %374 = vadd.xlane.f32.xlu1 %v373_v28 }
 0x2b3   :  { %v554_v30 = vpop.eup %553 }
 0x2b4   :  { %v376_v31 = vadd.f32 %v554_v30, %v552_v29  ;;  %v556_v34 = vpop.eup %555 }
 0x2b5   :  { %v349_v36 = vmul.f32 %v556_v34, %v341_v35  ;;  %v558_v37 = vpop.eup %557 }
 0x2b6   :  { %377 = vadd.xlane.f32.xlu0 %v376_v31  ;;  %321 = vadd.xlane.f32.xlu1 %v320_v21  ;;  %v350_v42 = vmul.f32 %v558_v37, %v342_v39 }
 0x2ba   :  { %324 = vadd.xlane.f32.xlu1 %v323_v26 }
 0x33f   :  { %v375_v38 = vpop.xlane.xlu1 %374 }
 0x340   :  { %v379_v40 = vadd.f32 %v375_v38, %v349_v36 }
 0x342   :  { %381 = vst.msk [vmem:[#allocation4] sm:$0xff] %vm60_vm1, %v379_v40 }
 0x343   :  { %v378_v43 = vpop.xlane.xlu0 %377  ;;  %v322_v44 = vpop.xlane.xlu1 %321 }
 0x344   :  { %v380_v45 = vadd.f32 %v378_v43, %v350_v42  ;;  %v326_v46 = vadd.f32 %v322_v44, %v304_v41 }
 0x346   :  { %382 = vst.msk [vmem:[#allocation4 + $0x8] sm:$0xff] %vm60_vm1, %v380_v45  ;;  %329 = vst.msk [vmem:[#allocation5] sm:$0xff] %vm60_vm1, %v326_v46 }
 0x347   :  { %v325_v48 = vpop.xlane.xlu1 %324 }
 0x348   :  { %v327_v49 = vadd.f32 %v325_v48, %v305_v47 }
 0x349   :  { %v392_v50 = vld [vmem:[#allocation4] sm:$0xff] }
 0x34a   :  { %330 = vst.msk [vmem:[#allocation5 + $0x8] sm:$0xff] %vm60_vm1, %v327_v49  ;;  %559 = vlog2.f32 %v392_v50 }
 0x34d   :  { %v393_v51 = vld [vmem:[#allocation4 + $0x8] sm:$0xff]  ;;  %v400_v57 = vld [vmem:[#allocation5] sm:$0xff] }
 0x34e   :  { %561 = vlog2.f32 %v393_v51 }
 0x351   :  { %v401_v5 = vld [vmem:[#allocation5 + $0x8] sm:$0xff] }
 0x354   :  { %v560_v52 = vpop.eup %559 }
 0x355   :  { %v395_v53 = vmul.f32 0.6931472, %v560_v52 }
 0x357   :  { %v398_v55 = vadd.f32 %v395_v53, %v390_v54 }
 0x358   :  { %v562_v56 = vpop.eup %561 }
 0x359   :  { %v402_v60 = vsub.f32 %v398_v55, %v400_v57  ;;  %v397_v62 = vmul.f32 0.6931472, %v562_v56 }
 0x35b   :  { %v404_v0 = vsel %vm388_vm7, %v402_v60, 0.0  ;;  %v399_v1 = vadd.f32 %v397_v62, %v391_v63 }
 0x35c   :  { %413 = vperm.xlu1 %521, %v404_v0  }
 0x35d   :  { %v403_v6 = vsub.f32 %v399_v1, %v401_v5 }
 0x35f   :  { %v405_v7 = vsel %vm389_vm6, %v403_v6, 0.0 }
 0x360   :  { %523 = vperm.xlu1 %521, %v522_v2   ;;  %418 = vperm.xlu0 %520, %v405_v7  }
 0x361   :  { %574 = shalt.err (!%p571_p4)
}
 0x362   :  { %s575_s8 = scalar_lea.hbm %s763_s4, 256 }
 0x363   :  { %p576_p5 = scmp.ne.s32.totalorder %s763_s4, %s575_s8  ;;  %p579_p6 = scmp.lt.u32.totalorder %s575_s8, %s763_s4 }
 0x365   :  { %p581_p7 = pnand %p579_p6, %p576_p5 }
 0x367   :  { %584 = shalt.err (!%p581_p7)
}
 0x368   :  { %s591_s13 = smov 128   ;;  %s592_s14 = smov 8   ;;  %vm410_vm8 = vcmp.eq.s32.totalorder %v722_v9, 0  ;;  %vm423_vm9 = vcmp.eq.s32.totalorder %v722_v9, 1 }
 0x369   :  { %451 = dma.vmem_to_hbm [thread:$0]  %s446_s29, 256, %s763_s4, [#allocation7], %s591_s13, %s591_s13, %s592_s14  }
 0x3db   :  { %v414_v58 = vpop.permute.xlu1 %413 }
 0x3dc   :  { %v421_v11 = vsel %vm410_vm8, %v414_v58, 0.0 }
 0x3df   :  { %v524_v3 = vpop.permute.xlu1 %523  ;;  %v419_v4 = vpop.permute.xlu0 %418 }
 0x3e0   :  { %v526_v8 = vunpack.i.h.bf16 %v524_v3  ;;  %v525_v10 = vunpack.i.l.bf16 %v524_v3  ;;  %v422_v14 = vsel %vm410_vm8, %v419_v4, 0.0 }
 0x3e2   :  { %v434_v12 = vsel %vm423_vm9, %v525_v10, 0.0  ;;  %v435_v13 = vsel %vm423_vm9, %v526_v8, 0.0 }
 0x3e3   :  { %v436_v15 = vadd.f32 %v434_v12, %v421_v11  ;;  %v437_v16 = vadd.f32 %v435_v13, %v422_v14 }
 0x3e5   :  { %438 = vst [vmem:[%s764_s5] sm:$0xff] %v436_v15  ;;  %439 = vst [vmem:[%s764_s5 + $0x8] sm:$0xff] %v437_v16 }
 0x3e6   :  { %585 = dma.done.wait [#allocation7], 256  }
 0x3e7   :  { %586 = vsyncadd [#allocation7], 4294967040 }
 0x3e8   :  { %459 = vsyncpa [#allocation7], 1 }

</bundles_post_ra>
